<compile_context>
chip_gen: v7x
topology: tpu7x:2x2x1
jax: 0.10.0
libtpu: 0.0.40
codegen_flags: <defaults>
</compile_context>

<pallas_src>
import functools

import numpy as np
import jax
import jax.numpy as jnp
from jax import lax
from jax.experimental import pallas as pl
from jax.experimental.pallas import tpu as pltpu


# ----------------------------- small helpers ------------------------------

def _round_up(x, m):
    return (x + m - 1) // m * m


def _support_size(t, p, p_max, n):
    """Number of protected (non-shrunk) entries per row at layer t (static int)."""
    return int(min(p * t, p_max) * n)


def _shrink(x, beta, k, n_pad):
    """PyTorch _shrink: keep the top-k |x| entries per row (ties included via
    >= threshold), soft-threshold the rest with lambda = beta.

    k is a tiny static int, so the k-th largest |x| (== descending-sort value
    at position k-1, duplicates counted) is found exactly by removing one
    occurrence of the current row max (k-1) times and taking the remaining
    max.  Each step is two cheap XLU lane reductions; the XLU is otherwise
    idle, and no O(N^2) intermediate is materialized.
    """
    if k <= 0:
        # torch path: threshold 0 -> mask all-True -> x unchanged.
        return x
    abs_x = jnp.abs(x)                                         # (tb, Np) f32
    if k == 1:
        thresh = jnp.max(abs_x, axis=-1, keepdims=True)
    else:
        # f32 column index (exact for small ints) -> only f32 lane reductions.
        col = lax.broadcasted_iota(jnp.int32, abs_x.shape, 1).astype(jnp.float32)
        sentinel = float(n_pad)
        work = abs_x
        for _ in range(k - 1):                                  # static unroll, k-1 <= ~23
            m = jnp.max(work, axis=-1, keepdims=True)           # current row max
            hit = work == m
            # first (lowest-index) occurrence of the max
            idx = jnp.min(jnp.where(hit, col, sentinel), axis=-1, keepdims=True)
            # remove exactly that one occurrence (|x| >= 0, so -1 never wins)
            work = jnp.where(col == idx, -1.0, work)
        thresh = jnp.max(work, axis=-1, keepdims=True)          # k-th largest
    mask = abs_x >= thresh
    # beta * softshrink(x / beta, lambd=1) == x - clip(x, -beta, beta)
    x_shr = x - jnp.clip(x, -beta, beta)
    return jnp.where(mask, x, x_shr)


# --------------------------------- kernel ----------------------------------

def lista_cpss_kernel(y_ref, At_ref, W_hbm, beta_ref, x_ref, w_buf, w_sem,
                      *, T, p, p_max, n_orig):
    # y      (tb, Mp)        f32   VMEM batch tile (lane-dense, zero-padded M)
    # At     (Np, Mp)        wdt   VMEM, grid-invariant (pre-transposed A)
    # W_hbm  (T+1, Mp, Np)   wdt   HBM (memory_space=ANY) -> per-layer DMA
    # beta   (T+1,)          f32   SMEM scalars
    # x out  (tb, Np)        f32   VMEM, lane-dense output tile
    # w_buf  (2, Mp, Np)     wdt   VMEM scratch, double-buffered layer weights
    # w_sem  DMA((2,))             per-slot DMA semaphores
    N_pad = x_ref.shape[-1]
    wdt = w_buf.dtype                           # matmul operand dtype (bf16)

    def w_copy(t, slot):
        return pltpu.make_async_copy(W_hbm.at[t], w_buf.at[slot], w_sem.at[slot])

    # Prime the per-layer weight pipeline: W[0] -> slot 0, W[1] -> slot 1.
    w_copy(0, 0).start()
    if T >= 1:
        w_copy(1, 1).start()

    y = y_ref[...]                              # f32, kept for the residual subtraction
    y_lo = y.astype(wdt)
    At = At_ref[...]

    # h = Ws[0](y) = y @ (A / norm)
    w_copy(0, 0).wait()
    h = jnp.dot(y_lo, w_buf[0], preferred_element_type=jnp.float32)
    x = _shrink(h, beta_ref[0], _support_size(1, p, p_max, n_orig), N_pad)

    for t in range(1, T + 1):                   # T static -> unrolled at trace time
        slot = t & 1
        # Prefetch W[t+1] into the buffer layer t-1 just finished using; the
        # DMA hides behind the previous shrink + the residual matmul below.
        if t + 1 <= T:
            w_copy(t + 1, 1 - slot).start()
        # residual = x @ A^T - y   (A pre-transposed, zero-padded: exact)
        resid = jnp.dot(x.astype(wdt), At, preferred_element_type=jnp.float32) - y
        w_copy(t, slot).wait()
        upd = jnp.dot(resid.astype(wdt), w_buf[slot],
                      preferred_element_type=jnp.float32)
        x = _shrink(x - upd, beta_ref[t], _support_size(t, p, p_max, n_orig), N_pad)

    x_ref[...] = x


# -------------------------------- wrapper -----------------------------------

def _pick_vmem_limit():
    """Generation-aware scoped-VMEM limit: ~3/4 of capacity, capped at 100 MiB
    (v5e/v6e: 96 MiB, v7x: 48 MiB).  Falls back to 64 MiB if unqueryable."""
    cap = None
    try:
        info = pltpu.get_tpu_info()
        cap = getattr(info, "vmem_capacity_bytes", None)
    except Exception:
        cap = None
    if not cap:
        cap = 64 * 1024 * 1024
    return int(min(100 * 1024 * 1024, (int(cap) * 3) // 4))


def lista_cpss_forward(y, A, W_stack, betas, *, T=5, p=0.012, p_max=0.12,
                       weight_dtype=jnp.bfloat16, batch_tile=None,
                       vmem_limit_bytes=None):
    B, M = y.shape
    M2, N = A.shape
    assert M2 == M and W_stack.shape == (T + 1, M, N) and betas.shape == (T + 1,)

    # ---- host-side prep: lane-dense padding + bf16 matmul operands ----
    M_pad = _round_up(M, 128)
    N_pad = _round_up(N, 128)
    A_t = jnp.zeros((N_pad, M_pad), weight_dtype).at[:N, :M].set(
        jnp.asarray(A.T, dtype=weight_dtype))                       # (Np, Mp)
    W = jnp.zeros((T + 1, M_pad, N_pad), weight_dtype).at[:, :M, :N].set(
        W_stack.astype(weight_dtype))                               # (T+1, Mp, Np)
    betas = betas.astype(jnp.float32)

    # ---- batch tiling: multiple of 8; >= 2 grid steps once B >= 16 so the
    # "parallel" axis spans both TensorCores on v7x ----
    if batch_tile is not None:
        tb = int(batch_tile)
        assert tb % 8 == 0, "batch_tile must be a multiple of 8"
    else:
        B8 = _round_up(B, 8)
        tb = min(128, B8)
        if B8 >= 16:
            tb = min(tb, max(8, (B8 // 2) // 8 * 8))
    B_pad = _round_up(B, tb)
    y_p = jnp.zeros((B_pad, M_pad), jnp.float32).at[:B, :M].set(
        y.astype(jnp.float32))

    grid_steps = B_pad // tb
    flops = 2 * B_pad * M_pad * N_pad * (1 + 2 * T)
    bytes_accessed = (B_pad * M_pad * 4 + B_pad * N_pad * 4
                      + N_pad * M_pad * 2
                      + grid_steps * (T + 1) * M_pad * N_pad * 2)
    if vmem_limit_bytes is None:
        vmem_limit_bytes = _pick_vmem_limit()

    kernel = functools.partial(lista_cpss_kernel, T=T, p=p, p_max=p_max, n_orig=N)
    out = pl.pallas_call(
        kernel,
        out_shape=jax.ShapeDtypeStruct((B_pad, N_pad), jnp.float32),
        grid=(grid_steps,),
        in_specs=[
            pl.BlockSpec((tb, M_pad), lambda b: (b, 0)),            # y batch tile
            pl.BlockSpec((N_pad, M_pad), lambda b: (0, 0)),         # A^T (grid-invariant)
            pl.BlockSpec(memory_space=pl.ANY),                      # W stack stays in HBM
            pl.BlockSpec(memory_space=pltpu.MemorySpace.SMEM),      # betas (scalars)
        ],
        out_specs=pl.BlockSpec((tb, N_pad), lambda b: (b, 0)),      # x batch tile
        scratch_shapes=[
            pltpu.VMEM((2, M_pad, N_pad), weight_dtype),            # per-layer W double buffer
            pltpu.SemaphoreType.DMA((2,)),
        ],
        compiler_params=pltpu.CompilerParams(
            dimension_semantics=("parallel",),                      # batch tiles independent
            vmem_limit_bytes=vmem_limit_bytes,
        ),
        cost_estimate=pl.CostEstimate(flops=flops, transcendentals=0,
                                      bytes_accessed=bytes_accessed),
    )(y_p, A_t, W, betas)
    return out[:B, :N]


# ------------------------- pure-JAX reference check ------------------------

def reference_forward(y, A, W_stack, betas, *, T, p, p_max,
                      weight_dtype=jnp.bfloat16):
    """Pure-JAX reference mirroring the kernel's mixed precision (matmul operands
    quantized to weight_dtype, f32 accumulation, f32 shrink/threshold math)."""
    hi = lax.Precision.HIGHEST
    N = A.shape[1]
    q = lambda z: z.astype(weight_dtype).astype(jnp.float32)
    A_t = q(A.T)
    W = q(W_stack)

    def shrink(x, beta, t):
        k = _support_size(t, p, p_max, N)
        if k <= 0:
            return x
        abs_x = jnp.abs(x)
        sorted_desc = -jnp.sort(-abs_x, axis=-1)
        thresh = sorted_desc[:, k - 1:k]
        mask = abs_x >= thresh
        x_shr = x - jnp.clip(x, -beta, beta)
        return jnp.where(mask, x, x_shr)

    h = jnp.dot(q(y), W[0], precision=hi)
    x = shrink(h, betas[0], 1)
    for t in range(1, T + 1):
        resid = jnp.dot(q(x), A_t, precision=hi) - y
        upd = jnp.dot(q(resid), W[t], precision=hi)
        x = shrink(x - upd, betas[t], t)
    return x


# ----------------------------------- main -----------------------------------

if __name__ == "__main__":
    # Small but non-trivial shapes: M=32 -> padded to 128, N=200 -> padded to
    # 256, B=16 -> two batch tiles of 8 (grid length 2 for megacore).
    B, M, N, T = 16, 32, 200, 5
    p, p_max, beta0 = 0.012, 0.12, 0.1

    key = jax.random.PRNGKey(0)
    k_a, k_y = jax.random.split(key)
    A = jax.random.normal(k_a, (M, N), dtype=jnp.float32) / jnp.sqrt(M)
    y = jax.random.normal(k_y, (B, M), dtype=jnp.float32)

    # Deterministic parameter init mirroring __init__ (plain-JAX glue).
    norm = 1.001 * jnp.linalg.norm(A.T @ A, ord=2)       # spectral norm of A^T A
    W_eff = (A / norm).astype(jnp.float32)               # effective Linear op: z @ (A/norm)
    W_stack = jnp.tile(W_eff[None], (T + 1, 1, 1))       # (T+1, M, N): per-layer params (tied at init)
    betas = jnp.full((T + 1,), beta0 / norm, dtype=jnp.float32)

    x = lista_cpss_forward(y, A, W_stack, betas, T=T, p=p, p_max=p_max,
                           weight_dtype=jnp.bfloat16)
    x = jax.block_until_ready(x)

    x_ref = reference_forward(y, A, W_stack, betas, T=T, p=p, p_max=p_max,
                              weight_dtype=jnp.bfloat16)
    diff = float(jnp.max(jnp.abs(x - x_ref)))
    assert np.isfinite(np.asarray(x)).all(), "non-finite output"
    assert diff < 5e-2, f"kernel/reference mismatch: max|diff|={diff}"

    # TODO(synk): the S-conditioned loss/NMSE bookkeeping (self.losses,
    # est_powers, compute_nmse_inference) is host-side stateful accounting and
    # is not part of the kernel.
    print("KERNEL_OK")
</pallas_src>

<mosaic_0001>
module attributes {stable_mosaic.version = 11 : i64} {
  func.func @lista_cpss_kernel(%arg0: i32, %arg1: memref<8x128xf32, #tpu.memory_space<vmem>>, %arg2: memref<256x128xbf16, #tpu.memory_space<vmem>>, %arg3: memref<6x128x256xbf16, #tpu.memory_space<any>>, %arg4: memref<6xf32, #tpu.memory_space<smem>>, %arg5: memref<8x256xf32, #tpu.memory_space<vmem>>, %arg6: memref<2x128x256xbf16, #tpu.memory_space<vmem>>, %arg7: memref<2x!tpu.dma_semaphore, #tpu.memory_space<semaphore_mem>>) attributes {dimension_semantics = [#tpu.dimension_semantics<parallel>], iteration_bounds = array<i64: 2>, scalar_prefetch = 0 : i64, scratch_operands = 2 : i64, tpu.core_type = #tpu.core_type<tc>, window_params = [{transform_indices = @transform_0, window_bounds = array<i64: 8, 128>}, {pipeline_mode = #tpu.pipeline_mode<synchronous>, transform_indices = @transform_1, window_bounds = array<i64: 256, 128>}, {}, {transform_indices = @transform_3, window_bounds = array<i64: 6>}, {transform_indices = @transform_4, window_bounds = array<i64: 8, 256>}]} {
    %c0_i32 = arith.constant 0 : i32
    %c0_i32_0 = arith.constant 0 : i32
    %c0_i32_1 = arith.constant 0 : i32
    %c0_i32_2 = arith.constant 0 : i32
    %c0_i32_3 = arith.constant 0 : i32
    %0 = tpu.memref_slice %arg3[%c0_i32, %c0_i32_2, %c0_i32_3] : memref<6x128x256xbf16, #tpu.memory_space<any>> -> memref<1x128x256xbf16, #tpu.memory_space<any>>
    %1 = tpu.memref_squeeze %0 : memref<1x128x256xbf16, #tpu.memory_space<any>> -> memref<128x256xbf16, #tpu.memory_space<any>>
    %c0_i32_4 = arith.constant 0 : i32
    %c0_i32_5 = arith.constant 0 : i32
    %2 = tpu.memref_slice %arg6[%c0_i32_0, %c0_i32_4, %c0_i32_5] : memref<2x128x256xbf16, #tpu.memory_space<vmem>> -> memref<1x128x256xbf16, #tpu.memory_space<vmem>>
    %3 = tpu.memref_squeeze %2 : memref<1x128x256xbf16, #tpu.memory_space<vmem>> -> memref<128x256xbf16, #tpu.memory_space<vmem>>
    %4 = tpu.memref_slice %arg7[%c0_i32_1] : memref<2x!tpu.dma_semaphore, #tpu.memory_space<semaphore_mem>> -> memref<1x!tpu.dma_semaphore, #tpu.memory_space<semaphore_mem>>
    %5 = tpu.memref_squeeze %4 : memref<1x!tpu.dma_semaphore, #tpu.memory_space<semaphore_mem>> -> memref<!tpu.dma_semaphore, #tpu.memory_space<semaphore_mem>>
    tpu.enqueue_dma source(%1 : memref<128x256xbf16, #tpu.memory_space<any>>) target(%3 : memref<128x256xbf16, #tpu.memory_space<vmem>>) target_semaphore(%5 : memref<!tpu.dma_semaphore, #tpu.memory_space<semaphore_mem>>)
    %c1_i32 = arith.constant 1 : i32
    %c1_i32_6 = arith.constant 1 : i32
    %c1_i32_7 = arith.constant 1 : i32
    %c0_i32_8 = arith.constant 0 : i32
    %c0_i32_9 = arith.constant 0 : i32
    %6 = tpu.memref_slice %arg3[%c1_i32, %c0_i32_8, %c0_i32_9] : memref<6x128x256xbf16, #tpu.memory_space<any>> -> memref<1x128x256xbf16, #tpu.memory_space<any>>
    %7 = tpu.memref_squeeze %6 : memref<1x128x256xbf16, #tpu.memory_space<any>> -> memref<128x256xbf16, #tpu.memory_space<any>>
    %c0_i32_10 = arith.constant 0 : i32
    %c0_i32_11 = arith.constant 0 : i32
    %8 = tpu.memref_slice %arg6[%c1_i32_6, %c0_i32_10, %c0_i32_11] : memref<2x128x256xbf16, #tpu.memory_space<vmem>> -> memref<1x128x256xbf16, #tpu.memory_space<vmem>>
    %9 = tpu.memref_squeeze %8 : memref<1x128x256xbf16, #tpu.memory_space<vmem>> -> memref<128x256xbf16, #tpu.memory_space<vmem>>
    %10 = tpu.memref_slice %arg7[%c1_i32_7] : memref<2x!tpu.dma_semaphore, #tpu.memory_space<semaphore_mem>> -> memref<1x!tpu.dma_semaphore, #tpu.memory_space<semaphore_mem>>
    %11 = tpu.memref_squeeze %10 : memref<1x!tpu.dma_semaphore, #tpu.memory_space<semaphore_mem>> -> memref<!tpu.dma_semaphore, #tpu.memory_space<semaphore_mem>>
    tpu.enqueue_dma source(%7 : memref<128x256xbf16, #tpu.memory_space<any>>) target(%9 : memref<128x256xbf16, #tpu.memory_space<vmem>>) target_semaphore(%11 : memref<!tpu.dma_semaphore, #tpu.memory_space<semaphore_mem>>)
    %c0 = arith.constant 0 : index
    %c0_12 = arith.constant 0 : index
    %12 = vector.load %arg1[%c0, %c0_12] : memref<8x128xf32, #tpu.memory_space<vmem>>, vector<8x128xf32>
    %13 = arith.truncf %12 : vector<8x128xf32> to vector<8x128xbf16>
    %c0_13 = arith.constant 0 : index
    %c0_14 = arith.constant 0 : index
    %14 = vector.load %arg2[%c0_13, %c0_14] : memref<256x128xbf16, #tpu.memory_space<vmem>>, vector<256x128xbf16>
    %c0_i32_15 = arith.constant 0 : i32
    %c0_i32_16 = arith.constant 0 : i32
    %c0_i32_17 = arith.constant 0 : i32
    %c0_i32_18 = arith.constant 0 : i32
    %c0_i32_19 = arith.constant 0 : i32
    %15 = tpu.memref_slice %arg3[%c0_i32_15, %c0_i32_18, %c0_i32_19] : memref<6x128x256xbf16, #tpu.memory_space<any>> -> memref<1x128x256xbf16, #tpu.memory_space<any>>
    %16 = tpu.memref_squeeze %15 : memref<1x128x256xbf16, #tpu.memory_space<any>> -> memref<128x256xbf16, #tpu.memory_space<any>>
    %c0_i32_20 = arith.constant 0 : i32
    %c0_i32_21 = arith.constant 0 : i32
    %17 = tpu.memref_slice %arg6[%c0_i32_16, %c0_i32_20, %c0_i32_21] : memref<2x128x256xbf16, #tpu.memory_space<vmem>> -> memref<1x128x256xbf16, #tpu.memory_space<vmem>>
    %18 = tpu.memref_squeeze %17 : memref<1x128x256xbf16, #tpu.memory_space<vmem>> -> memref<128x256xbf16, #tpu.memory_space<vmem>>
    %19 = tpu.memref_slice %arg7[%c0_i32_17] : memref<2x!tpu.dma_semaphore, #tpu.memory_space<semaphore_mem>> -> memref<1x!tpu.dma_semaphore, #tpu.memory_space<semaphore_mem>>
    %20 = tpu.memref_squeeze %19 : memref<1x!tpu.dma_semaphore, #tpu.memory_space<semaphore_mem>> -> memref<!tpu.dma_semaphore, #tpu.memory_space<semaphore_mem>>
    tpu.wait_dma2 semaphore(%20 : memref<!tpu.dma_semaphore, #tpu.memory_space<semaphore_mem>>) src(%16 : memref<128x256xbf16, #tpu.memory_space<any>>) dst(%18 : memref<128x256xbf16, #tpu.memory_space<vmem>>)
    %c0_22 = arith.constant 0 : index
    %c0_23 = arith.constant 0 : index
    %c0_24 = arith.constant 0 : index
    %21 = vector.load %arg6[%c0_22, %c0_23, %c0_24] : memref<2x128x256xbf16, #tpu.memory_space<vmem>>, vector<1x128x256xbf16>
    %22 = vector.shape_cast %21 : vector<1x128x256xbf16> to vector<128x256xbf16>
    %cst = arith.constant dense<0.000000e+00> : vector<8x256xf32>
    %23 = tpu.matmul %13, %22, %cst {dimension_numbers = #tpu.dot_dimension_numbers<[1], [0], [0], [1], [0, 0, 1, 1], [], []>} : vector<8x128xbf16>, vector<128x256xbf16>, vector<8x256xf32> -> vector<8x256xf32>
    %c0_25 = arith.constant 0 : index
    %24 = memref.load %arg4[%c0_25] : memref<6xf32, #tpu.memory_space<smem>>
    %25 = math.absf %23 : vector<8x256xf32>
    %26 = tpu.iota {dimensions = array<i32: 1>} : vector<8x256xi32>
    %27 = arith.sitofp %26 : vector<8x256xi32> to vector<8x256xf32>
    %cst_26 = arith.constant dense<0xFF800000> : vector<8xf32>
    %28 = vector.multi_reduction <maximumf>, %25, %cst_26 [1] : vector<8x256xf32> to vector<8xf32>
    %29 = vector.shape_cast %28 : vector<8xf32> to vector<8x1xf32>
    %30 = vector.broadcast %29 : vector<8x1xf32> to vector<8x256xf32>
    %31 = arith.cmpf oeq, %25, %30 : vector<8x256xf32>
    %cst_27 = arith.constant 2.560000e+02 : f32
    %32 = vector.broadcast %cst_27 : f32 to vector<8x256xf32>
    %33 = arith.select %31, %27, %32 : vector<8x256xi1>, vector<8x256xf32>
    %cst_28 = arith.constant dense<0x7F800000> : vector<8xf32>
    %34 = vector.multi_reduction <minimumf>, %33, %cst_28 [1] : vector<8x256xf32> to vector<8xf32>
    %35 = vector.shape_cast %34 : vector<8xf32> to vector<8x1xf32>
    %36 = vector.broadcast %35 : vector<8x1xf32> to vector<8x256xf32>
    %37 = arith.cmpf oeq, %27, %36 : vector<8x256xf32>
    %cst_29 = arith.constant -1.000000e+00 : f32
    %38 = vector.broadcast %cst_29 : f32 to vector<8x256xf32>
    %39 = arith.select %37, %38, %25 : vector<8x256xi1>, vector<8x256xf32>
    %cst_30 = arith.constant dense<0xFF800000> : vector<8xf32>
    %40 = vector.multi_reduction <maximumf>, %39, %cst_30 [1] : vector<8x256xf32> to vector<8xf32>
    %41 = vector.shape_cast %40 : vector<8xf32> to vector<8x1xf32>
    %42 = vector.broadcast %41 : vector<8x1xf32> to vector<8x256xf32>
    %43 = arith.cmpf oge, %25, %42 : vector<8x256xf32>
    %cst_31 = arith.constant 0.000000e+00 : f32
    %44 = arith.subf %cst_31, %24 : f32
    %45 = vector.broadcast %44 : f32 to vector<8x256xf32>
    %46 = arith.maximumf %45, %23 : vector<8x256xf32>
    %47 = vector.broadcast %24 : f32 to vector<8x256xf32>
    %48 = arith.minimumf %47, %46 : vector<8x256xf32>
    %49 = arith.subf %23, %48 : vector<8x256xf32>
    %50 = arith.select %43, %23, %49 : vector<8x256xi1>, vector<8x256xf32>
    %c2_i32 = arith.constant 2 : i32
    %c0_i32_32 = arith.constant 0 : i32
    %c0_i32_33 = arith.constant 0 : i32
    %c0_i32_34 = arith.constant 0 : i32
    %c0_i32_35 = arith.constant 0 : i32
    %51 = tpu.memref_slice %arg3[%c2_i32, %c0_i32_34, %c0_i32_35] : memref<6x128x256xbf16, #tpu.memory_space<any>> -> memref<1x128x256xbf16, #tpu.memory_space<any>>
    %52 = tpu.memref_squeeze %51 : memref<1x128x256xbf16, #tpu.memory_space<any>> -> memref<128x256xbf16, #tpu.memory_space<any>>
    %c0_i32_36 = arith.constant 0 : i32
    %c0_i32_37 = arith.constant 0 : i32
    %53 = tpu.memref_slice %arg6[%c0_i32_32, %c0_i32_36, %c0_i32_37] : memref<2x128x256xbf16, #tpu.memory_space<vmem>> -> memref<1x128x256xbf16, #tpu.memory_space<vmem>>
    %54 = tpu.memref_squeeze %53 : memref<1x128x256xbf16, #tpu.memory_space<vmem>> -> memref<128x256xbf16, #tpu.memory_space<vmem>>
    %55 = tpu.memref_slice %arg7[%c0_i32_33] : memref<2x!tpu.dma_semaphore, #tpu.memory_space<semaphore_mem>> -> memref<1x!tpu.dma_semaphore, #tpu.memory_space<semaphore_mem>>
    %56 = tpu.memref_squeeze %55 : memref<1x!tpu.dma_semaphore, #tpu.memory_space<semaphore_mem>> -> memref<!tpu.dma_semaphore, #tpu.memory_space<semaphore_mem>>
    tpu.enqueue_dma source(%52 : memref<128x256xbf16, #tpu.memory_space<any>>) target(%54 : memref<128x256xbf16, #tpu.memory_space<vmem>>) target_semaphore(%56 : memref<!tpu.dma_semaphore, #tpu.memory_space<semaphore_mem>>)
    %57 = arith.truncf %50 : vector<8x256xf32> to vector<8x256xbf16>
    %cst_38 = arith.constant dense<0.000000e+00> : vector<8x128xf32>
    %58 = tpu.matmul %57, %14, %cst_38 {dimension_numbers = #tpu.dot_dimension_numbers<[1], [0], [0], [1], [0, 0, 1, 1], [], []>} : vector<8x256xbf16>, vector<256x128xbf16>, vector<8x128xf32> -> vector<8x128xf32>
    %59 = arith.subf %58, %12 : vector<8x128xf32>
    %c1_i32_39 = arith.constant 1 : i32
    %c1_i32_40 = arith.constant 1 : i32
    %c1_i32_41 = arith.constant 1 : i32
    %c0_i32_42 = arith.constant 0 : i32
    %c0_i32_43 = arith.constant 0 : i32
    %60 = tpu.memref_slice %arg3[%c1_i32_39, %c0_i32_42, %c0_i32_43] : memref<6x128x256xbf16, #tpu.memory_space<any>> -> memref<1x128x256xbf16, #tpu.memory_space<any>>
    %61 = tpu.memref_squeeze %60 : memref<1x128x256xbf16, #tpu.memory_space<any>> -> memref<128x256xbf16, #tpu.memory_space<any>>
    %c0_i32_44 = arith.constant 0 : i32
    %c0_i32_45 = arith.constant 0 : i32
    %62 = tpu.memref_slice %arg6[%c1_i32_40, %c0_i32_44, %c0_i32_45] : memref<2x128x256xbf16, #tpu.memory_space<vmem>> -> memref<1x128x256xbf16, #tpu.memory_space<vmem>>
    %63 = tpu.memref_squeeze %62 : memref<1x128x256xbf16, #tpu.memory_space<vmem>> -> memref<128x256xbf16, #tpu.memory_space<vmem>>
    %64 = tpu.memref_slice %arg7[%c1_i32_41] : memref<2x!tpu.dma_semaphore, #tpu.memory_space<semaphore_mem>> -> memref<1x!tpu.dma_semaphore, #tpu.memory_space<semaphore_mem>>
    %65 = tpu.memref_squeeze %64 : memref<1x!tpu.dma_semaphore, #tpu.memory_space<semaphore_mem>> -> memref<!tpu.dma_semaphore, #tpu.memory_space<semaphore_mem>>
    tpu.wait_dma2 semaphore(%65 : memref<!tpu.dma_semaphore, #tpu.memory_space<semaphore_mem>>) src(%61 : memref<128x256xbf16, #tpu.memory_space<any>>) dst(%63 : memref<128x256xbf16, #tpu.memory_space<vmem>>)
    %66 = arith.truncf %59 : vector<8x128xf32> to vector<8x128xbf16>
    %c1 = arith.constant 1 : index
    %c0_46 = arith.constant 0 : index
    %c0_47 = arith.constant 0 : index
    %67 = vector.load %arg6[%c1, %c0_46, %c0_47] : memref<2x128x256xbf16, #tpu.memory_space<vmem>>, vector<1x128x256xbf16>
    %68 = vector.shape_cast %67 : vector<1x128x256xbf16> to vector<128x256xbf16>
    %cst_48 = arith.constant dense<0.000000e+00> : vector<8x256xf32>
    %69 = tpu.matmul %66, %68, %cst_48 {dimension_numbers = #tpu.dot_dimension_numbers<[1], [0], [0], [1], [0, 0, 1, 1], [], []>} : vector<8x128xbf16>, vector<128x256xbf16>, vector<8x256xf32> -> vector<8x256xf32>
    %70 = arith.subf %50, %69 : vector<8x256xf32>
    %c1_49 = arith.constant 1 : index
    %71 = memref.load %arg4[%c1_49] : memref<6xf32, #tpu.memory_space<smem>>
    %72 = math.absf %70 : vector<8x256xf32>
    %73 = tpu.iota {dimensions = array<i32: 1>} : vector<8x256xi32>
    %74 = arith.sitofp %73 : vector<8x256xi32> to vector<8x256xf32>
    %cst_50 = arith.constant dense<0xFF800000> : vector<8xf32>
    %75 = vector.multi_reduction <maximumf>, %72, %cst_50 [1] : vector<8x256xf32> to vector<8xf32>
    %76 = vector.shape_cast %75 : vector<8xf32> to vector<8x1xf32>
    %77 = vector.broadcast %76 : vector<8x1xf32> to vector<8x256xf32>
    %78 = arith.cmpf oeq, %72, %77 : vector<8x256xf32>
    %cst_51 = arith.constant 2.560000e+02 : f32
    %79 = vector.broadcast %cst_51 : f32 to vector<8x256xf32>
    %80 = arith.select %78, %74, %79 : vector<8x256xi1>, vector<8x256xf32>
    %cst_52 = arith.constant dense<0x7F800000> : vector<8xf32>
    %81 = vector.multi_reduction <minimumf>, %80, %cst_52 [1] : vector<8x256xf32> to vector<8xf32>
    %82 = vector.shape_cast %81 : vector<8xf32> to vector<8x1xf32>
    %83 = vector.broadcast %82 : vector<8x1xf32> to vector<8x256xf32>
    %84 = arith.cmpf oeq, %74, %83 : vector<8x256xf32>
    %cst_53 = arith.constant -1.000000e+00 : f32
    %85 = vector.broadcast %cst_53 : f32 to vector<8x256xf32>
    %86 = arith.select %84, %85, %72 : vector<8x256xi1>, vector<8x256xf32>
    %cst_54 = arith.constant dense<0xFF800000> : vector<8xf32>
    %87 = vector.multi_reduction <maximumf>, %86, %cst_54 [1] : vector<8x256xf32> to vector<8xf32>
    %88 = vector.shape_cast %87 : vector<8xf32> to vector<8x1xf32>
    %89 = vector.broadcast %88 : vector<8x1xf32> to vector<8x256xf32>
    %90 = arith.cmpf oge, %72, %89 : vector<8x256xf32>
    %cst_55 = arith.constant 0.000000e+00 : f32
    %91 = arith.subf %cst_55, %71 : f32
    %92 = vector.broadcast %91 : f32 to vector<8x256xf32>
    %93 = arith.maximumf %92, %70 : vector<8x256xf32>
    %94 = vector.broadcast %71 : f32 to vector<8x256xf32>
    %95 = arith.minimumf %94, %93 : vector<8x256xf32>
    %96 = arith.subf %70, %95 : vector<8x256xf32>
    %97 = arith.select %90, %70, %96 : vector<8x256xi1>, vector<8x256xf32>
    %c3_i32 = arith.constant 3 : i32
    %c1_i32_56 = arith.constant 1 : i32
    %c1_i32_57 = arith.constant 1 : i32
    %c0_i32_58 = arith.constant 0 : i32
    %c0_i32_59 = arith.constant 0 : i32
    %98 = tpu.memref_slice %arg3[%c3_i32, %c0_i32_58, %c0_i32_59] : memref<6x128x256xbf16, #tpu.memory_space<any>> -> memref<1x128x256xbf16, #tpu.memory_space<any>>
    %99 = tpu.memref_squeeze %98 : memref<1x128x256xbf16, #tpu.memory_space<any>> -> memref<128x256xbf16, #tpu.memory_space<any>>
    %c0_i32_60 = arith.constant 0 : i32
    %c0_i32_61 = arith.constant 0 : i32
    %100 = tpu.memref_slice %arg6[%c1_i32_56, %c0_i32_60, %c0_i32_61] : memref<2x128x256xbf16, #tpu.memory_space<vmem>> -> memref<1x128x256xbf16, #tpu.memory_space<vmem>>
    %101 = tpu.memref_squeeze %100 : memref<1x128x256xbf16, #tpu.memory_space<vmem>> -> memref<128x256xbf16, #tpu.memory_space<vmem>>
    %102 = tpu.memref_slice %arg7[%c1_i32_57] : memref<2x!tpu.dma_semaphore, #tpu.memory_space<semaphore_mem>> -> memref<1x!tpu.dma_semaphore, #tpu.memory_space<semaphore_mem>>
    %103 = tpu.memref_squeeze %102 : memref<1x!tpu.dma_semaphore, #tpu.memory_space<semaphore_mem>> -> memref<!tpu.dma_semaphore, #tpu.memory_space<semaphore_mem>>
    tpu.enqueue_dma source(%99 : memref<128x256xbf16, #tpu.memory_space<any>>) target(%101 : memref<128x256xbf16, #tpu.memory_space<vmem>>) target_semaphore(%103 : memref<!tpu.dma_semaphore, #tpu.memory_space<semaphore_mem>>)
    %104 = arith.truncf %97 : vector<8x256xf32> to vector<8x256xbf16>
    %cst_62 = arith.constant dense<0.000000e+00> : vector<8x128xf32>
    %105 = tpu.matmul %104, %14, %cst_62 {dimension_numbers = #tpu.dot_dimension_numbers<[1], [0], [0], [1], [0, 0, 1, 1], [], []>} : vector<8x256xbf16>, vector<256x128xbf16>, vector<8x128xf32> -> vector<8x128xf32>
    %106 = arith.subf %105, %12 : vector<8x128xf32>
    %c2_i32_63 = arith.constant 2 : i32
    %c0_i32_64 = arith.constant 0 : i32
    %c0_i32_65 = arith.constant 0 : i32
    %c0_i32_66 = arith.constant 0 : i32
    %c0_i32_67 = arith.constant 0 : i32
    %107 = tpu.memref_slice %arg3[%c2_i32_63, %c0_i32_66, %c0_i32_67] : memref<6x128x256xbf16, #tpu.memory_space<any>> -> memref<1x128x256xbf16, #tpu.memory_space<any>>
    %108 = tpu.memref_squeeze %107 : memref<1x128x256xbf16, #tpu.memory_space<any>> -> memref<128x256xbf16, #tpu.memory_space<any>>
    %c0_i32_68 = arith.constant 0 : i32
    %c0_i32_69 = arith.constant 0 : i32
    %109 = tpu.memref_slice %arg6[%c0_i32_64, %c0_i32_68, %c0_i32_69] : memref<2x128x256xbf16, #tpu.memory_space<vmem>> -> memref<1x128x256xbf16, #tpu.memory_space<vmem>>
    %110 = tpu.memref_squeeze %109 : memref<1x128x256xbf16, #tpu.memory_space<vmem>> -> memref<128x256xbf16, #tpu.memory_space<vmem>>
    %111 = tpu.memref_slice %arg7[%c0_i32_65] : memref<2x!tpu.dma_semaphore, #tpu.memory_space<semaphore_mem>> -> memref<1x!tpu.dma_semaphore, #tpu.memory_space<semaphore_mem>>
    %112 = tpu.memref_squeeze %111 : memref<1x!tpu.dma_semaphore, #tpu.memory_space<semaphore_mem>> -> memref<!tpu.dma_semaphore, #tpu.memory_space<semaphore_mem>>
    tpu.wait_dma2 semaphore(%112 : memref<!tpu.dma_semaphore, #tpu.memory_space<semaphore_mem>>) src(%108 : memref<128x256xbf16, #tpu.memory_space<any>>) dst(%110 : memref<128x256xbf16, #tpu.memory_space<vmem>>)
    %113 = arith.truncf %106 : vector<8x128xf32> to vector<8x128xbf16>
    %c0_70 = arith.constant 0 : index
    %c0_71 = arith.constant 0 : index
    %c0_72 = arith.constant 0 : index
    %114 = vector.load %arg6[%c0_70, %c0_71, %c0_72] : memref<2x128x256xbf16, #tpu.memory_space<vmem>>, vector<1x128x256xbf16>
    %115 = vector.shape_cast %114 : vector<1x128x256xbf16> to vector<128x256xbf16>
    %cst_73 = arith.constant dense<0.000000e+00> : vector<8x256xf32>
    %116 = tpu.matmul %113, %115, %cst_73 {dimension_numbers = #tpu.dot_dimension_numbers<[1], [0], [0], [1], [0, 0, 1, 1], [], []>} : vector<8x128xbf16>, vector<128x256xbf16>, vector<8x256xf32> -> vector<8x256xf32>
    %117 = arith.subf %97, %116 : vector<8x256xf32>
    %c2 = arith.constant 2 : index
    %118 = memref.load %arg4[%c2] : memref<6xf32, #tpu.memory_space<smem>>
    %119 = math.absf %117 : vector<8x256xf32>
    %120 = tpu.iota {dimensions = array<i32: 1>} : vector<8x256xi32>
    %121 = arith.sitofp %120 : vector<8x256xi32> to vector<8x256xf32>
    %cst_74 = arith.constant dense<0xFF800000> : vector<8xf32>
    %122 = vector.multi_reduction <maximumf>, %119, %cst_74 [1] : vector<8x256xf32> to vector<8xf32>
    %123 = vector.shape_cast %122 : vector<8xf32> to vector<8x1xf32>
    %124 = vector.broadcast %123 : vector<8x1xf32> to vector<8x256xf32>
    %125 = arith.cmpf oeq, %119, %124 : vector<8x256xf32>
    %cst_75 = arith.constant 2.560000e+02 : f32
    %126 = vector.broadcast %cst_75 : f32 to vector<8x256xf32>
    %127 = arith.select %125, %121, %126 : vector<8x256xi1>, vector<8x256xf32>
    %cst_76 = arith.constant dense<0x7F800000> : vector<8xf32>
    %128 = vector.multi_reduction <minimumf>, %127, %cst_76 [1] : vector<8x256xf32> to vector<8xf32>
    %129 = vector.shape_cast %128 : vector<8xf32> to vector<8x1xf32>
    %130 = vector.broadcast %129 : vector<8x1xf32> to vector<8x256xf32>
    %131 = arith.cmpf oeq, %121, %130 : vector<8x256xf32>
    %cst_77 = arith.constant -1.000000e+00 : f32
    %132 = vector.broadcast %cst_77 : f32 to vector<8x256xf32>
    %133 = arith.select %131, %132, %119 : vector<8x256xi1>, vector<8x256xf32>
    %cst_78 = arith.constant dense<0xFF800000> : vector<8xf32>
    %134 = vector.multi_reduction <maximumf>, %133, %cst_78 [1] : vector<8x256xf32> to vector<8xf32>
    %135 = vector.shape_cast %134 : vector<8xf32> to vector<8x1xf32>
    %136 = vector.broadcast %135 : vector<8x1xf32> to vector<8x256xf32>
    %137 = arith.cmpf oeq, %133, %136 : vector<8x256xf32>
    %cst_79 = arith.constant 2.560000e+02 : f32
    %138 = vector.broadcast %cst_79 : f32 to vector<8x256xf32>
    %139 = arith.select %137, %121, %138 : vector<8x256xi1>, vector<8x256xf32>
    %cst_80 = arith.constant dense<0x7F800000> : vector<8xf32>
    %140 = vector.multi_reduction <minimumf>, %139, %cst_80 [1] : vector<8x256xf32> to vector<8xf32>
    %141 = vector.shape_cast %140 : vector<8xf32> to vector<8x1xf32>
    %142 = vector.broadcast %141 : vector<8x1xf32> to vector<8x256xf32>
    %143 = arith.cmpf oeq, %121, %142 : vector<8x256xf32>
    %cst_81 = arith.constant -1.000000e+00 : f32
    %144 = vector.broadcast %cst_81 : f32 to vector<8x256xf32>
    %145 = arith.select %143, %144, %133 : vector<8x256xi1>, vector<8x256xf32>
    %cst_82 = arith.constant dense<0xFF800000> : vector<8xf32>
    %146 = vector.multi_reduction <maximumf>, %145, %cst_82 [1] : vector<8x256xf32> to vector<8xf32>
    %147 = vector.shape_cast %146 : vector<8xf32> to vector<8x1xf32>
    %148 = vector.broadcast %147 : vector<8x1xf32> to vector<8x256xf32>
    %149 = arith.cmpf oeq, %145, %148 : vector<8x256xf32>
    %cst_83 = arith.constant 2.560000e+02 : f32
    %150 = vector.broadcast %cst_83 : f32 to vector<8x256xf32>
    %151 = arith.select %149, %121, %150 : vector<8x256xi1>, vector<8x256xf32>
    %cst_84 = arith.constant dense<0x7F800000> : vector<8xf32>
    %152 = vector.multi_reduction <minimumf>, %151, %cst_84 [1] : vector<8x256xf32> to vector<8xf32>
    %153 = vector.shape_cast %152 : vector<8xf32> to vector<8x1xf32>
    %154 = vector.broadcast %153 : vector<8x1xf32> to vector<8x256xf32>
    %155 = arith.cmpf oeq, %121, %154 : vector<8x256xf32>
    %cst_85 = arith.constant -1.000000e+00 : f32
    %156 = vector.broadcast %cst_85 : f32 to vector<8x256xf32>
    %157 = arith.select %155, %156, %145 : vector<8x256xi1>, vector<8x256xf32>
    %cst_86 = arith.constant dense<0xFF800000> : vector<8xf32>
    %158 = vector.multi_reduction <maximumf>, %157, %cst_86 [1] : vector<8x256xf32> to vector<8xf32>
    %159 = vector.shape_cast %158 : vector<8xf32> to vector<8x1xf32>
    %160 = vector.broadcast %159 : vector<8x1xf32> to vector<8x256xf32>
    %161 = arith.cmpf oge, %119, %160 : vector<8x256xf32>
    %cst_87 = arith.constant 0.000000e+00 : f32
    %162 = arith.subf %cst_87, %118 : f32
    %163 = vector.broadcast %162 : f32 to vector<8x256xf32>
    %164 = arith.maximumf %163, %117 : vector<8x256xf32>
    %165 = vector.broadcast %118 : f32 to vector<8x256xf32>
    %166 = arith.minimumf %165, %164 : vector<8x256xf32>
    %167 = arith.subf %117, %166 : vector<8x256xf32>
    %168 = arith.select %161, %117, %167 : vector<8x256xi1>, vector<8x256xf32>
    %c4_i32 = arith.constant 4 : i32
    %c0_i32_88 = arith.constant 0 : i32
    %c0_i32_89 = arith.constant 0 : i32
    %c0_i32_90 = arith.constant 0 : i32
    %c0_i32_91 = arith.constant 0 : i32
    %169 = tpu.memref_slice %arg3[%c4_i32, %c0_i32_90, %c0_i32_91] : memref<6x128x256xbf16, #tpu.memory_space<any>> -> memref<1x128x256xbf16, #tpu.memory_space<any>>
    %170 = tpu.memref_squeeze %169 : memref<1x128x256xbf16, #tpu.memory_space<any>> -> memref<128x256xbf16, #tpu.memory_space<any>>
    %c0_i32_92 = arith.constant 0 : i32
    %c0_i32_93 = arith.constant 0 : i32
    %171 = tpu.memref_slice %arg6[%c0_i32_88, %c0_i32_92, %c0_i32_93] : memref<2x128x256xbf16, #tpu.memory_space<vmem>> -> memref<1x128x256xbf16, #tpu.memory_space<vmem>>
    %172 = tpu.memref_squeeze %171 : memref<1x128x256xbf16, #tpu.memory_space<vmem>> -> memref<128x256xbf16, #tpu.memory_space<vmem>>
    %173 = tpu.memref_slice %arg7[%c0_i32_89] : memref<2x!tpu.dma_semaphore, #tpu.memory_space<semaphore_mem>> -> memref<1x!tpu.dma_semaphore, #tpu.memory_space<semaphore_mem>>
    %174 = tpu.memref_squeeze %173 : memref<1x!tpu.dma_semaphore, #tpu.memory_space<semaphore_mem>> -> memref<!tpu.dma_semaphore, #tpu.memory_space<semaphore_mem>>
    tpu.enqueue_dma source(%170 : memref<128x256xbf16, #tpu.memory_space<any>>) target(%172 : memref<128x256xbf16, #tpu.memory_space<vmem>>) target_semaphore(%174 : memref<!tpu.dma_semaphore, #tpu.memory_space<semaphore_mem>>)
    %175 = arith.truncf %168 : vector<8x256xf32> to vector<8x256xbf16>
    %cst_94 = arith.constant dense<0.000000e+00> : vector<8x128xf32>
    %176 = tpu.matmul %175, %14, %cst_94 {dimension_numbers = #tpu.dot_dimension_numbers<[1], [0], [0], [1], [0, 0, 1, 1], [], []>} : vector<8x256xbf16>, vector<256x128xbf16>, vector<8x128xf32> -> vector<8x128xf32>
    %177 = arith.subf %176, %12 : vector<8x128xf32>
    %c3_i32_95 = arith.constant 3 : i32
    %c1_i32_96 = arith.constant 1 : i32
    %c1_i32_97 = arith.constant 1 : i32
    %c0_i32_98 = arith.constant 0 : i32
    %c0_i32_99 = arith.constant 0 : i32
    %178 = tpu.memref_slice %arg3[%c3_i32_95, %c0_i32_98, %c0_i32_99] : memref<6x128x256xbf16, #tpu.memory_space<any>> -> memref<1x128x256xbf16, #tpu.memory_space<any>>
    %179 = tpu.memref_squeeze %178 : memref<1x128x256xbf16, #tpu.memory_space<any>> -> memref<128x256xbf16, #tpu.memory_space<any>>
    %c0_i32_100 = arith.constant 0 : i32
    %c0_i32_101 = arith.constant 0 : i32
    %180 = tpu.memref_slice %arg6[%c1_i32_96, %c0_i32_100, %c0_i32_101] : memref<2x128x256xbf16, #tpu.memory_space<vmem>> -> memref<1x128x256xbf16, #tpu.memory_space<vmem>>
    %181 = tpu.memref_squeeze %180 : memref<1x128x256xbf16, #tpu.memory_space<vmem>> -> memref<128x256xbf16, #tpu.memory_space<vmem>>
    %182 = tpu.memref_slice %arg7[%c1_i32_97] : memref<2x!tpu.dma_semaphore, #tpu.memory_space<semaphore_mem>> -> memref<1x!tpu.dma_semaphore, #tpu.memory_space<semaphore_mem>>
    %183 = tpu.memref_squeeze %182 : memref<1x!tpu.dma_semaphore, #tpu.memory_space<semaphore_mem>> -> memref<!tpu.dma_semaphore, #tpu.memory_space<semaphore_mem>>
    tpu.wait_dma2 semaphore(%183 : memref<!tpu.dma_semaphore, #tpu.memory_space<semaphore_mem>>) src(%179 : memref<128x256xbf16, #tpu.memory_space<any>>) dst(%181 : memref<128x256xbf16, #tpu.memory_space<vmem>>)
    %184 = arith.truncf %177 : vector<8x128xf32> to vector<8x128xbf16>
    %c1_102 = arith.constant 1 : index
    %c0_103 = arith.constant 0 : index
    %c0_104 = arith.constant 0 : index
    %185 = vector.load %arg6[%c1_102, %c0_103, %c0_104] : memref<2x128x256xbf16, #tpu.memory_space<vmem>>, vector<1x128x256xbf16>
    %186 = vector.shape_cast %185 : vector<1x128x256xbf16> to vector<128x256xbf16>
    %cst_105 = arith.constant dense<0.000000e+00> : vector<8x256xf32>
    %187 = tpu.matmul %184, %186, %cst_105 {dimension_numbers = #tpu.dot_dimension_numbers<[1], [0], [0], [1], [0, 0, 1, 1], [], []>} : vector<8x128xbf16>, vector<128x256xbf16>, vector<8x256xf32> -> vector<8x256xf32>
    %188 = arith.subf %168, %187 : vector<8x256xf32>
    %c3 = arith.constant 3 : index
    %189 = memref.load %arg4[%c3] : memref<6xf32, #tpu.memory_space<smem>>
    %190 = math.absf %188 : vector<8x256xf32>
    %191 = tpu.iota {dimensions = array<i32: 1>} : vector<8x256xi32>
    %192 = arith.sitofp %191 : vector<8x256xi32> to vector<8x256xf32>
    %cst_106 = arith.constant dense<0xFF800000> : vector<8xf32>
    %193 = vector.multi_reduction <maximumf>, %190, %cst_106 [1] : vector<8x256xf32> to vector<8xf32>
    %194 = vector.shape_cast %193 : vector<8xf32> to vector<8x1xf32>
    %195 = vector.broadcast %194 : vector<8x1xf32> to vector<8x256xf32>
    %196 = arith.cmpf oeq, %190, %195 : vector<8x256xf32>
    %cst_107 = arith.constant 2.560000e+02 : f32
    %197 = vector.broadcast %cst_107 : f32 to vector<8x256xf32>
    %198 = arith.select %196, %192, %197 : vector<8x256xi1>, vector<8x256xf32>
    %cst_108 = arith.constant dense<0x7F800000> : vector<8xf32>
    %199 = vector.multi_reduction <minimumf>, %198, %cst_108 [1] : vector<8x256xf32> to vector<8xf32>
    %200 = vector.shape_cast %199 : vector<8xf32> to vector<8x1xf32>
    %201 = vector.broadcast %200 : vector<8x1xf32> to vector<8x256xf32>
    %202 = arith.cmpf oeq, %192, %201 : vector<8x256xf32>
    %cst_109 = arith.constant -1.000000e+00 : f32
    %203 = vector.broadcast %cst_109 : f32 to vector<8x256xf32>
    %204 = arith.select %202, %203, %190 : vector<8x256xi1>, vector<8x256xf32>
    %cst_110 = arith.constant dense<0xFF800000> : vector<8xf32>
    %205 = vector.multi_reduction <maximumf>, %204, %cst_110 [1] : vector<8x256xf32> to vector<8xf32>
    %206 = vector.shape_cast %205 : vector<8xf32> to vector<8x1xf32>
    %207 = vector.broadcast %206 : vector<8x1xf32> to vector<8x256xf32>
    %208 = arith.cmpf oeq, %204, %207 : vector<8x256xf32>
    %cst_111 = arith.constant 2.560000e+02 : f32
    %209 = vector.broadcast %cst_111 : f32 to vector<8x256xf32>
    %210 = arith.select %208, %192, %209 : vector<8x256xi1>, vector<8x256xf32>
    %cst_112 = arith.constant dense<0x7F800000> : vector<8xf32>
    %211 = vector.multi_reduction <minimumf>, %210, %cst_112 [1] : vector<8x256xf32> to vector<8xf32>
    %212 = vector.shape_cast %211 : vector<8xf32> to vector<8x1xf32>
    %213 = vector.broadcast %212 : vector<8x1xf32> to vector<8x256xf32>
    %214 = arith.cmpf oeq, %192, %213 : vector<8x256xf32>
    %cst_113 = arith.constant -1.000000e+00 : f32
    %215 = vector.broadcast %cst_113 : f32 to vector<8x256xf32>
    %216 = arith.select %214, %215, %204 : vector<8x256xi1>, vector<8x256xf32>
    %cst_114 = arith.constant dense<0xFF800000> : vector<8xf32>
    %217 = vector.multi_reduction <maximumf>, %216, %cst_114 [1] : vector<8x256xf32> to vector<8xf32>
    %218 = vector.shape_cast %217 : vector<8xf32> to vector<8x1xf32>
    %219 = vector.broadcast %218 : vector<8x1xf32> to vector<8x256xf32>
    %220 = arith.cmpf oeq, %216, %219 : vector<8x256xf32>
    %cst_115 = arith.constant 2.560000e+02 : f32
    %221 = vector.broadcast %cst_115 : f32 to vector<8x256xf32>
    %222 = arith.select %220, %192, %221 : vector<8x256xi1>, vector<8x256xf32>
    %cst_116 = arith.constant dense<0x7F800000> : vector<8xf32>
    %223 = vector.multi_reduction <minimumf>, %222, %cst_116 [1] : vector<8x256xf32> to vector<8xf32>
    %224 = vector.shape_cast %223 : vector<8xf32> to vector<8x1xf32>
    %225 = vector.broadcast %224 : vector<8x1xf32> to vector<8x256xf32>
    %226 = arith.cmpf oeq, %192, %225 : vector<8x256xf32>
    %cst_117 = arith.constant -1.000000e+00 : f32
    %227 = vector.broadcast %cst_117 : f32 to vector<8x256xf32>
    %228 = arith.select %226, %227, %216 : vector<8x256xi1>, vector<8x256xf32>
    %cst_118 = arith.constant dense<0xFF800000> : vector<8xf32>
    %229 = vector.multi_reduction <maximumf>, %228, %cst_118 [1] : vector<8x256xf32> to vector<8xf32>
    %230 = vector.shape_cast %229 : vector<8xf32> to vector<8x1xf32>
    %231 = vector.broadcast %230 : vector<8x1xf32> to vector<8x256xf32>
    %232 = arith.cmpf oeq, %228, %231 : vector<8x256xf32>
    %cst_119 = arith.constant 2.560000e+02 : f32
    %233 = vector.broadcast %cst_119 : f32 to vector<8x256xf32>
    %234 = arith.select %232, %192, %233 : vector<8x256xi1>, vector<8x256xf32>
    %cst_120 = arith.constant dense<0x7F800000> : vector<8xf32>
    %235 = vector.multi_reduction <minimumf>, %234, %cst_120 [1] : vector<8x256xf32> to vector<8xf32>
    %236 = vector.shape_cast %235 : vector<8xf32> to vector<8x1xf32>
    %237 = vector.broadcast %236 : vector<8x1xf32> to vector<8x256xf32>
    %238 = arith.cmpf oeq, %192, %237 : vector<8x256xf32>
    %cst_121 = arith.constant -1.000000e+00 : f32
    %239 = vector.broadcast %cst_121 : f32 to vector<8x256xf32>
    %240 = arith.select %238, %239, %228 : vector<8x256xi1>, vector<8x256xf32>
    %cst_122 = arith.constant dense<0xFF800000> : vector<8xf32>
    %241 = vector.multi_reduction <maximumf>, %240, %cst_122 [1] : vector<8x256xf32> to vector<8xf32>
    %242 = vector.shape_cast %241 : vector<8xf32> to vector<8x1xf32>
    %243 = vector.broadcast %242 : vector<8x1xf32> to vector<8x256xf32>
    %244 = arith.cmpf oeq, %240, %243 : vector<8x256xf32>
    %cst_123 = arith.constant 2.560000e+02 : f32
    %245 = vector.broadcast %cst_123 : f32 to vector<8x256xf32>
    %246 = arith.select %244, %192, %245 : vector<8x256xi1>, vector<8x256xf32>
    %cst_124 = arith.constant dense<0x7F800000> : vector<8xf32>
    %247 = vector.multi_reduction <minimumf>, %246, %cst_124 [1] : vector<8x256xf32> to vector<8xf32>
    %248 = vector.shape_cast %247 : vector<8xf32> to vector<8x1xf32>
    %249 = vector.broadcast %248 : vector<8x1xf32> to vector<8x256xf32>
    %250 = arith.cmpf oeq, %192, %249 : vector<8x256xf32>
    %cst_125 = arith.constant -1.000000e+00 : f32
    %251 = vector.broadcast %cst_125 : f32 to vector<8x256xf32>
    %252 = arith.select %250, %251, %240 : vector<8x256xi1>, vector<8x256xf32>
    %cst_126 = arith.constant dense<0xFF800000> : vector<8xf32>
    %253 = vector.multi_reduction <maximumf>, %252, %cst_126 [1] : vector<8x256xf32> to vector<8xf32>
    %254 = vector.shape_cast %253 : vector<8xf32> to vector<8x1xf32>
    %255 = vector.broadcast %254 : vector<8x1xf32> to vector<8x256xf32>
    %256 = arith.cmpf oeq, %252, %255 : vector<8x256xf32>
    %cst_127 = arith.constant 2.560000e+02 : f32
    %257 = vector.broadcast %cst_127 : f32 to vector<8x256xf32>
    %258 = arith.select %256, %192, %257 : vector<8x256xi1>, vector<8x256xf32>
    %cst_128 = arith.constant dense<0x7F800000> : vector<8xf32>
    %259 = vector.multi_reduction <minimumf>, %258, %cst_128 [1] : vector<8x256xf32> to vector<8xf32>
    %260 = vector.shape_cast %259 : vector<8xf32> to vector<8x1xf32>
    %261 = vector.broadcast %260 : vector<8x1xf32> to vector<8x256xf32>
    %262 = arith.cmpf oeq, %192, %261 : vector<8x256xf32>
    %cst_129 = arith.constant -1.000000e+00 : f32
    %263 = vector.broadcast %cst_129 : f32 to vector<8x256xf32>
    %264 = arith.select %262, %263, %252 : vector<8x256xi1>, vector<8x256xf32>
    %cst_130 = arith.constant dense<0xFF800000> : vector<8xf32>
    %265 = vector.multi_reduction <maximumf>, %264, %cst_130 [1] : vector<8x256xf32> to vector<8xf32>
    %266 = vector.shape_cast %265 : vector<8xf32> to vector<8x1xf32>
    %267 = vector.broadcast %266 : vector<8x1xf32> to vector<8x256xf32>
    %268 = arith.cmpf oge, %190, %267 : vector<8x256xf32>
    %cst_131 = arith.constant 0.000000e+00 : f32
    %269 = arith.subf %cst_131, %189 : f32
    %270 = vector.broadcast %269 : f32 to vector<8x256xf32>
    %271 = arith.maximumf %270, %188 : vector<8x256xf32>
    %272 = vector.broadcast %189 : f32 to vector<8x256xf32>
    %273 = arith.minimumf %272, %271 : vector<8x256xf32>
    %274 = arith.subf %188, %273 : vector<8x256xf32>
    %275 = arith.select %268, %188, %274 : vector<8x256xi1>, vector<8x256xf32>
    %c5_i32 = arith.constant 5 : i32
    %c1_i32_132 = arith.constant 1 : i32
    %c1_i32_133 = arith.constant 1 : i32
    %c0_i32_134 = arith.constant 0 : i32
    %c0_i32_135 = arith.constant 0 : i32
    %276 = tpu.memref_slice %arg3[%c5_i32, %c0_i32_134, %c0_i32_135] : memref<6x128x256xbf16, #tpu.memory_space<any>> -> memref<1x128x256xbf16, #tpu.memory_space<any>>
    %277 = tpu.memref_squeeze %276 : memref<1x128x256xbf16, #tpu.memory_space<any>> -> memref<128x256xbf16, #tpu.memory_space<any>>
    %c0_i32_136 = arith.constant 0 : i32
    %c0_i32_137 = arith.constant 0 : i32
    %278 = tpu.memref_slice %arg6[%c1_i32_132, %c0_i32_136, %c0_i32_137] : memref<2x128x256xbf16, #tpu.memory_space<vmem>> -> memref<1x128x256xbf16, #tpu.memory_space<vmem>>
    %279 = tpu.memref_squeeze %278 : memref<1x128x256xbf16, #tpu.memory_space<vmem>> -> memref<128x256xbf16, #tpu.memory_space<vmem>>
    %280 = tpu.memref_slice %arg7[%c1_i32_133] : memref<2x!tpu.dma_semaphore, #tpu.memory_space<semaphore_mem>> -> memref<1x!tpu.dma_semaphore, #tpu.memory_space<semaphore_mem>>
    %281 = tpu.memref_squeeze %280 : memref<1x!tpu.dma_semaphore, #tpu.memory_space<semaphore_mem>> -> memref<!tpu.dma_semaphore, #tpu.memory_space<semaphore_mem>>
    tpu.enqueue_dma source(%277 : memref<128x256xbf16, #tpu.memory_space<any>>) target(%279 : memref<128x256xbf16, #tpu.memory_space<vmem>>) target_semaphore(%281 : memref<!tpu.dma_semaphore, #tpu.memory_space<semaphore_mem>>)
    %282 = arith.truncf %275 : vector<8x256xf32> to vector<8x256xbf16>
    %cst_138 = arith.constant dense<0.000000e+00> : vector<8x128xf32>
    %283 = tpu.matmul %282, %14, %cst_138 {dimension_numbers = #tpu.dot_dimension_numbers<[1], [0], [0], [1], [0, 0, 1, 1], [], []>} : vector<8x256xbf16>, vector<256x128xbf16>, vector<8x128xf32> -> vector<8x128xf32>
    %284 = arith.subf %283, %12 : vector<8x128xf32>
    %c4_i32_139 = arith.constant 4 : i32
    %c0_i32_140 = arith.constant 0 : i32
    %c0_i32_141 = arith.constant 0 : i32
    %c0_i32_142 = arith.constant 0 : i32
    %c0_i32_143 = arith.constant 0 : i32
    %285 = tpu.memref_slice %arg3[%c4_i32_139, %c0_i32_142, %c0_i32_143] : memref<6x128x256xbf16, #tpu.memory_space<any>> -> memref<1x128x256xbf16, #tpu.memory_space<any>>
    %286 = tpu.memref_squeeze %285 : memref<1x128x256xbf16, #tpu.memory_space<any>> -> memref<128x256xbf16, #tpu.memory_space<any>>
    %c0_i32_144 = arith.constant 0 : i32
    %c0_i32_145 = arith.constant 0 : i32
    %287 = tpu.memref_slice %arg6[%c0_i32_140, %c0_i32_144, %c0_i32_145] : memref<2x128x256xbf16, #tpu.memory_space<vmem>> -> memref<1x128x256xbf16, #tpu.memory_space<vmem>>
    %288 = tpu.memref_squeeze %287 : memref<1x128x256xbf16, #tpu.memory_space<vmem>> -> memref<128x256xbf16, #tpu.memory_space<vmem>>
    %289 = tpu.memref_slice %arg7[%c0_i32_141] : memref<2x!tpu.dma_semaphore, #tpu.memory_space<semaphore_mem>> -> memref<1x!tpu.dma_semaphore, #tpu.memory_space<semaphore_mem>>
    %290 = tpu.memref_squeeze %289 : memref<1x!tpu.dma_semaphore, #tpu.memory_space<semaphore_mem>> -> memref<!tpu.dma_semaphore, #tpu.memory_space<semaphore_mem>>
    tpu.wait_dma2 semaphore(%290 : memref<!tpu.dma_semaphore, #tpu.memory_space<semaphore_mem>>) src(%286 : memref<128x256xbf16, #tpu.memory_space<any>>) dst(%288 : memref<128x256xbf16, #tpu.memory_space<vmem>>)
    %291 = arith.truncf %284 : vector<8x128xf32> to vector<8x128xbf16>
    %c0_146 = arith.constant 0 : index
    %c0_147 = arith.constant 0 : index
    %c0_148 = arith.constant 0 : index
    %292 = vector.load %arg6[%c0_146, %c0_147, %c0_148] : memref<2x128x256xbf16, #tpu.memory_space<vmem>>, vector<1x128x256xbf16>
    %293 = vector.shape_cast %292 : vector<1x128x256xbf16> to vector<128x256xbf16>
    %cst_149 = arith.constant dense<0.000000e+00> : vector<8x256xf32>
    %294 = tpu.matmul %291, %293, %cst_149 {dimension_numbers = #tpu.dot_dimension_numbers<[1], [0], [0], [1], [0, 0, 1, 1], [], []>} : vector<8x128xbf16>, vector<128x256xbf16>, vector<8x256xf32> -> vector<8x256xf32>
    %295 = arith.subf %275, %294 : vector<8x256xf32>
    %c4 = arith.constant 4 : index
    %296 = memref.load %arg4[%c4] : memref<6xf32, #tpu.memory_space<smem>>
    %297 = math.absf %295 : vector<8x256xf32>
    %298 = tpu.iota {dimensions = array<i32: 1>} : vector<8x256xi32>
    %299 = arith.sitofp %298 : vector<8x256xi32> to vector<8x256xf32>
    %cst_150 = arith.constant dense<0xFF800000> : vector<8xf32>
    %300 = vector.multi_reduction <maximumf>, %297, %cst_150 [1] : vector<8x256xf32> to vector<8xf32>
    %301 = vector.shape_cast %300 : vector<8xf32> to vector<8x1xf32>
    %302 = vector.broadcast %301 : vector<8x1xf32> to vector<8x256xf32>
    %303 = arith.cmpf oeq, %297, %302 : vector<8x256xf32>
    %cst_151 = arith.constant 2.560000e+02 : f32
    %304 = vector.broadcast %cst_151 : f32 to vector<8x256xf32>
    %305 = arith.select %303, %299, %304 : vector<8x256xi1>, vector<8x256xf32>
    %cst_152 = arith.constant dense<0x7F800000> : vector<8xf32>
    %306 = vector.multi_reduction <minimumf>, %305, %cst_152 [1] : vector<8x256xf32> to vector<8xf32>
    %307 = vector.shape_cast %306 : vector<8xf32> to vector<8x1xf32>
    %308 = vector.broadcast %307 : vector<8x1xf32> to vector<8x256xf32>
    %309 = arith.cmpf oeq, %299, %308 : vector<8x256xf32>
    %cst_153 = arith.constant -1.000000e+00 : f32
    %310 = vector.broadcast %cst_153 : f32 to vector<8x256xf32>
    %311 = arith.select %309, %310, %297 : vector<8x256xi1>, vector<8x256xf32>
    %cst_154 = arith.constant dense<0xFF800000> : vector<8xf32>
    %312 = vector.multi_reduction <maximumf>, %311, %cst_154 [1] : vector<8x256xf32> to vector<8xf32>
    %313 = vector.shape_cast %312 : vector<8xf32> to vector<8x1xf32>
    %314 = vector.broadcast %313 : vector<8x1xf32> to vector<8x256xf32>
    %315 = arith.cmpf oeq, %311, %314 : vector<8x256xf32>
    %cst_155 = arith.constant 2.560000e+02 : f32
    %316 = vector.broadcast %cst_155 : f32 to vector<8x256xf32>
    %317 = arith.select %315, %299, %316 : vector<8x256xi1>, vector<8x256xf32>
    %cst_156 = arith.constant dense<0x7F800000> : vector<8xf32>
    %318 = vector.multi_reduction <minimumf>, %317, %cst_156 [1] : vector<8x256xf32> to vector<8xf32>
    %319 = vector.shape_cast %318 : vector<8xf32> to vector<8x1xf32>
    %320 = vector.broadcast %319 : vector<8x1xf32> to vector<8x256xf32>
    %321 = arith.cmpf oeq, %299, %320 : vector<8x256xf32>
    %cst_157 = arith.constant -1.000000e+00 : f32
    %322 = vector.broadcast %cst_157 : f32 to vector<8x256xf32>
    %323 = arith.select %321, %322, %311 : vector<8x256xi1>, vector<8x256xf32>
    %cst_158 = arith.constant dense<0xFF800000> : vector<8xf32>
    %324 = vector.multi_reduction <maximumf>, %323, %cst_158 [1] : vector<8x256xf32> to vector<8xf32>
    %325 = vector.shape_cast %324 : vector<8xf32> to vector<8x1xf32>
    %326 = vector.broadcast %325 : vector<8x1xf32> to vector<8x256xf32>
    %327 = arith.cmpf oeq, %323, %326 : vector<8x256xf32>
    %cst_159 = arith.constant 2.560000e+02 : f32
    %328 = vector.broadcast %cst_159 : f32 to vector<8x256xf32>
    %329 = arith.select %327, %299, %328 : vector<8x256xi1>, vector<8x256xf32>
    %cst_160 = arith.constant dense<0x7F800000> : vector<8xf32>
    %330 = vector.multi_reduction <minimumf>, %329, %cst_160 [1] : vector<8x256xf32> to vector<8xf32>
    %331 = vector.shape_cast %330 : vector<8xf32> to vector<8x1xf32>
    %332 = vector.broadcast %331 : vector<8x1xf32> to vector<8x256xf32>
    %333 = arith.cmpf oeq, %299, %332 : vector<8x256xf32>
    %cst_161 = arith.constant -1.000000e+00 : f32
    %334 = vector.broadcast %cst_161 : f32 to vector<8x256xf32>
    %335 = arith.select %333, %334, %323 : vector<8x256xi1>, vector<8x256xf32>
    %cst_162 = arith.constant dense<0xFF800000> : vector<8xf32>
    %336 = vector.multi_reduction <maximumf>, %335, %cst_162 [1] : vector<8x256xf32> to vector<8xf32>
    %337 = vector.shape_cast %336 : vector<8xf32> to vector<8x1xf32>
    %338 = vector.broadcast %337 : vector<8x1xf32> to vector<8x256xf32>
    %339 = arith.cmpf oeq, %335, %338 : vector<8x256xf32>
    %cst_163 = arith.constant 2.560000e+02 : f32
    %340 = vector.broadcast %cst_163 : f32 to vector<8x256xf32>
    %341 = arith.select %339, %299, %340 : vector<8x256xi1>, vector<8x256xf32>
    %cst_164 = arith.constant dense<0x7F800000> : vector<8xf32>
    %342 = vector.multi_reduction <minimumf>, %341, %cst_164 [1] : vector<8x256xf32> to vector<8xf32>
    %343 = vector.shape_cast %342 : vector<8xf32> to vector<8x1xf32>
    %344 = vector.broadcast %343 : vector<8x1xf32> to vector<8x256xf32>
    %345 = arith.cmpf oeq, %299, %344 : vector<8x256xf32>
    %cst_165 = arith.constant -1.000000e+00 : f32
    %346 = vector.broadcast %cst_165 : f32 to vector<8x256xf32>
    %347 = arith.select %345, %346, %335 : vector<8x256xi1>, vector<8x256xf32>
    %cst_166 = arith.constant dense<0xFF800000> : vector<8xf32>
    %348 = vector.multi_reduction <maximumf>, %347, %cst_166 [1] : vector<8x256xf32> to vector<8xf32>
    %349 = vector.shape_cast %348 : vector<8xf32> to vector<8x1xf32>
    %350 = vector.broadcast %349 : vector<8x1xf32> to vector<8x256xf32>
    %351 = arith.cmpf oeq, %347, %350 : vector<8x256xf32>
    %cst_167 = arith.constant 2.560000e+02 : f32
    %352 = vector.broadcast %cst_167 : f32 to vector<8x256xf32>
    %353 = arith.select %351, %299, %352 : vector<8x256xi1>, vector<8x256xf32>
    %cst_168 = arith.constant dense<0x7F800000> : vector<8xf32>
    %354 = vector.multi_reduction <minimumf>, %353, %cst_168 [1] : vector<8x256xf32> to vector<8xf32>
    %355 = vector.shape_cast %354 : vector<8xf32> to vector<8x1xf32>
    %356 = vector.broadcast %355 : vector<8x1xf32> to vector<8x256xf32>
    %357 = arith.cmpf oeq, %299, %356 : vector<8x256xf32>
    %cst_169 = arith.constant -1.000000e+00 : f32
    %358 = vector.broadcast %cst_169 : f32 to vector<8x256xf32>
    %359 = arith.select %357, %358, %347 : vector<8x256xi1>, vector<8x256xf32>
    %cst_170 = arith.constant dense<0xFF800000> : vector<8xf32>
    %360 = vector.multi_reduction <maximumf>, %359, %cst_170 [1] : vector<8x256xf32> to vector<8xf32>
    %361 = vector.shape_cast %360 : vector<8xf32> to vector<8x1xf32>
    %362 = vector.broadcast %361 : vector<8x1xf32> to vector<8x256xf32>
    %363 = arith.cmpf oeq, %359, %362 : vector<8x256xf32>
    %cst_171 = arith.constant 2.560000e+02 : f32
    %364 = vector.broadcast %cst_171 : f32 to vector<8x256xf32>
    %365 = arith.select %363, %299, %364 : vector<8x256xi1>, vector<8x256xf32>
    %cst_172 = arith.constant dense<0x7F800000> : vector<8xf32>
    %366 = vector.multi_reduction <minimumf>, %365, %cst_172 [1] : vector<8x256xf32> to vector<8xf32>
    %367 = vector.shape_cast %366 : vector<8xf32> to vector<8x1xf32>
    %368 = vector.broadcast %367 : vector<8x1xf32> to vector<8x256xf32>
    %369 = arith.cmpf oeq, %299, %368 : vector<8x256xf32>
    %cst_173 = arith.constant -1.000000e+00 : f32
    %370 = vector.broadcast %cst_173 : f32 to vector<8x256xf32>
    %371 = arith.select %369, %370, %359 : vector<8x256xi1>, vector<8x256xf32>
    %cst_174 = arith.constant dense<0xFF800000> : vector<8xf32>
    %372 = vector.multi_reduction <maximumf>, %371, %cst_174 [1] : vector<8x256xf32> to vector<8xf32>
    %373 = vector.shape_cast %372 : vector<8xf32> to vector<8x1xf32>
    %374 = vector.broadcast %373 : vector<8x1xf32> to vector<8x256xf32>
    %375 = arith.cmpf oeq, %371, %374 : vector<8x256xf32>
    %cst_175 = arith.constant 2.560000e+02 : f32
    %376 = vector.broadcast %cst_175 : f32 to vector<8x256xf32>
    %377 = arith.select %375, %299, %376 : vector<8x256xi1>, vector<8x256xf32>
    %cst_176 = arith.constant dense<0x7F800000> : vector<8xf32>
    %378 = vector.multi_reduction <minimumf>, %377, %cst_176 [1] : vector<8x256xf32> to vector<8xf32>
    %379 = vector.shape_cast %378 : vector<8xf32> to vector<8x1xf32>
    %380 = vector.broadcast %379 : vector<8x1xf32> to vector<8x256xf32>
    %381 = arith.cmpf oeq, %299, %380 : vector<8x256xf32>
    %cst_177 = arith.constant -1.000000e+00 : f32
    %382 = vector.broadcast %cst_177 : f32 to vector<8x256xf32>
    %383 = arith.select %381, %382, %371 : vector<8x256xi1>, vector<8x256xf32>
    %cst_178 = arith.constant dense<0xFF800000> : vector<8xf32>
    %384 = vector.multi_reduction <maximumf>, %383, %cst_178 [1] : vector<8x256xf32> to vector<8xf32>
    %385 = vector.shape_cast %384 : vector<8xf32> to vector<8x1xf32>
    %386 = vector.broadcast %385 : vector<8x1xf32> to vector<8x256xf32>
    %387 = arith.cmpf oeq, %383, %386 : vector<8x256xf32>
    %cst_179 = arith.constant 2.560000e+02 : f32
    %388 = vector.broadcast %cst_179 : f32 to vector<8x256xf32>
    %389 = arith.select %387, %299, %388 : vector<8x256xi1>, vector<8x256xf32>
    %cst_180 = arith.constant dense<0x7F800000> : vector<8xf32>
    %390 = vector.multi_reduction <minimumf>, %389, %cst_180 [1] : vector<8x256xf32> to vector<8xf32>
    %391 = vector.shape_cast %390 : vector<8xf32> to vector<8x1xf32>
    %392 = vector.broadcast %391 : vector<8x1xf32> to vector<8x256xf32>
    %393 = arith.cmpf oeq, %299, %392 : vector<8x256xf32>
    %cst_181 = arith.constant -1.000000e+00 : f32
    %394 = vector.broadcast %cst_181 : f32 to vector<8x256xf32>
    %395 = arith.select %393, %394, %383 : vector<8x256xi1>, vector<8x256xf32>
    %cst_182 = arith.constant dense<0xFF800000> : vector<8xf32>
    %396 = vector.multi_reduction <maximumf>, %395, %cst_182 [1] : vector<8x256xf32> to vector<8xf32>
    %397 = vector.shape_cast %396 : vector<8xf32> to vector<8x1xf32>
    %398 = vector.broadcast %397 : vector<8x1xf32> to vector<8x256xf32>
    %399 = arith.cmpf oge, %297, %398 : vector<8x256xf32>
    %cst_183 = arith.constant 0.000000e+00 : f32
    %400 = arith.subf %cst_183, %296 : f32
    %401 = vector.broadcast %400 : f32 to vector<8x256xf32>
    %402 = arith.maximumf %401, %295 : vector<8x256xf32>
    %403 = vector.broadcast %296 : f32 to vector<8x256xf32>
    %404 = arith.minimumf %403, %402 : vector<8x256xf32>
    %405 = arith.subf %295, %404 : vector<8x256xf32>
    %406 = arith.select %399, %295, %405 : vector<8x256xi1>, vector<8x256xf32>
    %407 = arith.truncf %406 : vector<8x256xf32> to vector<8x256xbf16>
    %cst_184 = arith.constant dense<0.000000e+00> : vector<8x128xf32>
    %408 = tpu.matmul %407, %14, %cst_184 {dimension_numbers = #tpu.dot_dimension_numbers<[1], [0], [0], [1], [0, 0, 1, 1], [], []>} : vector<8x256xbf16>, vector<256x128xbf16>, vector<8x128xf32> -> vector<8x128xf32>
    %409 = arith.subf %408, %12 : vector<8x128xf32>
    %c5_i32_185 = arith.constant 5 : i32
    %c1_i32_186 = arith.constant 1 : i32
    %c1_i32_187 = arith.constant 1 : i32
    %c0_i32_188 = arith.constant 0 : i32
    %c0_i32_189 = arith.constant 0 : i32
    %410 = tpu.memref_slice %arg3[%c5_i32_185, %c0_i32_188, %c0_i32_189] : memref<6x128x256xbf16, #tpu.memory_space<any>> -> memref<1x128x256xbf16, #tpu.memory_space<any>>
    %411 = tpu.memref_squeeze %410 : memref<1x128x256xbf16, #tpu.memory_space<any>> -> memref<128x256xbf16, #tpu.memory_space<any>>
    %c0_i32_190 = arith.constant 0 : i32
    %c0_i32_191 = arith.constant 0 : i32
    %412 = tpu.memref_slice %arg6[%c1_i32_186, %c0_i32_190, %c0_i32_191] : memref<2x128x256xbf16, #tpu.memory_space<vmem>> -> memref<1x128x256xbf16, #tpu.memory_space<vmem>>
    %413 = tpu.memref_squeeze %412 : memref<1x128x256xbf16, #tpu.memory_space<vmem>> -> memref<128x256xbf16, #tpu.memory_space<vmem>>
    %414 = tpu.memref_slice %arg7[%c1_i32_187] : memref<2x!tpu.dma_semaphore, #tpu.memory_space<semaphore_mem>> -> memref<1x!tpu.dma_semaphore, #tpu.memory_space<semaphore_mem>>
    %415 = tpu.memref_squeeze %414 : memref<1x!tpu.dma_semaphore, #tpu.memory_space<semaphore_mem>> -> memref<!tpu.dma_semaphore, #tpu.memory_space<semaphore_mem>>
    tpu.wait_dma2 semaphore(%415 : memref<!tpu.dma_semaphore, #tpu.memory_space<semaphore_mem>>) src(%411 : memref<128x256xbf16, #tpu.memory_space<any>>) dst(%413 : memref<128x256xbf16, #tpu.memory_space<vmem>>)
    %416 = arith.truncf %409 : vector<8x128xf32> to vector<8x128xbf16>
    %c1_192 = arith.constant 1 : index
    %c0_193 = arith.constant 0 : index
    %c0_194 = arith.constant 0 : index
    %417 = vector.load %arg6[%c1_192, %c0_193, %c0_194] : memref<2x128x256xbf16, #tpu.memory_space<vmem>>, vector<1x128x256xbf16>
    %418 = vector.shape_cast %417 : vector<1x128x256xbf16> to vector<128x256xbf16>
    %cst_195 = arith.constant dense<0.000000e+00> : vector<8x256xf32>
    %419 = tpu.matmul %416, %418, %cst_195 {dimension_numbers = #tpu.dot_dimension_numbers<[1], [0], [0], [1], [0, 0, 1, 1], [], []>} : vector<8x128xbf16>, vector<128x256xbf16>, vector<8x256xf32> -> vector<8x256xf32>
    %420 = arith.subf %406, %419 : vector<8x256xf32>
    %c5 = arith.constant 5 : index
    %421 = memref.load %arg4[%c5] : memref<6xf32, #tpu.memory_space<smem>>
    %422 = math.absf %420 : vector<8x256xf32>
    %423 = tpu.iota {dimensions = array<i32: 1>} : vector<8x256xi32>
    %424 = arith.sitofp %423 : vector<8x256xi32> to vector<8x256xf32>
    %cst_196 = arith.constant dense<0xFF800000> : vector<8xf32>
    %425 = vector.multi_reduction <maximumf>, %422, %cst_196 [1] : vector<8x256xf32> to vector<8xf32>
    %426 = vector.shape_cast %425 : vector<8xf32> to vector<8x1xf32>
    %427 = vector.broadcast %426 : vector<8x1xf32> to vector<8x256xf32>
    %428 = arith.cmpf oeq, %422, %427 : vector<8x256xf32>
    %cst_197 = arith.constant 2.560000e+02 : f32
    %429 = vector.broadcast %cst_197 : f32 to vector<8x256xf32>
    %430 = arith.select %428, %424, %429 : vector<8x256xi1>, vector<8x256xf32>
    %cst_198 = arith.constant dense<0x7F800000> : vector<8xf32>
    %431 = vector.multi_reduction <minimumf>, %430, %cst_198 [1] : vector<8x256xf32> to vector<8xf32>
    %432 = vector.shape_cast %431 : vector<8xf32> to vector<8x1xf32>
    %433 = vector.broadcast %432 : vector<8x1xf32> to vector<8x256xf32>
    %434 = arith.cmpf oeq, %424, %433 : vector<8x256xf32>
    %cst_199 = arith.constant -1.000000e+00 : f32
    %435 = vector.broadcast %cst_199 : f32 to vector<8x256xf32>
    %436 = arith.select %434, %435, %422 : vector<8x256xi1>, vector<8x256xf32>
    %cst_200 = arith.constant dense<0xFF800000> : vector<8xf32>
    %437 = vector.multi_reduction <maximumf>, %436, %cst_200 [1] : vector<8x256xf32> to vector<8xf32>
    %438 = vector.shape_cast %437 : vector<8xf32> to vector<8x1xf32>
    %439 = vector.broadcast %438 : vector<8x1xf32> to vector<8x256xf32>
    %440 = arith.cmpf oeq, %436, %439 : vector<8x256xf32>
    %cst_201 = arith.constant 2.560000e+02 : f32
    %441 = vector.broadcast %cst_201 : f32 to vector<8x256xf32>
    %442 = arith.select %440, %424, %441 : vector<8x256xi1>, vector<8x256xf32>
    %cst_202 = arith.constant dense<0x7F800000> : vector<8xf32>
    %443 = vector.multi_reduction <minimumf>, %442, %cst_202 [1] : vector<8x256xf32> to vector<8xf32>
    %444 = vector.shape_cast %443 : vector<8xf32> to vector<8x1xf32>
    %445 = vector.broadcast %444 : vector<8x1xf32> to vector<8x256xf32>
    %446 = arith.cmpf oeq, %424, %445 : vector<8x256xf32>
    %cst_203 = arith.constant -1.000000e+00 : f32
    %447 = vector.broadcast %cst_203 : f32 to vector<8x256xf32>
    %448 = arith.select %446, %447, %436 : vector<8x256xi1>, vector<8x256xf32>
    %cst_204 = arith.constant dense<0xFF800000> : vector<8xf32>
    %449 = vector.multi_reduction <maximumf>, %448, %cst_204 [1] : vector<8x256xf32> to vector<8xf32>
    %450 = vector.shape_cast %449 : vector<8xf32> to vector<8x1xf32>
    %451 = vector.broadcast %450 : vector<8x1xf32> to vector<8x256xf32>
    %452 = arith.cmpf oeq, %448, %451 : vector<8x256xf32>
    %cst_205 = arith.constant 2.560000e+02 : f32
    %453 = vector.broadcast %cst_205 : f32 to vector<8x256xf32>
    %454 = arith.select %452, %424, %453 : vector<8x256xi1>, vector<8x256xf32>
    %cst_206 = arith.constant dense<0x7F800000> : vector<8xf32>
    %455 = vector.multi_reduction <minimumf>, %454, %cst_206 [1] : vector<8x256xf32> to vector<8xf32>
    %456 = vector.shape_cast %455 : vector<8xf32> to vector<8x1xf32>
    %457 = vector.broadcast %456 : vector<8x1xf32> to vector<8x256xf32>
    %458 = arith.cmpf oeq, %424, %457 : vector<8x256xf32>
    %cst_207 = arith.constant -1.000000e+00 : f32
    %459 = vector.broadcast %cst_207 : f32 to vector<8x256xf32>
    %460 = arith.select %458, %459, %448 : vector<8x256xi1>, vector<8x256xf32>
    %cst_208 = arith.constant dense<0xFF800000> : vector<8xf32>
    %461 = vector.multi_reduction <maximumf>, %460, %cst_208 [1] : vector<8x256xf32> to vector<8xf32>
    %462 = vector.shape_cast %461 : vector<8xf32> to vector<8x1xf32>
    %463 = vector.broadcast %462 : vector<8x1xf32> to vector<8x256xf32>
    %464 = arith.cmpf oeq, %460, %463 : vector<8x256xf32>
    %cst_209 = arith.constant 2.560000e+02 : f32
    %465 = vector.broadcast %cst_209 : f32 to vector<8x256xf32>
    %466 = arith.select %464, %424, %465 : vector<8x256xi1>, vector<8x256xf32>
    %cst_210 = arith.constant dense<0x7F800000> : vector<8xf32>
    %467 = vector.multi_reduction <minimumf>, %466, %cst_210 [1] : vector<8x256xf32> to vector<8xf32>
    %468 = vector.shape_cast %467 : vector<8xf32> to vector<8x1xf32>
    %469 = vector.broadcast %468 : vector<8x1xf32> to vector<8x256xf32>
    %470 = arith.cmpf oeq, %424, %469 : vector<8x256xf32>
    %cst_211 = arith.constant -1.000000e+00 : f32
    %471 = vector.broadcast %cst_211 : f32 to vector<8x256xf32>
    %472 = arith.select %470, %471, %460 : vector<8x256xi1>, vector<8x256xf32>
    %cst_212 = arith.constant dense<0xFF800000> : vector<8xf32>
    %473 = vector.multi_reduction <maximumf>, %472, %cst_212 [1] : vector<8x256xf32> to vector<8xf32>
    %474 = vector.shape_cast %473 : vector<8xf32> to vector<8x1xf32>
    %475 = vector.broadcast %474 : vector<8x1xf32> to vector<8x256xf32>
    %476 = arith.cmpf oeq, %472, %475 : vector<8x256xf32>
    %cst_213 = arith.constant 2.560000e+02 : f32
    %477 = vector.broadcast %cst_213 : f32 to vector<8x256xf32>
    %478 = arith.select %476, %424, %477 : vector<8x256xi1>, vector<8x256xf32>
    %cst_214 = arith.constant dense<0x7F800000> : vector<8xf32>
    %479 = vector.multi_reduction <minimumf>, %478, %cst_214 [1] : vector<8x256xf32> to vector<8xf32>
    %480 = vector.shape_cast %479 : vector<8xf32> to vector<8x1xf32>
    %481 = vector.broadcast %480 : vector<8x1xf32> to vector<8x256xf32>
    %482 = arith.cmpf oeq, %424, %481 : vector<8x256xf32>
    %cst_215 = arith.constant -1.000000e+00 : f32
    %483 = vector.broadcast %cst_215 : f32 to vector<8x256xf32>
    %484 = arith.select %482, %483, %472 : vector<8x256xi1>, vector<8x256xf32>
    %cst_216 = arith.constant dense<0xFF800000> : vector<8xf32>
    %485 = vector.multi_reduction <maximumf>, %484, %cst_216 [1] : vector<8x256xf32> to vector<8xf32>
    %486 = vector.shape_cast %485 : vector<8xf32> to vector<8x1xf32>
    %487 = vector.broadcast %486 : vector<8x1xf32> to vector<8x256xf32>
    %488 = arith.cmpf oeq, %484, %487 : vector<8x256xf32>
    %cst_217 = arith.constant 2.560000e+02 : f32
    %489 = vector.broadcast %cst_217 : f32 to vector<8x256xf32>
    %490 = arith.select %488, %424, %489 : vector<8x256xi1>, vector<8x256xf32>
    %cst_218 = arith.constant dense<0x7F800000> : vector<8xf32>
    %491 = vector.multi_reduction <minimumf>, %490, %cst_218 [1] : vector<8x256xf32> to vector<8xf32>
    %492 = vector.shape_cast %491 : vector<8xf32> to vector<8x1xf32>
    %493 = vector.broadcast %492 : vector<8x1xf32> to vector<8x256xf32>
    %494 = arith.cmpf oeq, %424, %493 : vector<8x256xf32>
    %cst_219 = arith.constant -1.000000e+00 : f32
    %495 = vector.broadcast %cst_219 : f32 to vector<8x256xf32>
    %496 = arith.select %494, %495, %484 : vector<8x256xi1>, vector<8x256xf32>
    %cst_220 = arith.constant dense<0xFF800000> : vector<8xf32>
    %497 = vector.multi_reduction <maximumf>, %496, %cst_220 [1] : vector<8x256xf32> to vector<8xf32>
    %498 = vector.shape_cast %497 : vector<8xf32> to vector<8x1xf32>
    %499 = vector.broadcast %498 : vector<8x1xf32> to vector<8x256xf32>
    %500 = arith.cmpf oeq, %496, %499 : vector<8x256xf32>
    %cst_221 = arith.constant 2.560000e+02 : f32
    %501 = vector.broadcast %cst_221 : f32 to vector<8x256xf32>
    %502 = arith.select %500, %424, %501 : vector<8x256xi1>, vector<8x256xf32>
    %cst_222 = arith.constant dense<0x7F800000> : vector<8xf32>
    %503 = vector.multi_reduction <minimumf>, %502, %cst_222 [1] : vector<8x256xf32> to vector<8xf32>
    %504 = vector.shape_cast %503 : vector<8xf32> to vector<8x1xf32>
    %505 = vector.broadcast %504 : vector<8x1xf32> to vector<8x256xf32>
    %506 = arith.cmpf oeq, %424, %505 : vector<8x256xf32>
    %cst_223 = arith.constant -1.000000e+00 : f32
    %507 = vector.broadcast %cst_223 : f32 to vector<8x256xf32>
    %508 = arith.select %506, %507, %496 : vector<8x256xi1>, vector<8x256xf32>
    %cst_224 = arith.constant dense<0xFF800000> : vector<8xf32>
    %509 = vector.multi_reduction <maximumf>, %508, %cst_224 [1] : vector<8x256xf32> to vector<8xf32>
    %510 = vector.shape_cast %509 : vector<8xf32> to vector<8x1xf32>
    %511 = vector.broadcast %510 : vector<8x1xf32> to vector<8x256xf32>
    %512 = arith.cmpf oeq, %508, %511 : vector<8x256xf32>
    %cst_225 = arith.constant 2.560000e+02 : f32
    %513 = vector.broadcast %cst_225 : f32 to vector<8x256xf32>
    %514 = arith.select %512, %424, %513 : vector<8x256xi1>, vector<8x256xf32>
    %cst_226 = arith.constant dense<0x7F800000> : vector<8xf32>
    %515 = vector.multi_reduction <minimumf>, %514, %cst_226 [1] : vector<8x256xf32> to vector<8xf32>
    %516 = vector.shape_cast %515 : vector<8xf32> to vector<8x1xf32>
    %517 = vector.broadcast %516 : vector<8x1xf32> to vector<8x256xf32>
    %518 = arith.cmpf oeq, %424, %517 : vector<8x256xf32>
    %cst_227 = arith.constant -1.000000e+00 : f32
    %519 = vector.broadcast %cst_227 : f32 to vector<8x256xf32>
    %520 = arith.select %518, %519, %508 : vector<8x256xi1>, vector<8x256xf32>
    %cst_228 = arith.constant dense<0xFF800000> : vector<8xf32>
    %521 = vector.multi_reduction <maximumf>, %520, %cst_228 [1] : vector<8x256xf32> to vector<8xf32>
    %522 = vector.shape_cast %521 : vector<8xf32> to vector<8x1xf32>
    %523 = vector.broadcast %522 : vector<8x1xf32> to vector<8x256xf32>
    %524 = arith.cmpf oeq, %520, %523 : vector<8x256xf32>
    %cst_229 = arith.constant 2.560000e+02 : f32
    %525 = vector.broadcast %cst_229 : f32 to vector<8x256xf32>
    %526 = arith.select %524, %424, %525 : vector<8x256xi1>, vector<8x256xf32>
    %cst_230 = arith.constant dense<0x7F800000> : vector<8xf32>
    %527 = vector.multi_reduction <minimumf>, %526, %cst_230 [1] : vector<8x256xf32> to vector<8xf32>
    %528 = vector.shape_cast %527 : vector<8xf32> to vector<8x1xf32>
    %529 = vector.broadcast %528 : vector<8x1xf32> to vector<8x256xf32>
    %530 = arith.cmpf oeq, %424, %529 : vector<8x256xf32>
    %cst_231 = arith.constant -1.000000e+00 : f32
    %531 = vector.broadcast %cst_231 : f32 to vector<8x256xf32>
    %532 = arith.select %530, %531, %520 : vector<8x256xi1>, vector<8x256xf32>
    %cst_232 = arith.constant dense<0xFF800000> : vector<8xf32>
    %533 = vector.multi_reduction <maximumf>, %532, %cst_232 [1] : vector<8x256xf32> to vector<8xf32>
    %534 = vector.shape_cast %533 : vector<8xf32> to vector<8x1xf32>
    %535 = vector.broadcast %534 : vector<8x1xf32> to vector<8x256xf32>
    %536 = arith.cmpf oeq, %532, %535 : vector<8x256xf32>
    %cst_233 = arith.constant 2.560000e+02 : f32
    %537 = vector.broadcast %cst_233 : f32 to vector<8x256xf32>
    %538 = arith.select %536, %424, %537 : vector<8x256xi1>, vector<8x256xf32>
    %cst_234 = arith.constant dense<0x7F800000> : vector<8xf32>
    %539 = vector.multi_reduction <minimumf>, %538, %cst_234 [1] : vector<8x256xf32> to vector<8xf32>
    %540 = vector.shape_cast %539 : vector<8xf32> to vector<8x1xf32>
    %541 = vector.broadcast %540 : vector<8x1xf32> to vector<8x256xf32>
    %542 = arith.cmpf oeq, %424, %541 : vector<8x256xf32>
    %cst_235 = arith.constant -1.000000e+00 : f32
    %543 = vector.broadcast %cst_235 : f32 to vector<8x256xf32>
    %544 = arith.select %542, %543, %532 : vector<8x256xi1>, vector<8x256xf32>
    %cst_236 = arith.constant dense<0xFF800000> : vector<8xf32>
    %545 = vector.multi_reduction <maximumf>, %544, %cst_236 [1] : vector<8x256xf32> to vector<8xf32>
    %546 = vector.shape_cast %545 : vector<8xf32> to vector<8x1xf32>
    %547 = vector.broadcast %546 : vector<8x1xf32> to vector<8x256xf32>
    %548 = arith.cmpf oeq, %544, %547 : vector<8x256xf32>
    %cst_237 = arith.constant 2.560000e+02 : f32
    %549 = vector.broadcast %cst_237 : f32 to vector<8x256xf32>
    %550 = arith.select %548, %424, %549 : vector<8x256xi1>, vector<8x256xf32>
    %cst_238 = arith.constant dense<0x7F800000> : vector<8xf32>
    %551 = vector.multi_reduction <minimumf>, %550, %cst_238 [1] : vector<8x256xf32> to vector<8xf32>
    %552 = vector.shape_cast %551 : vector<8xf32> to vector<8x1xf32>
    %553 = vector.broadcast %552 : vector<8x1xf32> to vector<8x256xf32>
    %554 = arith.cmpf oeq, %424, %553 : vector<8x256xf32>
    %cst_239 = arith.constant -1.000000e+00 : f32
    %555 = vector.broadcast %cst_239 : f32 to vector<8x256xf32>
    %556 = arith.select %554, %555, %544 : vector<8x256xi1>, vector<8x256xf32>
    %cst_240 = arith.constant dense<0xFF800000> : vector<8xf32>
    %557 = vector.multi_reduction <maximumf>, %556, %cst_240 [1] : vector<8x256xf32> to vector<8xf32>
    %558 = vector.shape_cast %557 : vector<8xf32> to vector<8x1xf32>
    %559 = vector.broadcast %558 : vector<8x1xf32> to vector<8x256xf32>
    %560 = arith.cmpf oge, %422, %559 : vector<8x256xf32>
    %cst_241 = arith.constant 0.000000e+00 : f32
    %561 = arith.subf %cst_241, %421 : f32
    %562 = vector.broadcast %561 : f32 to vector<8x256xf32>
    %563 = arith.maximumf %562, %420 : vector<8x256xf32>
    %564 = vector.broadcast %421 : f32 to vector<8x256xf32>
    %565 = arith.minimumf %564, %563 : vector<8x256xf32>
    %566 = arith.subf %420, %565 : vector<8x256xf32>
    %567 = arith.select %560, %420, %566 : vector<8x256xi1>, vector<8x256xf32>
    %c0_242 = arith.constant 0 : index
    %c0_243 = arith.constant 0 : index
    %568 = vector.load %arg5[%c0_242, %c0_243] : memref<8x256xf32, #tpu.memory_space<vmem>>, vector<8x256xf32>
    tpu.vector_store %arg5[%c0_242, %c0_243], %567 {strides = array<i32>} : memref<8x256xf32, #tpu.memory_space<vmem>>, vector<8x256xf32>,
    return
  }
  func.func @transform_0(%arg0: i32) -> (i32, i32) {
    %c0_i32 = arith.constant 0 : i32
    %c0_i32_0 = arith.constant 0 : i32
    return %arg0, %c0_i32 : i32, i32
  }
  func.func @transform_1(%arg0: i32) -> (i32, i32) {
    %c0_i32 = arith.constant 0 : i32
    %c0_i32_0 = arith.constant 0 : i32
    %c0_i32_1 = arith.constant 0 : i32
    return %c0_i32, %c0_i32_0 : i32, i32
  }
  func.func @transform_3(%arg0: i32) -> i32 {
    %c0_i32 = arith.constant 0 : i32
    %c0_i32_0 = arith.constant 0 : i32
    return %c0_i32 : i32
  }
  func.func @transform_4(%arg0: i32) -> (i32, i32) {
    %c0_i32 = arith.constant 0 : i32
    %c0_i32_0 = arith.constant 0 : i32
    return %arg0, %c0_i32 : i32, i32
  }
}

</mosaic_0001>

<bundles_post_ra>
// kernel: tpu_custom_call.1
= control target key start
LH: loop header
LB: loop body
LE: loop exit
PB: predicated region body
PF: predicated region fallthrough
CT: control target
= control target key end

     0   :  { %9 = vsyncpa [#allocation5], 0  ;;  %s3081_s0 = inlined_call_operand.hbm [shape: f32[16,128], index: 0, kind: input, shape index: {}]   ;;  %s3082_s1 = inlined_call_operand.hbm [shape: bf16[256,128], index: 1, kind: input, shape index: {}]   ;;  %s3083_s2 = inlined_call_operand.hbm [shape: bf16[6,128,256], index: 2, kind: input, shape index: {}]   ;;  %s3084_s3 = inlined_call_operand.vmem [shape: f32[6], index: 3, kind: input, shape index: {}]   ;;  %s3085_s4 = inlined_call_operand.hbm [shape: f32[16,256], index: 4, kind: output, shape index: {}]  }
   0x1   :  { %11 = vsyncpa [#allocation5 + $0x1], 0 }
   0x2   :  { %12 = vsyncpa [#allocation9], 0 }
   0x3   :  { %13 = vsyncpa [#allocation7], 0 }
   0x4   :  { %14 = vsyncpa [#allocation6], 0 }
   0x5   :  { %16 = vsyncpa [#allocation6 + $0x1], 0  ;;  %s2262_s15 = smov 0   ;;  %s2264_s16 = smov 0  }
   0x6   :  { %s2266_s17 = smov 0   ;;  %s2268_s18 = smov 0  }
   0x7 LB: > { %s2283_s19 = sadd.s32 4294967295, %s2213_s18   ;;  %s1806_s20 = sadd.s32 4294967294, %s2213_s18   ;;  %s2213_s18 = sphi %s2268_s18, %s3111_s18   ;;  %s2209_s17 = sphi %s2266_s17, %s3110_s17   ;;  %s2205_s16 = sphi %s2264_s16, %s3109_s16   ;;  %s2201_s15 = sphi %s2262_s15, %s3108_s15  }
   0x8   : > { %p42_p0 = scmp.ne.s32.totalorder %s2205_s16, %s2201_s15  ;;  %p3086_p1 = scmp.eq.s32.totalorder %s2283_s19, 0 }
   0x9   : > { %p114_p3 = scmp.eq.s32.totalorder %s1806_s20, 1  ;;  %p1807_p5 = scmp.ge.s32.totalorder %s2213_s18, 1 }
   0xa   : > { %p2292_p4 = por %p3086_p1, %p42_p0  ;;  %p121_p7 = scmp.lt.s32.totalorder %s2213_s18, 3 }
   0xb   : > { %p2297_p6 = por %p114_p3, %p42_p0  ;;  %s2215_s24 = smov [#allocation8]  }
   0xc   : > { %s3091_s21 = scalar_select %p2292_p4, 1, 0 }
   0xd   : > { %s3092_s22 = scalar_select %p2297_p6, 1, 0 }
   0xe   : > { %p2302_p8 = pnand %p1807_p5, %p121_p7  ;;  %s133_s25 = sshll.u32 %s2215_s24, 4  ;;  %s134_s25 = int_to_ptr.vmem [resolvable:$true] %s133_s25 }
   0xf   : > { %s147_s28 = sshll.u32 %s3084_s3, 4  ;;  %s2054_s6 = scalar_lea.hbm %s3082_s1, 2048  ;;  %s2318_s28 = int_to_ptr.vmem [resolvable:$true] %s147_s28 }
  0x10   : > { %s3093_s23 = scalar_select %p2302_p8, 1, 0 }
  0x11   : > { %p1981_p9 = pneg %p2302_p8  ;;  %p2055_p12 = scmp.ne.s32.totalorder %s3082_s1, %s2054_s6 }
  0x12   : > { %p2061_p5 = scmp.lt.u32.totalorder %s2054_s6, %s3082_s1 }
  0x13   : > { %p2314_p11 = pnand %p1981_p9, %p3086_p1 }
  0x15   : > { %p2056_p13 = pneg %p2314_p11 }
  0x17   : > { %p2057_p0 = pnand %p2056_p13, %p2055_p12 }
  0x19   : > { %p2058_p3 = pneg %p2057_p0 }
  0x1b   : > { %p2063_p7 = pnand %p2061_p5, %p2058_p3 }
  0x1d   : > { %2066 = shalt.err (!%p2063_p7)
}
  0x1e   : > { %s2067_s11 = scalar_lea.vmem %s134_s25, 2048  ;;  %p2075_p2 = scmp.lt.s32.totalorder %s134_s25, %s134_s25 }
  0x1f   : > { %p2068_p9 = scmp.ne.s32.totalorder %s134_s25, %s2067_s11  ;;  %p2076_p6 = scmp.lt.s32.totalorder %s2067_s11, %s2067_s11 }
  0x21   : > { %p2070_p10 = pnand %p2068_p9, %p2056_p13  ;;  %p2077_p4 = por %p2076_p6, %p2075_p2 }
  0x23   : > { %p2071_p1 = pneg %p2070_p10 }
  0x25   : > { %p2078_p8 = pnand %p2077_p4, %p2071_p1 }
  0x27   : > { %2081 = shalt.err (!%p2078_p8)
}
  0x28   : > { %s2216_s12 = smov 64   ;;  %s2217_s13 = smov 4  }
  0x29   : > { %1984 = dma.hbm_to_vmem [thread:$0]  (!%p2314_p11), %s3082_s1, 2048, %s134_s25, [#allocation9], %s2216_s12, %s2216_s12, %s2217_s13  }
  0x2a   : > { %s2082_s24 = scalar_lea.vmem %s2318_s28, 16  ;;  %p2090_p1 = scmp.lt.s32.totalorder %s2318_s28, %s2318_s28 }
  0x2b   : > { %p2083_p12 = scmp.ne.s32.totalorder %s2318_s28, %s2082_s24  ;;  %p2091_p4 = scmp.lt.s32.totalorder %s2082_s24, %s2082_s24 }
  0x2d   : > { %p2085_p10 = pnand %p2083_p12, %p2056_p13  ;;  %p2092_p6 = por %p2091_p4, %p2090_p1 }
  0x2f   : > { %p2086_p2 = pneg %p2085_p10 }
  0x31   : > { %p2093_p8 = pnand %p2092_p6, %p2086_p2 }
  0x33   : > { %2096 = shalt.err (!%p2093_p8)
}
  0x34   : > { %s2218_s26 = smov [#allocation10]   ;;  %s2353_s25 = sadd.s32 1, %s2213_s18  }
  0x35   : > { %1987 = dma.vmem_to_smem (!%p2314_p11), %s2318_s28, 16, %s2218_s26, [#allocation7]  }
  0x36   : > { %s29_s27 = sadd.s32 1, %s2209_s17  ;;  %s26_s30 = ssub.s32 %s2213_s18, %s2353_s25 }
  0x37   : > { %p36_p13 = scmp.ne.s32.totalorder %s2209_s17, %s2205_s16  ;;  %p27_p0 = scmp.eq.s32.totalorder %s26_s30, 0 }
  0x38   : > { %p37_p3 = scmp.eq.s32.totalorder %s2213_s18, 0  ;;  %p3095_p5 = scmp.eq.s32.totalorder %s2283_s19, 1 }
  0x39   : > { %p1998_p9 = scmp.lt.s32.totalorder %s2213_s18, 2  ;;  %s158_s6 = sand.u32 1, %s2209_s17  }
  0x3a   : > { %p2363_p7 = por %p3095_p5, %p36_p13  ;;  %p38_p12 = por %p37_p3, %p36_p13 }
  0x3b   : > { %s2369_s5 = scalar_select %p27_p0, %s2209_s17, %s29_s27  }
  0x3c   : > { %s1811_s7 = sshll.u32 %s158_s6, 3  ;;  %s1812_s28 = sshll.u32 %s2213_s18, 7 }
  0x3d   : > { %s2376_s10 = scalar_lea.hbm %s3081_s0, %s1812_s28  ;;  %s162_s11 = scalar_lea.vmem [#allocation4], %s1811_s7 }
  0x3e   : > { %s169_s12 = sshll.u32 %s162_s11, 4  ;;  %p2380_p11 = pnand %p1998_p9, %p38_p12  ;;  %s2378_s12 = int_to_ptr.vmem [resolvable:$true] %s169_s12 }
  0x3f   : > { %s159_s14 = scalar_lea.sflag [#allocation5], %s158_s6  ;;  %s2097_s20 = scalar_lea.hbm %s2376_s10, 128 }
  0x40   : > { %p2098_p10 = scmp.ne.s32.totalorder %s2376_s10, %s2097_s20  ;;  %p2099_p2 = pneg %p2380_p11 }
  0x41   : > { %s2102_s27 = scalar_lea.hbm %s3081_s0, 256  ;;  %p2103_p6 = scmp.lt.u32.totalorder %s2376_s10, %s3081_s0 }
  0x42   : > { %p2100_p1 = pnand %p2099_p2, %p2098_p10  ;;  %p2104_p8 = scmp.lt.u32.totalorder %s2102_s27, %s2097_s20 }
  0x43   : > { %p2106_p0 = scmp.lt.u32.totalorder %s2097_s20, %s2376_s10 }
  0x44   : > { %p2101_p4 = pneg %p2100_p1  ;;  %p2105_p13 = por %p2104_p8, %p2103_p6 }
  0x46   : > { %p2107_p3 = por %p2106_p0, %p2105_p13 }
  0x48   : > { %p2108_p5 = pnand %p2107_p3, %p2101_p4 }
  0x4a   : > { %2111 = shalt.err (!%p2108_p5)
}
  0x4b   : > { %s2112_s6 = scalar_lea.vmem %s2378_s12, 128  ;;  %s2219_s28 = smov [#allocation4]  }
  0x4c   : > { %p2113_p9 = scmp.ne.s32.totalorder %s2378_s12, %s2112_s6  ;;  %s2117_s8 = sshll.u32 %s2219_s28, 4  ;;  %s2118_s8 = int_to_ptr.vmem [resolvable:$false] %s2117_s8 }
  0x4d   : > { %s2119_s9 = scalar_lea.vmem %s2118_s8, 256  ;;  %p2120_p1 = scmp.lt.s32.totalorder %s2378_s12, %s2118_s8 }
  0x4e   : > { %p2115_p12 = pnand %p2113_p9, %p2099_p2  ;;  %p2121_p6 = scmp.lt.s32.totalorder %s2119_s9, %s2112_s6 }
  0x50   : > { %p2116_p10 = pneg %p2115_p12  ;;  %p2122_p8 = por %p2121_p6, %p2120_p1 }
  0x52   : > { %p2123_p13 = pnand %p2122_p8, %p2116_p10 }
  0x54   : > { %2126 = shalt.err (!%p2123_p13)
}
  0x55   : > { %1991 = dma.hbm_to_vmem [thread:$0]  (!%p2380_p11), %s2376_s10, 128, %s2378_s12, %s159_s14  }
  0x56   : > { %p3098_p4 = scmp.ne.s32.totalorder %s3093_s23, 0 }
  0x58   : > { %178 = sbr.rel (%p3098_p4) target bundleno = 12391 (0x3067), region = 32 }
  0x5f   : > { %s2412_s11 = sand.u32 1, %s2205_s16   ;;  %p3099_p2 = scmp.ne.s32.totalorder %s3091_s21, 0 }
  0x60   : > { %s1814_s20 = sshll.u32 %s2412_s11, 3  ;;  %s181_s24 = scalar_lea.sflag [#allocation5], %s2412_s11 }
  0x61   : > { %s2416_s26 = scalar_lea.vmem [#allocation4], %s1814_s20 }
  0x62   : > { %2172 = dma.done.wait (%p3099_p2), %s181_s24, 128  }
  0x63   : > { %2174 = vsyncadd (%p3099_p2), %s181_s24, 4294967168  ;;  %p3100_p11 = scmp.eq.s32.totalorder %s2283_s19, 0 }
  0x65   : > { %2176 = dma.done.wait (%p3100_p11), [#allocation9], 2048   ;;  %p3101_p0 = pmov %p3100_p11 }
  0x67   : > { %2178 = vsyncadd (%p3101_p0), [#allocation9], 4294965248  ;;  %p3102_p3 = pmov %p3101_p0 }
  0x68   : > { %p3103_p5 = pmov %p3101_p0 }
  0x69   : > { %2180 = dma.done.wait (%p3102_p3), [#allocation7], 16  }
  0x6a   : > { %2182 = vsyncadd (%p3103_p5), [#allocation7], 4294967280 }
  0x6b   : > { %197 = sfence }
  0x6c   : > { %s221_s10 = sld [smem:[#allocation0]]   ;;  %s2220_s12 = smov [#allocation2]  }
  0x6d   : > { %s229_s13 = sshll.u32 %s2220_s12, 4  ;;  %s2221_s21 = smov 256   ;;  %s2431_s13 = int_to_ptr.vmem [resolvable:$true] %s229_s13 }
  0x6e   : > { %233 = sst [smem:[#allocation13]] %s2221_s21  ;;  %s2222_s14 = smov 2  }
  0x6f   : > { %235 = sst [smem:[#allocation13 + $0x1]] %s2221_s21  ;;  %s2223_s30 = smov 64  }
  0x70   : > { %237 = sst [smem:[#allocation13 + $0x2]] %s2222_s14  ;;  %s2224_s6 = smov 128  }
  0x71   : > { %239 = sst [smem:[#allocation13 + $0x3]] %s2223_s30  ;;  %s3089_s28 = smov 4  }
  0x72   : > { %s1818_s27 = sshll.u32 %s221_s10, 26  ;;  %241 = sst [smem:[#allocation13 + $0x4]] %s2224_s6 }
  0x73   : > { %s2437_s7 = sadd.s32 134217728, %s1818_s27  ;;  %243 = sst [smem:[#allocation13 + $0x5]] %s2222_s14 }
  0x74   : > { %245 = sst [smem:[#allocation13 + $0x6]] %s2224_s6  ;;  %s2226_s8 = smov [#allocation3]  }
  0x75   : > { %247 = sst [smem:[#allocation13 + $0x7]] %s2223_s30  ;;  %s2227_s9 = smov [#allocation12]  }
  0x76   : > { %249 = sst [smem:[#allocation13 + $0x8]] %s3089_s28  ;;  %s2228_s10 = smov [#allocation2 + $0x80]  }
  0x77   : > { %251 = dma.general %s3083_s2, 2048, %s2431_s13, %s2226_s8, %s2227_s9, [#allocation13], %s2437_s7, 0  }
  0x78   : > { %270 = sst [smem:[#allocation15]] %s2221_s21  ;;  %s266_s12 = sshll.u32 %s2228_s10, 4  ;;  %s2458_s12 = int_to_ptr.vmem [resolvable:$true] %s266_s12 }
  0x79   : > { %272 = sst [smem:[#allocation15 + $0x1]] %s2221_s21  ;;  %s252_s28 = scalar_lea.hbm %s3083_s2, 2048 }
  0x7a   : > { %274 = sst [smem:[#allocation15 + $0x2]] %s2222_s14  ;;  %s3104_s9 = smov 4  }
  0x7b   : > { %276 = sst [smem:[#allocation15 + $0x3]] %s2223_s30  ;;  %s2229_s20 = smov [#allocation3 + $0x1]  }
  0x7c   : > { %278 = sst [smem:[#allocation15 + $0x4]] %s2224_s6  ;;  %s2230_s24 = smov [#allocation14]  }
  0x7d   : > { %280 = sst [smem:[#allocation15 + $0x5]] %s2222_s14 }
  0x7e   : > { %282 = sst [smem:[#allocation15 + $0x6]] %s2224_s6 }
  0x7f   : > { %284 = sst [smem:[#allocation15 + $0x7]] %s2223_s30 }
  0x80   : > { %286 = sst [smem:[#allocation15 + $0x8]] %s3104_s9 }
  0x81   : > { %288 = dma.general %s252_s28, 2048, %s2458_s12, %s2229_s20, %s2230_s24, [#allocation15], %s2437_s7, 0  }
  0x82   : > { %v2468_v0 = vld [vmem:[%s2416_s26] sm:$0xff]  ;;  %v2470_v1 = vld [vmem:[#allocation8] sm:$0xf]  ;;  %v2472_v2 = vld [vmem:[#allocation8 + $0x4] sm:$0xf]  ;;  %s3105_s26 = sshll.u32 %s2412_s11, 4 }
  0x83   : > { %v290_v3 = vpack.c.bf16 %v2468_v0, %v2468_v0  ;;  %v2476_v4 = vld [vmem:[#allocation8 + $0x8] sm:$0xf]  ;;  %v2478_v5 = vld [vmem:[#allocation8 + $0xc] sm:$0xf]  ;;  %v2480_v6 = vld [vmem:[#allocation8 + $0x10] sm:$0xf] }
  0x84   : > { %v2482_v7 = vld [vmem:[#allocation8 + $0x14] sm:$0xf]  ;;  %v2484_v8 = vld [vmem:[#allocation8 + $0x18] sm:$0xf]  ;;  %v2486_v9 = vld [vmem:[#allocation8 + $0x1c] sm:$0xf] }
  0x85   : > { %v2488_v10 = vld [vmem:[#allocation8 + $0x20] sm:$0xf]  ;;  %v2490_v11 = vld [vmem:[#allocation8 + $0x24] sm:$0xf]  ;;  %v2492_v12 = vld [vmem:[#allocation8 + $0x28] sm:$0xf] }
  0x86   : > { %v2494_v13 = vld [vmem:[#allocation8 + $0x2c] sm:$0xf]  ;;  %v2496_v14 = vld [vmem:[#allocation8 + $0x30] sm:$0xf]  ;;  %v2498_v15 = vld [vmem:[#allocation8 + $0x34] sm:$0xf] }
  0x87   : > { %v2500_v16 = vld [vmem:[#allocation8 + $0x38] sm:$0xf]  ;;  %v2502_v17 = vld [vmem:[#allocation8 + $0x3c] sm:$0xf]  ;;  %v2504_v18 = vld [vmem:[#allocation8 + $0x40] sm:$0xf] }
  0x88   : > { %v2506_v19 = vld [vmem:[#allocation8 + $0x44] sm:$0xf]  ;;  %v2508_v20 = vld [vmem:[#allocation8 + $0x48] sm:$0xf]  ;;  %v2510_v21 = vld [vmem:[#allocation8 + $0x4c] sm:$0xf] }
  0x89   : > { %v2512_v22 = vld [vmem:[#allocation8 + $0x50] sm:$0xf]  ;;  %v2514_v23 = vld [vmem:[#allocation8 + $0x54] sm:$0xf]  ;;  %v2516_v24 = vld [vmem:[#allocation8 + $0x58] sm:$0xf] }
  0x8a   : > { %v2518_v25 = vld [vmem:[#allocation8 + $0x5c] sm:$0xf]  ;;  %v2520_v26 = vld [vmem:[#allocation8 + $0x60] sm:$0xf]  ;;  %v2522_v27 = vld [vmem:[#allocation8 + $0x64] sm:$0xf] }
  0x8b   : > { %v2524_v28 = vld [vmem:[#allocation8 + $0x68] sm:$0xf]  ;;  %v2526_v29 = vld [vmem:[#allocation8 + $0x6c] sm:$0xf]  ;;  %v2528_v30 = vld [vmem:[#allocation8 + $0x70] sm:$0xf] }
  0x8c   : > { %v2530_v31 = vld [vmem:[#allocation8 + $0x74] sm:$0xf]  ;;  %v2532_v32 = vld [vmem:[#allocation8 + $0x78] sm:$0xf]  ;;  %v2534_v33 = vld [vmem:[#allocation8 + $0x7c] sm:$0xf] }
  0x8d   : > { %s2538_s23 = scalar_lea.vmem [#allocation11], %s3105_s26 }
  0x8e   : > { %2183 = dma.done.wait [#allocation3], 2048 }
  0x8f   : > { %2184 = vsyncadd [#allocation3], 4294965248  ;;  %438 = sst [smem:[#allocation17]] %s2221_s21  ;;  %v2231_v34 = vmov 0   ;;  %v328_v35 = vld [vmem:[#allocation2 + $0x8] sm:$0xff]  ;;  %v327_v36 = vld [vmem:[#allocation2] sm:$0xff]  ;;  %v387_v58 = vlaneseq }
  0x90   : > { %375 = vmatprep.mubr.bf16.mxu0 %v2231_v34  ;;  %440 = sst [smem:[#allocation17 + $0x1]] %s2221_s21  ;;  %v330_v37 = vld [vmem:[#allocation2 + $0x18] sm:$0xff]  ;;  %343 = vmatprep.subr.bf16.mxu0 %v328_v35  ;;  %v329_v38 = vld [vmem:[#allocation2 + $0x10] sm:$0xff]  ;;  %v332_v39 = vld [vmem:[#allocation2 + $0x28] sm:$0xff]  ;;  %s384_s28 = sld [smem:[#allocation10]] }
  0x91   : > { %442 = sst [smem:[#allocation17 + $0x2]] %s2222_s14  ;;  %344 = vmatpush1.bf16.msra.mxu0 %v327_v36  ;;  %v331_v40 = vld [vmem:[#allocation2 + $0x20] sm:$0xff]  ;;  %v334_v41 = vld [vmem:[#allocation2 + $0x38] sm:$0xff]  ;;  %v333_v42 = vld [vmem:[#allocation2 + $0x30] sm:$0xff]  ;;  %v388_v59 = vand.u32 127, %v387_v58  ;;  %s422_s26 = scalar_lea.hbm %s3083_s2, 4096 }
  0x92   : > { %444 = sst [smem:[#allocation17 + $0x3]] %s2223_s30  ;;  %345 = vmatprep.subr.bf16.mxu0 %v330_v37  ;;  %v336_v43 = vld [vmem:[#allocation2 + $0x48] sm:$0xff]  ;;  %v335_v44 = vld [vmem:[#allocation2 + $0x40] sm:$0xff]  ;;  %v338_v45 = vld [vmem:[#allocation2 + $0x58] sm:$0xff]  ;;  %v2575_v37 = vcombine.low %v2504_v18, %v2506_v19  ;;  %v2594_v18 = vcombine.low %v2512_v22, %v2514_v23 }
  0x93   : > { %446 = sst [smem:[#allocation17 + $0x4]] %s2224_s6  ;;  %v337_v46 = vld [vmem:[#allocation2 + $0x50] sm:$0xff]  ;;  %v340_v47 = vld [vmem:[#allocation2 + $0x68] sm:$0xff]  ;;  %v339_v48 = vld [vmem:[#allocation2 + $0x60] sm:$0xff]  ;;  %v389_v60 = vadd.s32 128, %v388_v59  ;;  %v2565_v61 = vcvt.s32.f32 %v388_v59 }
  0x94   : > { %448 = sst [smem:[#allocation17 + $0x5]] %s2222_s14  ;;  %v342_v49 = vld [vmem:[#allocation2 + $0x78] sm:$0xff]  ;;  %v341_v50 = vld [vmem:[#allocation2 + $0x70] sm:$0xff]  ;;  %1859 = vmatprep.subr.bf16.mxu1 %v2575_v37 }
  0x95   : > { %450 = sst [smem:[#allocation17 + $0x6]] %s2224_s6  ;;  %346 = vmatpush1.bf16.msra.mxu0 %v329_v38  ;;  %v2567_v62 = vcvt.s32.f32 %v389_v60  ;;  %v2579_v38 = vcombine.low %v2470_v1, %v2472_v2  ;;  %v2599_v1 = vcombine.low %v2480_v6, %v2482_v7  ;;  %v2604_v2 = vcombine.low %v2516_v24, %v2518_v25 }
  0x96   : > { %452 = sst [smem:[#allocation17 + $0x7]] %s2223_s30  ;;  %347 = vmatprep.subr.bf16.mxu0 %v332_v39  ;;  %v2583_v39 = vcombine.low %v2508_v20, %v2510_v21  ;;  %v2619_v6 = vcombine.low %v2488_v10, %v2490_v11  ;;  %v2624_v7 = vcombine.low %v2524_v28, %v2526_v29  ;;  %v2639_v10 = vcombine.low %v2496_v14, %v2498_v15 }
  0x97   : > { %454 = sst [smem:[#allocation17 + $0x8]] %s3104_s9  ;;  %1860 = vmatpush3.bf16.msra.mxu1 %v2579_v38  ;;  %v2649_v20 = vcombine.low %v2532_v32, %v2534_v33  ;;  %v2653_v14 = vcombine.low %v2500_v16, %v2502_v17  ;;  %v415_v23 = vstv %s384_s28 }
  0x98   : > { %1861 = vmatprep.subr.bf16.mxu1 %v2583_v39  ;;  %s411_s10 = ssub.f32 0.0, %s384_s28  ;;  %s2232_s28 = smov [#allocation16]  }
  0x99   : > { %348 = vmatpush1.bf16.msra.mxu0 %v331_v40  ;;  %v2589_v40 = vcombine.low %v2476_v4, %v2478_v5  ;;  %v2609_v4 = vcombine.low %v2484_v8, %v2486_v9  ;;  %v2614_v5 = vcombine.low %v2520_v26, %v2522_v27  ;;  %v2629_v8 = vcombine.low %v2492_v12, %v2494_v13  ;;  %456 = dma.general %s422_s26, 2048, %s2431_s13, %s2226_s8, %s2232_s28, [#allocation17], %s2437_s7, 0  }
  0x9a   : > { %349 = vmatprep.subr.bf16.mxu0 %v334_v41  ;;  %v2634_v9 = vcombine.low %v2528_v30, %v2530_v31  ;;  %v412_v15 = vstv %s411_s10 }
  0x9b   : > { %1862 = vmatpush3.bf16.msra.mxu1 %v2589_v40 }
  0x9c   : > { %1863 = vmatprep.subr.bf16.mxu1 %v2594_v18 }
  0x9d   : > { %350 = vmatpush1.bf16.msra.mxu0 %v333_v42 }
  0x9e   : > { %351 = vmatprep.subr.bf16.mxu0 %v336_v43 }
  0x9f   : > { %1864 = vmatpush3.bf16.msra.mxu1 %v2599_v1 }
  0xa0   : > { %1865 = vmatprep.subr.bf16.mxu1 %v2604_v2 }
  0xa1   : > { %352 = vmatpush1.bf16.msra.mxu0 %v335_v44 }
  0xa2   : > { %353 = vmatprep.subr.bf16.mxu0 %v338_v45 }
  0xa3   : > { %1866 = vmatpush3.bf16.msra.mxu1 %v2609_v4 }
  0xa4   : > { %1867 = vmatprep.subr.bf16.mxu1 %v2614_v5 }
  0xa5   : > { %354 = vmatpush1.bf16.msra.mxu0 %v337_v46 }
  0xa6   : > { %355 = vmatprep.subr.bf16.mxu0 %v340_v47 }
  0xa7   : > { %1868 = vmatpush3.bf16.msra.mxu1 %v2619_v6 }
  0xa8   : > { %1869 = vmatprep.subr.bf16.mxu1 %v2624_v7 }
  0xa9   : > { %356 = vmatpush1.bf16.msra.mxu0 %v339_v48 }
  0xaa   : > { %357 = vmatprep.subr.bf16.mxu0 %v342_v49 }
  0xab   : > { %1870 = vmatpush3.bf16.msra.mxu1 %v2629_v8 }
  0xac   : > { %1871 = vmatprep.subr.bf16.mxu1 %v2634_v9 }
  0xad   : > { %358 = vmatpush1.bf16.msra.mxu0 %v341_v50 }
  0xaf   : > { %1872 = vmatpush3.bf16.msra.mxu1 %v2639_v10 }
  0xb0   : > { %376 = vmatmul.mubr.bf16.vlgmr.msra.gmra.mrb[0].mxu0 %v290_v3  ;;  %1873 = vmatprep.subr.bf16.mxu1 %v2649_v20 }
  0xb3   : > { %1874 = vmatpush3.bf16.msra.mxu1 %v2653_v14 }
 0x183   : > { %v2553_v51 = vpop.f32.mrb[0].mxu0 }
 0x184   : > { %v2556_v52 = vand.u32 2147483647, %v2553_v51  ;;  %v2558_v53 = vpop.f32.mrb[1].mxu0  ;;  %v413_v21 = vmax.f32 %v412_v15, %v2553_v51 }
 0x185   : > { %v2561_v54 = vand.u32 2147483647, %v2558_v53  ;;  %v381_v55 = vpop.f32.mrb[2].mxu0  ;;  %v414_v22 = vmax.f32 %v412_v15, %v2558_v53 }
 0x186   : > { %v382_v56 = vpop.f32.mrb[3].mxu0  ;;  %v416_v24 = vmin.f32 %v415_v23, %v413_v21 }
 0x187   : > { %v392_v57 = vmax.f32 %v2556_v52, %v2561_v54  ;;  %v417_v25 = vmin.f32 %v415_v23, %v414_v22 }
 0x188   : > { %v418_v26 = vsub.f32 %v2553_v51, %v416_v24 }
 0x189   : > { %393 = vmax.xlane.f32.xlu0 %v392_v57  ;;  %v419_v17 = vsub.f32 %v2558_v53, %v417_v25 }
 0x216   : > { %v394_v63 = vpop.xlane.xlu0 %393 }
 0x217   : > { %vm395_vm0 = vcmp.eq.f32.partialorder %v2556_v52, %v394_v63  ;;  %vm396_vm1 = vcmp.eq.f32.partialorder %v2561_v54, %v394_v63 }
 0x218   : > { %v397_v3 = vsel %vm395_vm0, %v2565_v61, 256.0  ;;  %v398_v35 = vsel %vm396_vm1, %v2567_v62, 256.0 }
 0x219   : > { %v399_v36 = vmin.f32 %v397_v3, %v398_v35 }
 0x21b   : > { %400 = vmin.xlane.f32.xlu0 %v399_v36 }
 0x2a8   : > { %v401_v11 = vpop.xlane.xlu0 %400 }
 0x2a9   : > { %vm402_vm2 = vcmp.eq.f32.partialorder %v2565_v61, %v401_v11  ;;  %vm403_vm3 = vcmp.eq.f32.partialorder %v2567_v62, %v401_v11 }
 0x2aa   : > { %v404_v12 = vsel %vm402_vm2, -1.0, %v2556_v52  ;;  %v405_v13 = vsel %vm403_vm3, -1.0, %v2561_v54 }
 0x2ab   : > { %v406_v19 = vmax.f32 %v404_v12, %v405_v13 }
 0x2ad   : > { %407 = vmax.xlane.f32.xlu1 %v406_v19 }
 0x33a   : > { %v408_v16 = vpop.xlane.xlu1 %407 }
 0x33b   : > { %vm409_vm4 = vcmp.ge.f32.partialorder %v2556_v52, %v408_v16  ;;  %vm410_vm5 = vcmp.ge.f32.partialorder %v2561_v54, %v408_v16 }
 0x33c   : > { %v2664_v27 = vsel %vm409_vm4, %v2553_v51, %v418_v26  ;;  %v2667_v28 = vsel %vm410_vm5, %v2558_v53, %v419_v17 }
 0x33d   : > { %v457_v29 = vpack.c.bf16 %v2664_v27, %v2664_v27  ;;  %v458_v30 = vpack.c.bf16 %v2667_v28, %v2667_v28 }
 0x33f   : > { %587 = vmatprep.mubr.bf16.mxu1 %v458_v30 }
 0x340   : > { %588 = vmatmul.mubr.bf16.vlgmr.msra.gmra.mrb[0].mxu1 %v457_v29 }
 0x413   : > { %v1875_v31 = vpop.f32.mrb[0].mxu1 }
 0x414   : > { %v1876_v32 = vpop.f32.mrb[1].mxu1 }
 0x415   : > { %v1877_v33 = vadd.f32 %v1876_v32, %v1875_v31  ;;  %v1878_v41 = vpop.f32.mrb[2].mxu1 }
 0x416   : > { %v1879_v42 = vpop.f32.mrb[3].mxu1 }
 0x417   : > { %v595_v43 = vsub.f32 %v1877_v33, %v2468_v0 }
 0x418   : > { %2185 = dma.done.wait [#allocation3 + $0x1], 2048 }
 0x419   : > { %2186 = vsyncadd [#allocation3 + $0x1], 4294965248  ;;  %647 = vmatprep.mubr.bf16.mxu0 %v2231_v34  ;;  %1881 = vmatprep.subr.bf16.mxu1 %v2575_v37  ;;  %707 = sst [smem:[#allocation19]] %s2221_s21  ;;  %v600_v44 = vld [vmem:[#allocation2 + $0x88] sm:$0xff]  ;;  %v599_v45 = vld [vmem:[#allocation2 + $0x80] sm:$0xff]  ;;  %v598_v60 = vpack.c.bf16 %v595_v43, %v595_v43  ;;  %s1840_s10 = sld [smem:[#allocation10 + $0x1]] }
 0x41a   : > { %1882 = vmatpush3.bf16.msra.mxu1 %v2579_v38  ;;  %709 = sst [smem:[#allocation19 + $0x1]] %s2221_s21  ;;  %v602_v46 = vld [vmem:[#allocation2 + $0x98] sm:$0xff]  ;;  %615 = vmatprep.subr.bf16.mxu0 %v600_v44  ;;  %v601_v47 = vld [vmem:[#allocation2 + $0x90] sm:$0xff]  ;;  %v604_v48 = vld [vmem:[#allocation2 + $0xa8] sm:$0xff]  ;;  %s691_s28 = scalar_lea.hbm %s3083_s2, 6144 }
 0x41b   : > { %1883 = vmatprep.subr.bf16.mxu1 %v2583_v39  ;;  %711 = sst [smem:[#allocation19 + $0x2]] %s2222_s14  ;;  %616 = vmatpush1.bf16.msra.mxu0 %v599_v45  ;;  %v603_v49 = vld [vmem:[#allocation2 + $0xa0] sm:$0xff]  ;;  %v606_v50 = vld [vmem:[#allocation2 + $0xb8] sm:$0xff]  ;;  %v605_v51 = vld [vmem:[#allocation2 + $0xb0] sm:$0xff] }
 0x41c   : > { %713 = sst [smem:[#allocation19 + $0x3]] %s2223_s30  ;;  %617 = vmatprep.subr.bf16.mxu0 %v602_v46  ;;  %v608_v52 = vld [vmem:[#allocation2 + $0xc8] sm:$0xff]  ;;  %v607_v53 = vld [vmem:[#allocation2 + $0xc0] sm:$0xff]  ;;  %v610_v54 = vld [vmem:[#allocation2 + $0xd8] sm:$0xff] }
 0x41d   : > { %715 = sst [smem:[#allocation19 + $0x4]] %s2224_s6  ;;  %v609_v55 = vld [vmem:[#allocation2 + $0xd0] sm:$0xff]  ;;  %v612_v56 = vld [vmem:[#allocation2 + $0xe8] sm:$0xff]  ;;  %v611_v57 = vld [vmem:[#allocation2 + $0xe0] sm:$0xff] }
 0x41e   : > { %1884 = vmatpush3.bf16.msra.mxu1 %v2589_v40  ;;  %717 = sst [smem:[#allocation19 + $0x5]] %s2222_s14  ;;  %v614_v58 = vld [vmem:[#allocation2 + $0xf8] sm:$0xff]  ;;  %v613_v59 = vld [vmem:[#allocation2 + $0xf0] sm:$0xff] }
 0x41f   : > { %1885 = vmatprep.subr.bf16.mxu1 %v2594_v18  ;;  %719 = sst [smem:[#allocation19 + $0x6]] %s2224_s6  ;;  %618 = vmatpush1.bf16.msra.mxu0 %v601_v47  ;;  %v684_v30 = vstv %s1840_s10 }
 0x420   : > { %721 = sst [smem:[#allocation19 + $0x7]] %s2223_s30  ;;  %619 = vmatprep.subr.bf16.mxu0 %v604_v48 }
 0x421   : > { %723 = sst [smem:[#allocation19 + $0x8]] %s3104_s9 }
 0x422   : > { %1886 = vmatpush3.bf16.msra.mxu1 %v2599_v1  ;;  %s680_s27 = ssub.f32 0.0, %s1840_s10  ;;  %s2233_s10 = smov [#allocation18]  }
 0x423   : > { %1887 = vmatprep.subr.bf16.mxu1 %v2604_v2  ;;  %620 = vmatpush1.bf16.msra.mxu0 %v603_v49  ;;  %725 = dma.general %s691_s28, 2048, %s2458_s12, %s2229_s20, %s2233_s10, [#allocation19], %s2437_s7, 0  }
 0x424   : > { %621 = vmatprep.subr.bf16.mxu0 %v606_v50 }
 0x426   : > { %1888 = vmatpush3.bf16.msra.mxu1 %v2609_v4 }
 0x427   : > { %1889 = vmatprep.subr.bf16.mxu1 %v2614_v5  ;;  %622 = vmatpush1.bf16.msra.mxu0 %v605_v51 }
 0x428   : > { %623 = vmatprep.subr.bf16.mxu0 %v608_v52 }
 0x42a   : > { %1890 = vmatpush3.bf16.msra.mxu1 %v2619_v6 }
 0x42b   : > { %1891 = vmatprep.subr.bf16.mxu1 %v2624_v7  ;;  %624 = vmatpush1.bf16.msra.mxu0 %v607_v53 }
 0x42c   : > { %625 = vmatprep.subr.bf16.mxu0 %v610_v54 }
 0x42e   : > { %1892 = vmatpush3.bf16.msra.mxu1 %v2629_v8 }
 0x42f   : > { %1893 = vmatprep.subr.bf16.mxu1 %v2634_v9  ;;  %626 = vmatpush1.bf16.msra.mxu0 %v609_v55 }
 0x430   : > { %627 = vmatprep.subr.bf16.mxu0 %v612_v56 }
 0x432   : > { %1894 = vmatpush3.bf16.msra.mxu1 %v2639_v10 }
 0x433   : > { %1895 = vmatprep.subr.bf16.mxu1 %v2649_v20  ;;  %628 = vmatpush1.bf16.msra.mxu0 %v611_v57 }
 0x434   : > { %629 = vmatprep.subr.bf16.mxu0 %v614_v58 }
 0x436   : > { %1896 = vmatpush3.bf16.msra.mxu1 %v2653_v14 }
 0x437   : > { %630 = vmatpush1.bf16.msra.mxu0 %v613_v59 }
 0x43a   : > { %648 = vmatmul.mubr.bf16.vlgmr.msra.gmra.mrb[4].mxu0 %v598_v60 }
 0x50d   : > { %v649_v63 = vpop.f32.mrb[4].mxu0 }
 0x50e   : > { %v656_v3 = vsub.f32 %v2664_v27, %v649_v63  ;;  %v651_v35 = vpop.f32.mrb[5].mxu0  ;;  %v681_v27 = vstv %s680_s27 }
 0x50f   : > { %v657_v36 = vsub.f32 %v2667_v28, %v651_v35  ;;  %v653_v11 = vpop.f32.mrb[6].mxu0 }
 0x510   : > { %v654_v12 = vpop.f32.mrb[7].mxu0  ;;  %v659_v13 = vand.u32 2147483647, %v656_v3  ;;  %v682_v28 = vmax.f32 %v681_v27, %v656_v3 }
 0x511   : > { %v660_v19 = vand.u32 2147483647, %v657_v36  ;;  %v683_v29 = vmax.f32 %v681_v27, %v657_v36 }
 0x512   : > { %v685_v31 = vmin.f32 %v684_v30, %v682_v28 }
 0x513   : > { %v661_v15 = vmax.f32 %v659_v13, %v660_v19  ;;  %v686_v32 = vmin.f32 %v684_v30, %v683_v29 }
 0x514   : > { %v687_v33 = vsub.f32 %v656_v3, %v685_v31 }
 0x515   : > { %662 = vmax.xlane.f32.xlu0 %v661_v15  ;;  %v688_v42 = vsub.f32 %v657_v36, %v686_v32 }
 0x5a2   : > { %v663_v21 = vpop.xlane.xlu0 %662 }
 0x5a3   : > { %vm664_vm6 = vcmp.eq.f32.partialorder %v659_v13, %v663_v21  ;;  %vm665_vm7 = vcmp.eq.f32.partialorder %v660_v19, %v663_v21 }
 0x5a4   : > { %v666_v22 = vsel %vm664_vm6, %v2565_v61, 256.0  ;;  %v667_v23 = vsel %vm665_vm7, %v2567_v62, 256.0 }
 0x5a5   : > { %v668_v24 = vmin.f32 %v666_v22, %v667_v23 }
 0x5a7   : > { %669 = vmin.xlane.f32.xlu0 %v668_v24 }
 0x634   : > { %v670_v25 = vpop.xlane.xlu0 %669 }
 0x635   : > { %vm671_vm8 = vcmp.eq.f32.partialorder %v2565_v61, %v670_v25  ;;  %vm672_vm9 = vcmp.eq.f32.partialorder %v2567_v62, %v670_v25 }
 0x636   : > { %v673_v26 = vsel %vm671_vm8, -1.0, %v659_v13  ;;  %v674_v16 = vsel %vm672_vm9, -1.0, %v660_v19 }
 0x637   : > { %v675_v17 = vmax.f32 %v673_v26, %v674_v16 }
 0x639   : > { %676 = vmax.xlane.f32.xlu1 %v675_v17 }
 0x6c6   : > { %v677_v41 = vpop.xlane.xlu1 %676 }
 0x6c7   : > { %vm678_vm10 = vcmp.ge.f32.partialorder %v659_v13, %v677_v41  ;;  %vm679_vm11 = vcmp.ge.f32.partialorder %v660_v19, %v677_v41 }
 0x6c8   : > { %v2712_v43 = vsel %vm678_vm10, %v656_v3, %v687_v33  ;;  %v2714_v44 = vsel %vm679_vm11, %v657_v36, %v688_v42 }
 0x6c9   : > { %v726_v45 = vpack.c.bf16 %v2712_v43, %v2712_v43  ;;  %v727_v46 = vpack.c.bf16 %v2714_v44, %v2714_v44 }
 0x6cb   : > { %760 = vmatprep.mubr.bf16.mxu1 %v727_v46 }
 0x6cc   : > { %761 = vmatmul.mubr.bf16.vlgmr.msra.gmra.mrb[4].mxu1 %v726_v45 }
 0x79f   : > { %v1897_v47 = vpop.f32.mrb[4].mxu1 }
 0x7a0   : > { %v1898_v48 = vpop.f32.mrb[5].mxu1 }
 0x7a1   : > { %v1899_v49 = vadd.f32 %v1898_v48, %v1897_v47  ;;  %v1900_v50 = vpop.f32.mrb[6].mxu1 }
 0x7a2   : > { %v1901_v51 = vpop.f32.mrb[7].mxu1 }
 0x7a3   : > { %v768_v52 = vsub.f32 %v1899_v49, %v2468_v0 }
 0x7a4   : > { %2187 = dma.done.wait [#allocation3], 2048 }
 0x7a5   : > { %2188 = vsyncadd [#allocation3], 4294965248  ;;  %820 = vmatprep.mubr.bf16.mxu0 %v2231_v34  ;;  %1903 = vmatprep.subr.bf16.mxu1 %v2575_v37  ;;  %908 = sst [smem:[#allocation21]] %s2221_s21  ;;  %v773_v53 = vld [vmem:[#allocation2 + $0x8] sm:$0xff]  ;;  %v772_v54 = vld [vmem:[#allocation2] sm:$0xff]  ;;  %v771_v15 = vpack.c.bf16 %v768_v52, %v768_v52  ;;  %s1843_s27 = sld [smem:[#allocation10 + $0x2]] }
 0x7a6   : > { %1904 = vmatpush3.bf16.msra.mxu1 %v2579_v38  ;;  %910 = sst [smem:[#allocation21 + $0x1]] %s2221_s21  ;;  %v775_v55 = vld [vmem:[#allocation2 + $0x18] sm:$0xff]  ;;  %788 = vmatprep.subr.bf16.mxu0 %v773_v53  ;;  %v774_v56 = vld [vmem:[#allocation2 + $0x10] sm:$0xff]  ;;  %v777_v57 = vld [vmem:[#allocation2 + $0x28] sm:$0xff]  ;;  %s892_s10 = scalar_lea.hbm %s3083_s2, 8192 }
 0x7a7   : > { %1905 = vmatprep.subr.bf16.mxu1 %v2583_v39  ;;  %912 = sst [smem:[#allocation21 + $0x2]] %s2222_s14  ;;  %789 = vmatpush1.bf16.msra.mxu0 %v772_v54  ;;  %v776_v58 = vld [vmem:[#allocation2 + $0x20] sm:$0xff]  ;;  %v779_v59 = vld [vmem:[#allocation2 + $0x38] sm:$0xff]  ;;  %v778_v60 = vld [vmem:[#allocation2 + $0x30] sm:$0xff] }
 0x7a8   : > { %914 = sst [smem:[#allocation21 + $0x3]] %s2223_s30  ;;  %790 = vmatprep.subr.bf16.mxu0 %v775_v55  ;;  %v781_v63 = vld [vmem:[#allocation2 + $0x48] sm:$0xff]  ;;  %v780_v3 = vld [vmem:[#allocation2 + $0x40] sm:$0xff]  ;;  %v783_v35 = vld [vmem:[#allocation2 + $0x58] sm:$0xff] }
 0x7a9   : > { %916 = sst [smem:[#allocation21 + $0x4]] %s2224_s6  ;;  %v782_v36 = vld [vmem:[#allocation2 + $0x50] sm:$0xff]  ;;  %v785_v11 = vld [vmem:[#allocation2 + $0x68] sm:$0xff]  ;;  %v784_v12 = vld [vmem:[#allocation2 + $0x60] sm:$0xff] }
 0x7aa   : > { %1906 = vmatpush3.bf16.msra.mxu1 %v2589_v40  ;;  %918 = sst [smem:[#allocation21 + $0x5]] %s2222_s14  ;;  %v787_v13 = vld [vmem:[#allocation2 + $0x78] sm:$0xff]  ;;  %v786_v19 = vld [vmem:[#allocation2 + $0x70] sm:$0xff] }
 0x7ab   : > { %1907 = vmatprep.subr.bf16.mxu1 %v2594_v18  ;;  %920 = sst [smem:[#allocation21 + $0x6]] %s2224_s6  ;;  %791 = vmatpush1.bf16.msra.mxu0 %v774_v56 }
 0x7ac   : > { %922 = sst [smem:[#allocation21 + $0x7]] %s2223_s30  ;;  %792 = vmatprep.subr.bf16.mxu0 %v777_v57 }
 0x7ad   : > { %924 = sst [smem:[#allocation21 + $0x8]] %s3104_s9 }
 0x7ae   : > { %1908 = vmatpush3.bf16.msra.mxu1 %v2599_v1  ;;  %s881_s24 = ssub.f32 0.0, %s1843_s27 }
 0x7af   : > { %1909 = vmatprep.subr.bf16.mxu1 %v2604_v2  ;;  %793 = vmatpush1.bf16.msra.mxu0 %v776_v58 }
 0x7b0   : > { %794 = vmatprep.subr.bf16.mxu0 %v779_v59  ;;  %v882_v59 = vstv %s881_s24 }
 0x7b2   : > { %1910 = vmatpush3.bf16.msra.mxu1 %v2609_v4 }
 0x7b3   : > { %1911 = vmatprep.subr.bf16.mxu1 %v2614_v5  ;;  %795 = vmatpush1.bf16.msra.mxu0 %v778_v60 }
 0x7b4   : > { %796 = vmatprep.subr.bf16.mxu0 %v781_v63 }
 0x7b6   : > { %1912 = vmatpush3.bf16.msra.mxu1 %v2619_v6 }
 0x7b7   : > { %1913 = vmatprep.subr.bf16.mxu1 %v2624_v7  ;;  %797 = vmatpush1.bf16.msra.mxu0 %v780_v3  ;;  %v885_v3 = vstv %s1843_s27  ;;  %s2234_s27 = smov [#allocation20]  }
 0x7b8   : > { %798 = vmatprep.subr.bf16.mxu0 %v783_v35  ;;  %926 = dma.general %s892_s10, 2048, %s2431_s13, %s2226_s8, %s2234_s27, [#allocation21], %s2437_s7, 0  }
 0x7ba   : > { %1914 = vmatpush3.bf16.msra.mxu1 %v2629_v8 }
 0x7bb   : > { %1915 = vmatprep.subr.bf16.mxu1 %v2634_v9  ;;  %799 = vmatpush1.bf16.msra.mxu0 %v782_v36 }
 0x7bc   : > { %800 = vmatprep.subr.bf16.mxu0 %v785_v11 }
 0x7be   : > { %1916 = vmatpush3.bf16.msra.mxu1 %v2639_v10 }
 0x7bf   : > { %1917 = vmatprep.subr.bf16.mxu1 %v2649_v20  ;;  %801 = vmatpush1.bf16.msra.mxu0 %v784_v12 }
 0x7c0   : > { %802 = vmatprep.subr.bf16.mxu0 %v787_v13 }
 0x7c2   : > { %1918 = vmatpush3.bf16.msra.mxu1 %v2653_v14 }
 0x7c3   : > { %803 = vmatpush1.bf16.msra.mxu0 %v786_v19 }
 0x7c6   : > { %821 = vmatmul.mubr.bf16.vlgmr.msra.gmra.mrb[8].mxu0 %v771_v15 }
 0x899   : > { %v822_v21 = vpop.f32.mrb[8].mxu0 }
 0x89a   : > { %v2754_v22 = vsub.f32 %v2712_v43, %v822_v21  ;;  %v824_v23 = vpop.f32.mrb[9].mxu0 }
 0x89b   : > { %v2757_v24 = vsub.f32 %v2714_v44, %v824_v23  ;;  %v826_v25 = vpop.f32.mrb[10].mxu0 }
 0x89c   : > { %v827_v26 = vpop.f32.mrb[11].mxu0  ;;  %v832_v16 = vand.u32 2147483647, %v2754_v22  ;;  %v883_v60 = vmax.f32 %v882_v59, %v2754_v22 }
 0x89d   : > { %v833_v17 = vand.u32 2147483647, %v2757_v24  ;;  %v884_v63 = vmax.f32 %v882_v59, %v2757_v24 }
 0x89e   : > { %v886_v35 = vmin.f32 %v885_v3, %v883_v60 }
 0x89f   : > { %v834_v27 = vmax.f32 %v832_v16, %v833_v17  ;;  %v887_v36 = vmin.f32 %v885_v3, %v884_v63 }
 0x8a0   : > { %v888_v11 = vsub.f32 %v2754_v22, %v886_v35 }
 0x8a1   : > { %835 = vmax.xlane.f32.xlu0 %v834_v27  ;;  %v889_v13 = vsub.f32 %v2757_v24, %v887_v36 }
 0x92e   : > { %v836_v28 = vpop.xlane.xlu0 %835 }
 0x92f   : > { %vm837_vm12 = vcmp.eq.f32.partialorder %v832_v16, %v836_v28  ;;  %vm838_vm13 = vcmp.eq.f32.partialorder %v833_v17, %v836_v28 }
 0x930   : > { %v839_v29 = vsel %vm837_vm12, %v2565_v61, 256.0  ;;  %v840_v30 = vsel %vm838_vm13, %v2567_v62, 256.0 }
 0x931   : > { %v841_v31 = vmin.f32 %v839_v29, %v840_v30 }
 0x933   : > { %842 = vmin.xlane.f32.xlu0 %v841_v31 }
 0x9c0   : > { %v843_v32 = vpop.xlane.xlu0 %842 }
 0x9c1   : > { %vm844_vm14 = vcmp.eq.f32.partialorder %v2565_v61, %v843_v32  ;;  %vm845_vm15 = vcmp.eq.f32.partialorder %v2567_v62, %v843_v32 }
 0x9c2   : > { %v846_v33 = vsel %vm844_vm14, -1.0, %v832_v16  ;;  %v847_v41 = vsel %vm845_vm15, -1.0, %v833_v17 }
 0x9c3   : > { %v848_v42 = vmax.f32 %v846_v33, %v847_v41 }
 0x9c5   : > { %849 = vmax.xlane.f32.xlu1 %v848_v42 }
 0xa52   : > { %v850_v43 = vpop.xlane.xlu1 %849 }
 0xa53   : > { %vm851_vm0 = vcmp.eq.f32.partialorder %v846_v33, %v850_v43  ;;  %vm852_vm1 = vcmp.eq.f32.partialorder %v847_v41, %v850_v43 }
 0xa54   : > { %v853_v44 = vsel %vm851_vm0, %v2565_v61, 256.0  ;;  %v854_v45 = vsel %vm852_vm1, %v2567_v62, 256.0 }
 0xa55   : > { %v855_v46 = vmin.f32 %v853_v44, %v854_v45 }
 0xa57   : > { %856 = vmin.xlane.f32.xlu1 %v855_v46 }
 0xae4   : > { %v857_v47 = vpop.xlane.xlu1 %856 }
 0xae5   : > { %vm858_vm2 = vcmp.eq.f32.partialorder %v2565_v61, %v857_v47  ;;  %vm859_vm3 = vcmp.eq.f32.partialorder %v2567_v62, %v857_v47 }
 0xae6   : > { %v860_v48 = vsel %vm858_vm2, -1.0, %v846_v33  ;;  %v861_v49 = vsel %vm859_vm3, -1.0, %v847_v41 }
 0xae7   : > { %v862_v50 = vmax.f32 %v860_v48, %v861_v49 }
 0xae9   : > { %863 = vmax.xlane.f32.xlu0 %v862_v50 }
 0xb76   : > { %v864_v51 = vpop.xlane.xlu0 %863 }
 0xb77   : > { %vm865_vm4 = vcmp.eq.f32.partialorder %v860_v48, %v864_v51  ;;  %vm866_vm5 = vcmp.eq.f32.partialorder %v861_v49, %v864_v51 }
 0xb78   : > { %v867_v52 = vsel %vm865_vm4, %v2565_v61, 256.0  ;;  %v868_v53 = vsel %vm866_vm5, %v2567_v62, 256.0 }
 0xb79   : > { %v869_v54 = vmin.f32 %v867_v52, %v868_v53 }
 0xb7b   : > { %870 = vmin.xlane.f32.xlu1 %v869_v54 }
 0xc08   : > { %v871_v55 = vpop.xlane.xlu1 %870 }
 0xc09   : > { %vm872_vm6 = vcmp.eq.f32.partialorder %v2565_v61, %v871_v55  ;;  %vm873_vm7 = vcmp.eq.f32.partialorder %v2567_v62, %v871_v55 }
 0xc0a   : > { %v874_v56 = vsel %vm872_vm6, -1.0, %v860_v48  ;;  %v875_v57 = vsel %vm873_vm7, -1.0, %v861_v49 }
 0xc0b   : > { %v876_v58 = vmax.f32 %v874_v56, %v875_v57 }
 0xc0d   : > { %877 = vmax.xlane.f32.xlu0 %v876_v58 }
 0xc9a   : > { %v878_v12 = vpop.xlane.xlu0 %877 }
 0xc9b   : > { %vm879_vm8 = vcmp.ge.f32.partialorder %v832_v16, %v878_v12  ;;  %vm880_vm9 = vcmp.ge.f32.partialorder %v833_v17, %v878_v12 }
 0xc9c   : > { %v2778_v19 = vsel %vm879_vm8, %v2754_v22, %v888_v11  ;;  %v2781_v15 = vsel %vm880_vm9, %v2757_v24, %v889_v13 }
 0xc9d   : > { %v927_v21 = vpack.c.bf16 %v2778_v19, %v2778_v19  ;;  %v928_v23 = vpack.c.bf16 %v2781_v15, %v2781_v15 }
 0xc9f   : > { %961 = vmatprep.mubr.bf16.mxu1 %v928_v23 }
 0xca0   : > { %962 = vmatmul.mubr.bf16.vlgmr.msra.gmra.mrb[8].mxu1 %v927_v21 }
 0xd73   : > { %v1919_v22 = vpop.f32.mrb[8].mxu1 }
 0xd74   : > { %v1920_v25 = vpop.f32.mrb[9].mxu1 }
 0xd75   : > { %v1921_v26 = vadd.f32 %v1920_v25, %v1919_v22  ;;  %v1922_v24 = vpop.f32.mrb[10].mxu1 }
 0xd76   : > { %v1923_v16 = vpop.f32.mrb[11].mxu1 }
 0xd77   : > { %v969_v17 = vsub.f32 %v1921_v26, %v2468_v0 }
 0xd78   : > { %2189 = dma.done.wait [#allocation3 + $0x1], 2048 }
 0xd79   : > { %2190 = vsyncadd [#allocation3 + $0x1], 4294965248  ;;  %1021 = vmatprep.mubr.bf16.mxu0 %v2231_v34  ;;  %1925 = vmatprep.subr.bf16.mxu1 %v2575_v37  ;;  %1151 = sst [smem:[#allocation23]] %s2221_s21  ;;  %v974_v27 = vld [vmem:[#allocation2 + $0x88] sm:$0xff]  ;;  %v973_v28 = vld [vmem:[#allocation2 + $0x80] sm:$0xff]  ;;  %v972_v50 = vpack.c.bf16 %v969_v17, %v969_v17  ;;  %s1846_s13 = sld [smem:[#allocation10 + $0x3]] }
 0xd7a   : > { %1926 = vmatpush3.bf16.msra.mxu1 %v2579_v38  ;;  %1153 = sst [smem:[#allocation23 + $0x1]] %s2221_s21  ;;  %v976_v29 = vld [vmem:[#allocation2 + $0x98] sm:$0xff]  ;;  %989 = vmatprep.subr.bf16.mxu0 %v974_v27  ;;  %v975_v30 = vld [vmem:[#allocation2 + $0x90] sm:$0xff]  ;;  %v978_v31 = vld [vmem:[#allocation2 + $0xa8] sm:$0xff]  ;;  %s2235_s8 = smov [#allocation22]  }
 0xd7b   : > { %1927 = vmatprep.subr.bf16.mxu1 %v2583_v39  ;;  %1155 = sst [smem:[#allocation23 + $0x2]] %s2222_s14  ;;  %990 = vmatpush1.bf16.msra.mxu0 %v973_v28  ;;  %v977_v32 = vld [vmem:[#allocation2 + $0xa0] sm:$0xff]  ;;  %v980_v33 = vld [vmem:[#allocation2 + $0xb8] sm:$0xff]  ;;  %v979_v41 = vld [vmem:[#allocation2 + $0xb0] sm:$0xff] }
 0xd7c   : > { %1157 = sst [smem:[#allocation23 + $0x3]] %s2223_s30  ;;  %991 = vmatprep.subr.bf16.mxu0 %v976_v29  ;;  %v982_v42 = vld [vmem:[#allocation2 + $0xc8] sm:$0xff]  ;;  %v981_v43 = vld [vmem:[#allocation2 + $0xc0] sm:$0xff]  ;;  %v984_v44 = vld [vmem:[#allocation2 + $0xd8] sm:$0xff] }
 0xd7d   : > { %1159 = sst [smem:[#allocation23 + $0x4]] %s2224_s6  ;;  %v983_v45 = vld [vmem:[#allocation2 + $0xd0] sm:$0xff]  ;;  %v986_v46 = vld [vmem:[#allocation2 + $0xe8] sm:$0xff]  ;;  %v985_v47 = vld [vmem:[#allocation2 + $0xe0] sm:$0xff] }
 0xd7e   : > { %1928 = vmatpush3.bf16.msra.mxu1 %v2589_v40  ;;  %1161 = sst [smem:[#allocation23 + $0x5]] %s2222_s14  ;;  %v988_v48 = vld [vmem:[#allocation2 + $0xf8] sm:$0xff]  ;;  %v987_v49 = vld [vmem:[#allocation2 + $0xf0] sm:$0xff] }
 0xd7f   : > { %1929 = vmatprep.subr.bf16.mxu1 %v2594_v18  ;;  %1163 = sst [smem:[#allocation23 + $0x6]] %s2224_s6  ;;  %992 = vmatpush1.bf16.msra.mxu0 %v975_v30  ;;  %s1135_s6 = scalar_lea.hbm %s3083_s2, 10240 }
 0xd80   : > { %1165 = sst [smem:[#allocation23 + $0x7]] %s2223_s30  ;;  %993 = vmatprep.subr.bf16.mxu0 %v978_v31 }
 0xd81   : > { %1167 = sst [smem:[#allocation23 + $0x8]] %s3104_s9 }
 0xd82   : > { %1930 = vmatpush3.bf16.msra.mxu1 %v2599_v1  ;;  %s1124_s21 = ssub.f32 0.0, %s1846_s13 }
 0xd83   : > { %1931 = vmatprep.subr.bf16.mxu1 %v2604_v2  ;;  %994 = vmatpush1.bf16.msra.mxu0 %v977_v32  ;;  %1169 = dma.general %s1135_s6, 2048, %s2458_s12, %s2229_s20, %s2235_s8, [#allocation23], %s2437_s7, 0  }
 0xd84   : > { %995 = vmatprep.subr.bf16.mxu0 %v980_v33 }
 0xd86   : > { %1932 = vmatpush3.bf16.msra.mxu1 %v2609_v4 }
 0xd87   : > { %1933 = vmatprep.subr.bf16.mxu1 %v2614_v5  ;;  %996 = vmatpush1.bf16.msra.mxu0 %v979_v41 }
 0xd88   : > { %997 = vmatprep.subr.bf16.mxu0 %v982_v42 }
 0xd8a   : > { %1934 = vmatpush3.bf16.msra.mxu1 %v2619_v6 }
 0xd8b   : > { %1935 = vmatprep.subr.bf16.mxu1 %v2624_v7  ;;  %998 = vmatpush1.bf16.msra.mxu0 %v981_v43 }
 0xd8c   : > { %999 = vmatprep.subr.bf16.mxu0 %v984_v44 }
 0xd8e   : > { %1936 = vmatpush3.bf16.msra.mxu1 %v2629_v8 }
 0xd8f   : > { %1937 = vmatprep.subr.bf16.mxu1 %v2634_v9  ;;  %1000 = vmatpush1.bf16.msra.mxu0 %v983_v45 }
 0xd90   : > { %1001 = vmatprep.subr.bf16.mxu0 %v986_v46 }
 0xd92   : > { %1938 = vmatpush3.bf16.msra.mxu1 %v2639_v10 }
 0xd93   : > { %1939 = vmatprep.subr.bf16.mxu1 %v2649_v20  ;;  %1002 = vmatpush1.bf16.msra.mxu0 %v985_v47 }
 0xd94   : > { %1003 = vmatprep.subr.bf16.mxu0 %v988_v48 }
 0xd96   : > { %1940 = vmatpush3.bf16.msra.mxu1 %v2653_v14 }
 0xd97   : > { %1004 = vmatpush1.bf16.msra.mxu0 %v987_v49 }
 0xd9a   : > { %1022 = vmatmul.mubr.bf16.vlgmr.msra.gmra.mrb[12].mxu0 %v972_v50 }
 0xe6d   : > { %v1023_v51 = vpop.f32.mrb[12].mxu0 }
 0xe6e   : > { %v2821_v52 = vsub.f32 %v2778_v19, %v1023_v51  ;;  %v1025_v53 = vpop.f32.mrb[13].mxu0 }
 0xe6f   : > { %v2824_v54 = vsub.f32 %v2781_v15, %v1025_v53  ;;  %v1027_v55 = vpop.f32.mrb[14].mxu0 }
 0xe70   : > { %v1028_v56 = vpop.f32.mrb[15].mxu0  ;;  %v2827_v57 = vand.u32 2147483647, %v2821_v52 }
 0xe71   : > { %v2830_v58 = vand.u32 2147483647, %v2824_v54 }
 0xe73   : > { %v1035_v59 = vmax.f32 %v2827_v57, %v2830_v58 }
 0xe75   : > { %1036 = vmax.xlane.f32.xlu0 %v1035_v59 }
 0xf02   : > { %v1037_v60 = vpop.xlane.xlu0 %1036 }
 0xf03   : > { %vm1038_vm10 = vcmp.eq.f32.partialorder %v2827_v57, %v1037_v60  ;;  %vm1039_vm11 = vcmp.eq.f32.partialorder %v2830_v58, %v1037_v60 }
 0xf04   : > { %v1040_v63 = vsel %vm1038_vm10, %v2565_v61, 256.0  ;;  %v1041_v3 = vsel %vm1039_vm11, %v2567_v62, 256.0 }
 0xf05   : > { %v1042_v35 = vmin.f32 %v1040_v63, %v1041_v3 }
 0xf07   : > { %1043 = vmin.xlane.f32.xlu0 %v1042_v35 }
 0xf94   : > { %v1044_v36 = vpop.xlane.xlu0 %1043 }
 0xf95   : > { %vm1045_vm12 = vcmp.eq.f32.partialorder %v2565_v61, %v1044_v36  ;;  %vm1046_vm13 = vcmp.eq.f32.partialorder %v2567_v62, %v1044_v36 }
 0xf96   : > { %v1047_v11 = vsel %vm1045_vm12, -1.0, %v2827_v57  ;;  %v1048_v12 = vsel %vm1046_vm13, -1.0, %v2830_v58 }
 0xf97   : > { %v1049_v13 = vmax.f32 %v1047_v11, %v1048_v12 }
 0xf99   : > { %1050 = vmax.xlane.f32.xlu1 %v1049_v13 }
0x1026   : > { %v1051_v19 = vpop.xlane.xlu1 %1050 }
0x1027   : > { %vm1052_vm14 = vcmp.eq.f32.partialorder %v1047_v11, %v1051_v19  ;;  %vm1053_vm15 = vcmp.eq.f32.partialorder %v1048_v12, %v1051_v19  ;;  %v1125_v19 = vstv %s1124_s21 }
0x1028   : > { %v1054_v15 = vsel %vm1052_vm14, %v2565_v61, 256.0  ;;  %v1055_v21 = vsel %vm1053_vm15, %v2567_v62, 256.0 }
0x1029   : > { %v1056_v23 = vmin.f32 %v1054_v15, %v1055_v21  ;;  %v1126_v15 = vmax.f32 %v1125_v19, %v2821_v52  ;;  %v1127_v21 = vmax.f32 %v1125_v19, %v2824_v54 }
0x102b   : > { %1057 = vmin.xlane.f32.xlu1 %v1056_v23  ;;  %v1128_v23 = vstv %s1846_s13 }
0x10b8   : > { %v1058_v22 = vpop.xlane.xlu1 %1057 }
0x10b9   : > { %vm1059_vm0 = vcmp.eq.f32.partialorder %v2565_v61, %v1058_v22  ;;  %vm1060_vm1 = vcmp.eq.f32.partialorder %v2567_v62, %v1058_v22  ;;  %v1129_v22 = vmin.f32 %v1128_v23, %v1126_v15 }
0x10ba   : > { %v1061_v25 = vsel %vm1059_vm0, -1.0, %v1047_v11  ;;  %v1062_v26 = vsel %vm1060_vm1, -1.0, %v1048_v12 }
0x10bb   : > { %v1063_v24 = vmax.f32 %v1061_v25, %v1062_v26 }
0x10bd   : > { %1064 = vmax.xlane.f32.xlu0 %v1063_v24 }
0x114a   : > { %v1065_v16 = vpop.xlane.xlu0 %1064 }
0x114b   : > { %vm1066_vm2 = vcmp.eq.f32.partialorder %v1061_v25, %v1065_v16  ;;  %vm1067_vm3 = vcmp.eq.f32.partialorder %v1062_v26, %v1065_v16 }
0x114c   : > { %v1068_v17 = vsel %vm1066_vm2, %v2565_v61, 256.0  ;;  %v1069_v27 = vsel %vm1067_vm3, %v2567_v62, 256.0 }
0x114d   : > { %v1070_v28 = vmin.f32 %v1068_v17, %v1069_v27 }
0x114f   : > { %1071 = vmin.xlane.f32.xlu1 %v1070_v28 }
0x11dc   : > { %v1072_v29 = vpop.xlane.xlu1 %1071 }
0x11dd   : > { %vm1073_vm4 = vcmp.eq.f32.partialorder %v2565_v61, %v1072_v29  ;;  %vm1074_vm5 = vcmp.eq.f32.partialorder %v2567_v62, %v1072_v29 }
0x11de   : > { %v1075_v30 = vsel %vm1073_vm4, -1.0, %v1061_v25  ;;  %v1076_v31 = vsel %vm1074_vm5, -1.0, %v1062_v26  ;;  %v1130_v25 = vmin.f32 %v1128_v23, %v1127_v21  ;;  %v1131_v26 = vsub.f32 %v2821_v52, %v1129_v22 }
0x11df   : > { %v1077_v32 = vmax.f32 %v1075_v30, %v1076_v31 }
0x11e0   : > { %v1132_v16 = vsub.f32 %v2824_v54, %v1130_v25 }
0x11e1   : > { %1078 = vmax.xlane.f32.xlu0 %v1077_v32 }
0x126e   : > { %v1079_v33 = vpop.xlane.xlu0 %1078 }
0x126f   : > { %vm1080_vm6 = vcmp.eq.f32.partialorder %v1075_v30, %v1079_v33  ;;  %vm1081_vm7 = vcmp.eq.f32.partialorder %v1076_v31, %v1079_v33 }
0x1270   : > { %v1082_v41 = vsel %vm1080_vm6, %v2565_v61, 256.0  ;;  %v1083_v42 = vsel %vm1081_vm7, %v2567_v62, 256.0 }
0x1271   : > { %v1084_v43 = vmin.f32 %v1082_v41, %v1083_v42 }
0x1273   : > { %1085 = vmin.xlane.f32.xlu1 %v1084_v43 }
0x1300   : > { %v1086_v44 = vpop.xlane.xlu1 %1085 }
0x1301   : > { %vm1087_vm8 = vcmp.eq.f32.partialorder %v2565_v61, %v1086_v44  ;;  %vm1088_vm9 = vcmp.eq.f32.partialorder %v2567_v62, %v1086_v44 }
0x1302   : > { %v1089_v45 = vsel %vm1087_vm8, -1.0, %v1075_v30  ;;  %v1090_v46 = vsel %vm1088_vm9, -1.0, %v1076_v31 }
0x1303   : > { %v1091_v47 = vmax.f32 %v1089_v45, %v1090_v46 }
0x1305   : > { %1092 = vmax.xlane.f32.xlu0 %v1091_v47 }
0x1392   : > { %v1093_v48 = vpop.xlane.xlu0 %1092 }
0x1393   : > { %vm1094_vm10 = vcmp.eq.f32.partialorder %v1089_v45, %v1093_v48  ;;  %vm1095_vm11 = vcmp.eq.f32.partialorder %v1090_v46, %v1093_v48 }
0x1394   : > { %v1096_v49 = vsel %vm1094_vm10, %v2565_v61, 256.0  ;;  %v1097_v50 = vsel %vm1095_vm11, %v2567_v62, 256.0 }
0x1395   : > { %v1098_v51 = vmin.f32 %v1096_v49, %v1097_v50 }
0x1397   : > { %1099 = vmin.xlane.f32.xlu1 %v1098_v51 }
0x1424   : > { %v1100_v53 = vpop.xlane.xlu1 %1099 }
0x1425   : > { %vm1101_vm12 = vcmp.eq.f32.partialorder %v2565_v61, %v1100_v53  ;;  %vm1102_vm13 = vcmp.eq.f32.partialorder %v2567_v62, %v1100_v53 }
0x1426   : > { %v1103_v55 = vsel %vm1101_vm12, -1.0, %v1089_v45  ;;  %v1104_v56 = vsel %vm1102_vm13, -1.0, %v1090_v46 }
0x1427   : > { %v1105_v59 = vmax.f32 %v1103_v55, %v1104_v56 }
0x1429   : > { %1106 = vmax.xlane.f32.xlu0 %v1105_v59 }
0x14b6   : > { %v1107_v60 = vpop.xlane.xlu0 %1106 }
0x14b7   : > { %vm1108_vm14 = vcmp.eq.f32.partialorder %v1103_v55, %v1107_v60  ;;  %vm1109_vm15 = vcmp.eq.f32.partialorder %v1104_v56, %v1107_v60 }
0x14b8   : > { %v1110_v63 = vsel %vm1108_vm14, %v2565_v61, 256.0  ;;  %v1111_v3 = vsel %vm1109_vm15, %v2567_v62, 256.0 }
0x14b9   : > { %v1112_v35 = vmin.f32 %v1110_v63, %v1111_v3 }
0x14bb   : > { %1113 = vmin.xlane.f32.xlu1 %v1112_v35 }
0x1548   : > { %v1114_v36 = vpop.xlane.xlu1 %1113 }
0x1549   : > { %vm1115_vm0 = vcmp.eq.f32.partialorder %v2565_v61, %v1114_v36  ;;  %vm1116_vm1 = vcmp.eq.f32.partialorder %v2567_v62, %v1114_v36 }
0x154a   : > { %v1117_v11 = vsel %vm1115_vm0, -1.0, %v1103_v55  ;;  %v1118_v12 = vsel %vm1116_vm1, -1.0, %v1104_v56 }
0x154b   : > { %v1119_v13 = vmax.f32 %v1117_v11, %v1118_v12 }
0x154d   : > { %1120 = vmax.xlane.f32.xlu0 %v1119_v13 }
0x15da   : > { %v1121_v24 = vpop.xlane.xlu0 %1120 }
0x15db   : > { %vm1122_vm2 = vcmp.ge.f32.partialorder %v2827_v57, %v1121_v24  ;;  %vm1123_vm3 = vcmp.ge.f32.partialorder %v2830_v58, %v1121_v24 }
0x15dc   : > { %v2869_v17 = vsel %vm1122_vm2, %v2821_v52, %v1131_v26  ;;  %v2872_v27 = vsel %vm1123_vm3, %v2824_v54, %v1132_v16 }
0x15dd   : > { %v1170_v28 = vpack.c.bf16 %v2869_v17, %v2869_v17  ;;  %v1171_v29 = vpack.c.bf16 %v2872_v27, %v2872_v27 }
0x15df   : > { %1204 = vmatprep.mubr.bf16.mxu1 %v1171_v29 }
0x15e0   : > { %1205 = vmatmul.mubr.bf16.vlgmr.msra.gmra.mrb[12].mxu1 %v1170_v28 }
0x16b3   : > { %v1941_v52 = vpop.f32.mrb[12].mxu1 }
0x16b4   : > { %v1942_v57 = vpop.f32.mrb[13].mxu1 }
0x16b5   : > { %v1943_v58 = vadd.f32 %v1942_v57, %v1941_v52  ;;  %v1944_v54 = vpop.f32.mrb[14].mxu1 }
0x16b6   : > { %v1945_v30 = vpop.f32.mrb[15].mxu1 }
0x16b7   : > { %v1212_v31 = vsub.f32 %v1943_v58, %v2468_v0 }
0x16b8   : > { %2191 = dma.done.wait [#allocation3], 2048 }
0x16b9   : > { %2192 = vsyncadd [#allocation3], 4294965248  ;;  %1264 = vmatprep.mubr.bf16.mxu0 %v2231_v34  ;;  %1947 = vmatprep.subr.bf16.mxu1 %v2575_v37  ;;  %v1217_v32 = vld [vmem:[#allocation2 + $0x8] sm:$0xff]  ;;  %v1216_v33 = vld [vmem:[#allocation2] sm:$0xff]  ;;  %v1215_v43 = vpack.c.bf16 %v1212_v31, %v1212_v31  ;;  %s1849_s7 = sld [smem:[#allocation10 + $0x4]] }
0x16ba   : > { %1948 = vmatpush3.bf16.msra.mxu1 %v2579_v38  ;;  %v1219_v41 = vld [vmem:[#allocation2 + $0x18] sm:$0xff]  ;;  %1232 = vmatprep.subr.bf16.mxu0 %v1217_v32  ;;  %v1218_v42 = vld [vmem:[#allocation2 + $0x10] sm:$0xff]  ;;  %v1221_v37 = vld [vmem:[#allocation2 + $0x28] sm:$0xff] }
0x16bb   : > { %1949 = vmatprep.subr.bf16.mxu1 %v2583_v39  ;;  %1233 = vmatpush1.bf16.msra.mxu0 %v1216_v33  ;;  %v1220_v38 = vld [vmem:[#allocation2 + $0x20] sm:$0xff]  ;;  %v1223_v39 = vld [vmem:[#allocation2 + $0x38] sm:$0xff] }
0x16bc   : > { %1234 = vmatprep.subr.bf16.mxu0 %v1219_v41 }
0x16be   : > { %1950 = vmatpush3.bf16.msra.mxu1 %v2589_v40  ;;  %v1222_v40 = vld [vmem:[#allocation2 + $0x30] sm:$0xff] }
0x16bf   : > { %1951 = vmatprep.subr.bf16.mxu1 %v2594_v18  ;;  %1235 = vmatpush1.bf16.msra.mxu0 %v1218_v42  ;;  %v1225_v18 = vld [vmem:[#allocation2 + $0x48] sm:$0xff]  ;;  %s1395_s12 = ssub.f32 0.0, %s1849_s7 }
0x16c0   : > { %1236 = vmatprep.subr.bf16.mxu0 %v1221_v37 }
0x16c2   : > { %1952 = vmatpush3.bf16.msra.mxu1 %v2599_v1  ;;  %v1224_v1 = vld [vmem:[#allocation2 + $0x40] sm:$0xff] }
0x16c3   : > { %1953 = vmatprep.subr.bf16.mxu1 %v2604_v2  ;;  %1237 = vmatpush1.bf16.msra.mxu0 %v1220_v38  ;;  %v1227_v2 = vld [vmem:[#allocation2 + $0x58] sm:$0xff] }
0x16c4   : > { %1238 = vmatprep.subr.bf16.mxu0 %v1223_v39 }
0x16c6   : > { %1954 = vmatpush3.bf16.msra.mxu1 %v2609_v4  ;;  %v1226_v4 = vld [vmem:[#allocation2 + $0x50] sm:$0xff] }
0x16c7   : > { %1955 = vmatprep.subr.bf16.mxu1 %v2614_v5  ;;  %1239 = vmatpush1.bf16.msra.mxu0 %v1222_v40  ;;  %v1229_v5 = vld [vmem:[#allocation2 + $0x68] sm:$0xff] }
0x16c8   : > { %1240 = vmatprep.subr.bf16.mxu0 %v1225_v18 }
0x16ca   : > { %1956 = vmatpush3.bf16.msra.mxu1 %v2619_v6  ;;  %v1228_v6 = vld [vmem:[#allocation2 + $0x60] sm:$0xff] }
0x16cb   : > { %1957 = vmatprep.subr.bf16.mxu1 %v2624_v7  ;;  %1241 = vmatpush1.bf16.msra.mxu0 %v1224_v1  ;;  %v1231_v7 = vld [vmem:[#allocation2 + $0x78] sm:$0xff] }
0x16cc   : > { %1242 = vmatprep.subr.bf16.mxu0 %v1227_v2 }
0x16ce   : > { %1958 = vmatpush3.bf16.msra.mxu1 %v2629_v8  ;;  %v1230_v8 = vld [vmem:[#allocation2 + $0x70] sm:$0xff] }
0x16cf   : > { %1959 = vmatprep.subr.bf16.mxu1 %v2634_v9  ;;  %1243 = vmatpush1.bf16.msra.mxu0 %v1226_v4 }
0x16d0   : > { %1244 = vmatprep.subr.bf16.mxu0 %v1229_v5 }
0x16d2   : > { %1960 = vmatpush3.bf16.msra.mxu1 %v2639_v10 }
0x16d3   : > { %1961 = vmatprep.subr.bf16.mxu1 %v2649_v20  ;;  %1245 = vmatpush1.bf16.msra.mxu0 %v1228_v6 }
0x16d4   : > { %1246 = vmatprep.subr.bf16.mxu0 %v1231_v7 }
0x16d6   : > { %1962 = vmatpush3.bf16.msra.mxu1 %v2653_v14 }
0x16d7   : > { %1247 = vmatpush1.bf16.msra.mxu0 %v1230_v8 }
0x16da   : > { %1265 = vmatmul.mubr.bf16.vlgmr.msra.gmra.mrb[16].mxu0 %v1215_v43 }
0x17ad   : > { %v1266_v9 = vpop.f32.mrb[16].mxu0 }
0x17ae   : > { %v2903_v10 = vsub.f32 %v2869_v17, %v1266_v9  ;;  %v1268_v44 = vpop.f32.mrb[17].mxu0 }
0x17af   : > { %v2906_v20 = vsub.f32 %v2872_v27, %v1268_v44  ;;  %v1270_v45 = vpop.f32.mrb[18].mxu0 }
0x17b0   : > { %v1271_v46 = vpop.f32.mrb[19].mxu0  ;;  %v2909_v14 = vand.u32 2147483647, %v2903_v10 }
0x17b1   : > { %v2912_v47 = vand.u32 2147483647, %v2906_v20 }
0x17b3   : > { %v1278_v48 = vmax.f32 %v2909_v14, %v2912_v47 }
0x17b5   : > { %1279 = vmax.xlane.f32.xlu0 %v1278_v48 }
0x1842   : > { %v1280_v49 = vpop.xlane.xlu0 %1279 }
0x1843   : > { %vm1281_vm4 = vcmp.eq.f32.partialorder %v2909_v14, %v1280_v49  ;;  %vm1282_vm5 = vcmp.eq.f32.partialorder %v2912_v47, %v1280_v49 }
0x1844   : > { %v1283_v50 = vsel %vm1281_vm4, %v2565_v61, 256.0  ;;  %v1284_v51 = vsel %vm1282_vm5, %v2567_v62, 256.0 }
0x1845   : > { %v1285_v53 = vmin.f32 %v1283_v50, %v1284_v51 }
0x1847   : > { %1286 = vmin.xlane.f32.xlu0 %v1285_v53 }
0x18d4   : > { %v1287_v55 = vpop.xlane.xlu0 %1286 }
0x18d5   : > { %vm1288_vm6 = vcmp.eq.f32.partialorder %v2565_v61, %v1287_v55  ;;  %vm1289_vm7 = vcmp.eq.f32.partialorder %v2567_v62, %v1287_v55 }
0x18d6   : > { %v1290_v56 = vsel %vm1288_vm6, -1.0, %v2909_v14  ;;  %v1291_v59 = vsel %vm1289_vm7, -1.0, %v2912_v47 }
0x18d7   : > { %v1292_v60 = vmax.f32 %v1290_v56, %v1291_v59 }
0x18d9   : > { %1293 = vmax.xlane.f32.xlu1 %v1292_v60 }
0x1966   : > { %v1294_v63 = vpop.xlane.xlu1 %1293 }
0x1967   : > { %vm1295_vm8 = vcmp.eq.f32.partialorder %v1290_v56, %v1294_v63  ;;  %vm1296_vm9 = vcmp.eq.f32.partialorder %v1291_v59, %v1294_v63  ;;  %v1396_v63 = vstv %s1395_s12 }
0x1968   : > { %v1297_v3 = vsel %vm1295_vm8, %v2565_v61, 256.0  ;;  %v1298_v35 = vsel %vm1296_vm9, %v2567_v62, 256.0 }
0x1969   : > { %v1299_v36 = vmin.f32 %v1297_v3, %v1298_v35  ;;  %v1397_v3 = vmax.f32 %v1396_v63, %v2903_v10  ;;  %v1398_v35 = vmax.f32 %v1396_v63, %v2906_v20 }
0x196b   : > { %1300 = vmin.xlane.f32.xlu1 %v1299_v36  ;;  %v1399_v36 = vstv %s1849_s7 }
0x19f8   : > { %v1301_v11 = vpop.xlane.xlu1 %1300 }
0x19f9   : > { %vm1302_vm10 = vcmp.eq.f32.partialorder %v2565_v61, %v1301_v11  ;;  %vm1303_vm11 = vcmp.eq.f32.partialorder %v2567_v62, %v1301_v11  ;;  %v1400_v11 = vmin.f32 %v1399_v36, %v1397_v3 }
0x19fa   : > { %v1304_v12 = vsel %vm1302_vm10, -1.0, %v1290_v56  ;;  %v1305_v13 = vsel %vm1303_vm11, -1.0, %v1291_v59 }
0x19fb   : > { %v1306_v19 = vmax.f32 %v1304_v12, %v1305_v13 }
0x19fd   : > { %1307 = vmax.xlane.f32.xlu0 %v1306_v19 }
0x1a8a   : > { %v1308_v15 = vpop.xlane.xlu0 %1307 }
0x1a8b   : > { %vm1309_vm12 = vcmp.eq.f32.partialorder %v1304_v12, %v1308_v15  ;;  %vm1310_vm13 = vcmp.eq.f32.partialorder %v1305_v13, %v1308_v15 }
0x1a8c   : > { %v1311_v21 = vsel %vm1309_vm12, %v2565_v61, 256.0  ;;  %v1312_v23 = vsel %vm1310_vm13, %v2567_v62, 256.0 }
0x1a8d   : > { %v1313_v22 = vmin.f32 %v1311_v21, %v1312_v23 }
0x1a8f   : > { %1314 = vmin.xlane.f32.xlu1 %v1313_v22 }
0x1b1c   : > { %v1315_v25 = vpop.xlane.xlu1 %1314 }
0x1b1d   : > { %vm1316_vm14 = vcmp.eq.f32.partialorder %v2565_v61, %v1315_v25  ;;  %vm1317_vm15 = vcmp.eq.f32.partialorder %v2567_v62, %v1315_v25 }
0x1b1e   : > { %v1318_v26 = vsel %vm1316_vm14, -1.0, %v1304_v12  ;;  %v1319_v24 = vsel %vm1317_vm15, -1.0, %v1305_v13  ;;  %v1401_v12 = vmin.f32 %v1399_v36, %v1398_v35  ;;  %v1402_v13 = vsub.f32 %v2903_v10, %v1400_v11 }
0x1b1f   : > { %v1320_v16 = vmax.f32 %v1318_v26, %v1319_v24 }
0x1b20   : > { %v1403_v15 = vsub.f32 %v2906_v20, %v1401_v12 }
0x1b21   : > { %1321 = vmax.xlane.f32.xlu0 %v1320_v16 }
0x1bae   : > { %v1322_v17 = vpop.xlane.xlu0 %1321 }
0x1baf   : > { %vm1323_vm0 = vcmp.eq.f32.partialorder %v1318_v26, %v1322_v17  ;;  %vm1324_vm1 = vcmp.eq.f32.partialorder %v1319_v24, %v1322_v17 }
0x1bb0   : > { %v1325_v27 = vsel %vm1323_vm0, %v2565_v61, 256.0  ;;  %v1326_v28 = vsel %vm1324_vm1, %v2567_v62, 256.0 }
0x1bb1   : > { %v1327_v29 = vmin.f32 %v1325_v27, %v1326_v28 }
0x1bb3   : > { %1328 = vmin.xlane.f32.xlu1 %v1327_v29 }
0x1c40   : > { %v1329_v52 = vpop.xlane.xlu1 %1328 }
0x1c41   : > { %vm1330_vm2 = vcmp.eq.f32.partialorder %v2565_v61, %v1329_v52  ;;  %vm1331_vm3 = vcmp.eq.f32.partialorder %v2567_v62, %v1329_v52 }
0x1c42   : > { %v1332_v57 = vsel %vm1330_vm2, -1.0, %v1318_v26  ;;  %v1333_v58 = vsel %vm1331_vm3, -1.0, %v1319_v24 }
0x1c43   : > { %v1334_v54 = vmax.f32 %v1332_v57, %v1333_v58 }
0x1c45   : > { %1335 = vmax.xlane.f32.xlu0 %v1334_v54 }
0x1cd2   : > { %v1336_v30 = vpop.xlane.xlu0 %1335 }
0x1cd3   : > { %vm1337_vm4 = vcmp.eq.f32.partialorder %v1332_v57, %v1336_v30  ;;  %vm1338_vm5 = vcmp.eq.f32.partialorder %v1333_v58, %v1336_v30 }
0x1cd4   : > { %v1339_v31 = vsel %vm1337_vm4, %v2565_v61, 256.0  ;;  %v1340_v32 = vsel %vm1338_vm5, %v2567_v62, 256.0 }
0x1cd5   : > { %v1341_v33 = vmin.f32 %v1339_v31, %v1340_v32 }
0x1cd7   : > { %1342 = vmin.xlane.f32.xlu1 %v1341_v33 }
0x1d64   : > { %v1343_v41 = vpop.xlane.xlu1 %1342 }
0x1d65   : > { %vm1344_vm6 = vcmp.eq.f32.partialorder %v2565_v61, %v1343_v41  ;;  %vm1345_vm7 = vcmp.eq.f32.partialorder %v2567_v62, %v1343_v41 }
0x1d66   : > { %v1346_v42 = vsel %vm1344_vm6, -1.0, %v1332_v57  ;;  %v1347_v37 = vsel %vm1345_vm7, -1.0, %v1333_v58 }
0x1d67   : > { %v1348_v38 = vmax.f32 %v1346_v42, %v1347_v37 }
0x1d69   : > { %1349 = vmax.xlane.f32.xlu0 %v1348_v38 }
0x1df6   : > { %v1350_v39 = vpop.xlane.xlu0 %1349 }
0x1df7   : > { %vm1351_vm8 = vcmp.eq.f32.partialorder %v1346_v42, %v1350_v39  ;;  %vm1352_vm9 = vcmp.eq.f32.partialorder %v1347_v37, %v1350_v39 }
0x1df8   : > { %v1353_v40 = vsel %vm1351_vm8, %v2565_v61, 256.0  ;;  %v1354_v18 = vsel %vm1352_vm9, %v2567_v62, 256.0 }
0x1df9   : > { %v1355_v1 = vmin.f32 %v1353_v40, %v1354_v18 }
0x1dfb   : > { %1356 = vmin.xlane.f32.xlu1 %v1355_v1 }
0x1e88   : > { %v1357_v2 = vpop.xlane.xlu1 %1356 }
0x1e89   : > { %vm1358_vm10 = vcmp.eq.f32.partialorder %v2565_v61, %v1357_v2  ;;  %vm1359_vm11 = vcmp.eq.f32.partialorder %v2567_v62, %v1357_v2 }
0x1e8a   : > { %v1360_v4 = vsel %vm1358_vm10, -1.0, %v1346_v42  ;;  %v1361_v5 = vsel %vm1359_vm11, -1.0, %v1347_v37 }
0x1e8b   : > { %v1362_v6 = vmax.f32 %v1360_v4, %v1361_v5 }
0x1e8d   : > { %1363 = vmax.xlane.f32.xlu0 %v1362_v6 }
0x1f1a   : > { %v1364_v7 = vpop.xlane.xlu0 %1363 }
0x1f1b   : > { %vm1365_vm12 = vcmp.eq.f32.partialorder %v1360_v4, %v1364_v7  ;;  %vm1366_vm13 = vcmp.eq.f32.partialorder %v1361_v5, %v1364_v7 }
0x1f1c   : > { %v1367_v8 = vsel %vm1365_vm12, %v2565_v61, 256.0  ;;  %v1368_v43 = vsel %vm1366_vm13, %v2567_v62, 256.0 }
0x1f1d   : > { %v1369_v9 = vmin.f32 %v1367_v8, %v1368_v43 }
0x1f1f   : > { %1370 = vmin.xlane.f32.xlu1 %v1369_v9 }
0x1fac   : > { %v1371_v44 = vpop.xlane.xlu1 %1370 }
0x1fad   : > { %vm1372_vm14 = vcmp.eq.f32.partialorder %v2565_v61, %v1371_v44  ;;  %vm1373_vm15 = vcmp.eq.f32.partialorder %v2567_v62, %v1371_v44 }
0x1fae   : > { %v1374_v45 = vsel %vm1372_vm14, -1.0, %v1360_v4  ;;  %v1375_v46 = vsel %vm1373_vm15, -1.0, %v1361_v5 }
0x1faf   : > { %v1376_v48 = vmax.f32 %v1374_v45, %v1375_v46 }
0x1fb1   : > { %1377 = vmax.xlane.f32.xlu0 %v1376_v48 }
0x203e   : > { %v1378_v49 = vpop.xlane.xlu0 %1377 }
0x203f   : > { %vm1379_vm0 = vcmp.eq.f32.partialorder %v1374_v45, %v1378_v49  ;;  %vm1380_vm1 = vcmp.eq.f32.partialorder %v1375_v46, %v1378_v49 }
0x2040   : > { %v1381_v50 = vsel %vm1379_vm0, %v2565_v61, 256.0  ;;  %v1382_v51 = vsel %vm1380_vm1, %v2567_v62, 256.0 }
0x2041   : > { %v1383_v53 = vmin.f32 %v1381_v50, %v1382_v51 }
0x2043   : > { %1384 = vmin.xlane.f32.xlu1 %v1383_v53 }
0x20d0   : > { %v1385_v55 = vpop.xlane.xlu1 %1384 }
0x20d1   : > { %vm1386_vm2 = vcmp.eq.f32.partialorder %v2565_v61, %v1385_v55  ;;  %vm1387_vm3 = vcmp.eq.f32.partialorder %v2567_v62, %v1385_v55 }
0x20d2   : > { %v1388_v56 = vsel %vm1386_vm2, -1.0, %v1374_v45  ;;  %v1389_v59 = vsel %vm1387_vm3, -1.0, %v1375_v46 }
0x20d3   : > { %v1390_v60 = vmax.f32 %v1388_v56, %v1389_v59 }
0x20d5   : > { %1391 = vmax.xlane.f32.xlu0 %v1390_v60 }
0x2162   : > { %v1392_v19 = vpop.xlane.xlu0 %1391 }
0x2163   : > { %vm1393_vm4 = vcmp.ge.f32.partialorder %v2909_v14, %v1392_v19  ;;  %vm1394_vm5 = vcmp.ge.f32.partialorder %v2912_v47, %v1392_v19 }
0x2164   : > { %v1404_v21 = vsel %vm1393_vm4, %v2903_v10, %v1402_v13  ;;  %v1405_v23 = vsel %vm1394_vm5, %v2906_v20, %v1403_v15 }
0x2165   : > { %v1406_v22 = vpack.c.bf16 %v1404_v21, %v1404_v21  ;;  %v1407_v25 = vpack.c.bf16 %v1405_v23, %v1405_v23 }
0x2167   : > { %1440 = vmatprep.mubr.bf16.mxu1 %v1407_v25 }
0x2168   : > { %1441 = vmatmul.mubr.bf16.vlgmr.msra.gmra.mrb[16].mxu1 %v1406_v22 }
0x223b   : > { %v1963_v26 = vpop.f32.mrb[16].mxu1 }
0x223c   : > { %v1964_v24 = vpop.f32.mrb[17].mxu1 }
0x223d   : > { %v1965_v16 = vadd.f32 %v1964_v24, %v1963_v26  ;;  %v1966_v17 = vpop.f32.mrb[18].mxu1 }
0x223e   : > { %v1967_v27 = vpop.f32.mrb[19].mxu1 }
0x223f   : > { %v1448_v28 = vsub.f32 %v1965_v16, %v2468_v0 }
0x2240   : > { %2193 = dma.done.wait [#allocation3 + $0x1], 2048 }
0x2241   : > { %2194 = vsyncadd [#allocation3 + $0x1], 4294965248  ;;  %1500 = vmatprep.mubr.bf16.mxu0 %v2231_v34  ;;  %v1453_v14 = vld [vmem:[#allocation2 + $0x88] sm:$0xff]  ;;  %v1452_v47 = vld [vmem:[#allocation2 + $0x80] sm:$0xff]  ;;  %v1451_v42 = vpack.c.bf16 %v1448_v28, %v1448_v28  ;;  %s1850_s9 = sld [smem:[#allocation10 + $0x5]]  ;;  %s1858_s24 = sshll.u32 %s2283_s19, 8 }
0x2242   : > { %v1455_v10 = vld [vmem:[#allocation2 + $0x98] sm:$0xff]  ;;  %1468 = vmatprep.subr.bf16.mxu0 %v1453_v14  ;;  %v1454_v20 = vld [vmem:[#allocation2 + $0x90] sm:$0xff]  ;;  %v1457_v29 = vld [vmem:[#allocation2 + $0xa8] sm:$0xff]  ;;  %s1701_s26 = sshll.u32 %s2538_s23, 4  ;;  %s3033_s27 = scalar_lea.hbm %s3085_s4, %s1858_s24  ;;  %s3035_s26 = int_to_ptr.vmem [resolvable:$true] %s1701_s26 }
0x2243   : > { %1469 = vmatpush1.bf16.msra.mxu0 %v1452_v47  ;;  %v1456_v52 = vld [vmem:[#allocation2 + $0xa0] sm:$0xff]  ;;  %v1459_v57 = vld [vmem:[#allocation2 + $0xb8] sm:$0xff]  ;;  %v1458_v58 = vld [vmem:[#allocation2 + $0xb0] sm:$0xff]  ;;  %s1687_s19 = scalar_lea.sflag [#allocation6], %s2412_s11  ;;  %s2127_s13 = scalar_lea.vmem %s3035_s26, 256 }
0x2244   : > { %1470 = vmatprep.subr.bf16.mxu0 %v1455_v10  ;;  %v1461_v0 = vld [vmem:[#allocation2 + $0xc8] sm:$0xff]  ;;  %v1460_v54 = vld [vmem:[#allocation2 + $0xc0] sm:$0xff]  ;;  %v1463_v34 = vld [vmem:[#allocation2 + $0xd8] sm:$0xff]  ;;  %p2128_p9 = scmp.ne.s32.totalorder %s3035_s26, %s2127_s13  ;;  %s2236_s21 = smov [#allocation11]  }
0x2245   : > { %v1462_v30 = vld [vmem:[#allocation2 + $0xd0] sm:$0xff]  ;;  %v1465_v31 = vld [vmem:[#allocation2 + $0xe8] sm:$0xff]  ;;  %v1464_v32 = vld [vmem:[#allocation2 + $0xe0] sm:$0xff]  ;;  %s2131_s14 = sshll.u32 %s2236_s21, 4  ;;  %s2132_s14 = int_to_ptr.vmem [resolvable:$false] %s2131_s14 }
0x2246   : > { %v1467_v33 = vld [vmem:[#allocation2 + $0xf8] sm:$0xff]  ;;  %v1466_v41 = vld [vmem:[#allocation2 + $0xf0] sm:$0xff]  ;;  %p2129_p12 = pnand %p2128_p9, %p2363_p7  ;;  %s2133_s30 = scalar_lea.vmem %s2132_s14, 512 }
0x2247   : > { %1471 = vmatpush1.bf16.msra.mxu0 %v1454_v20  ;;  %s1673_s20 = ssub.f32 0.0, %s1850_s9  ;;  %p2134_p1 = scmp.lt.s32.totalorder %s3035_s26, %s2132_s14 }
0x2248   : > { %1472 = vmatprep.subr.bf16.mxu0 %v1457_v29  ;;  %p2130_p10 = pneg %p2129_p12  ;;  %p2135_p6 = scmp.lt.s32.totalorder %s2133_s30, %s2127_s13 }
0x224a   : > { %p2136_p8 = por %p2135_p6, %p2134_p1 }
0x224b   : > { %1473 = vmatpush1.bf16.msra.mxu0 %v1456_v52 }
0x224c   : > { %1474 = vmatprep.subr.bf16.mxu0 %v1459_v57  ;;  %p2137_p13 = pnand %p2136_p8, %p2130_p10 }
0x224f   : > { %1475 = vmatpush1.bf16.msra.mxu0 %v1458_v58 }
0x2250   : > { %1476 = vmatprep.subr.bf16.mxu0 %v1461_v0 }
0x2253   : > { %1477 = vmatpush1.bf16.msra.mxu0 %v1460_v54 }
0x2254   : > { %1478 = vmatprep.subr.bf16.mxu0 %v1463_v34 }
0x2257   : > { %1479 = vmatpush1.bf16.msra.mxu0 %v1462_v30 }
0x2258   : > { %1480 = vmatprep.subr.bf16.mxu0 %v1465_v31 }
0x225b   : > { %1481 = vmatpush1.bf16.msra.mxu0 %v1464_v32 }
0x225c   : > { %1482 = vmatprep.subr.bf16.mxu0 %v1467_v33 }
0x225f   : > { %1483 = vmatpush1.bf16.msra.mxu0 %v1466_v41 }
0x2262   : > { %1501 = vmatmul.mubr.bf16.vlgmr.msra.gmra.mrb[20].mxu0 %v1451_v42 }
0x2335   : > { %v1502_v37 = vpop.f32.mrb[20].mxu0 }
0x2336   : > { %v2962_v38 = vsub.f32 %v1404_v21, %v1502_v37  ;;  %v1504_v39 = vpop.f32.mrb[21].mxu0 }
0x2337   : > { %v2964_v40 = vsub.f32 %v1405_v23, %v1504_v39  ;;  %v1506_v18 = vpop.f32.mrb[22].mxu0 }
0x2338   : > { %v1507_v1 = vpop.f32.mrb[23].mxu0  ;;  %v2967_v2 = vand.u32 2147483647, %v2962_v38 }
0x2339   : > { %v2970_v4 = vand.u32 2147483647, %v2964_v40 }
0x233b   : > { %v1514_v5 = vmax.f32 %v2967_v2, %v2970_v4 }
0x233d   : > { %1515 = vmax.xlane.f32.xlu0 %v1514_v5 }
0x23ca   : > { %v1516_v6 = vpop.xlane.xlu0 %1515 }
0x23cb   : > { %vm1517_vm6 = vcmp.eq.f32.partialorder %v2967_v2, %v1516_v6  ;;  %vm1518_vm7 = vcmp.eq.f32.partialorder %v2970_v4, %v1516_v6 }
0x23cc   : > { %v1519_v7 = vsel %vm1517_vm6, %v2565_v61, 256.0  ;;  %v1520_v8 = vsel %vm1518_vm7, %v2567_v62, 256.0 }
0x23cd   : > { %v1521_v43 = vmin.f32 %v1519_v7, %v1520_v8 }
0x23cf   : > { %1522 = vmin.xlane.f32.xlu0 %v1521_v43 }
0x245c   : > { %v1523_v9 = vpop.xlane.xlu0 %1522 }
0x245d   : > { %vm1524_vm8 = vcmp.eq.f32.partialorder %v2565_v61, %v1523_v9  ;;  %vm1525_vm9 = vcmp.eq.f32.partialorder %v2567_v62, %v1523_v9 }
0x245e   : > { %v1526_v44 = vsel %vm1524_vm8, -1.0, %v2967_v2  ;;  %v1527_v45 = vsel %vm1525_vm9, -1.0, %v2970_v4 }
0x245f   : > { %v1528_v46 = vmax.f32 %v1526_v44, %v1527_v45 }
0x2461   : > { %1529 = vmax.xlane.f32.xlu1 %v1528_v46 }
0x24ee   : > { %v1530_v48 = vpop.xlane.xlu1 %1529 }
0x24ef   : > { %vm1531_vm10 = vcmp.eq.f32.partialorder %v1526_v44, %v1530_v48  ;;  %vm1532_vm11 = vcmp.eq.f32.partialorder %v1527_v45, %v1530_v48 }
0x24f0   : > { %v1533_v49 = vsel %vm1531_vm10, %v2565_v61, 256.0  ;;  %v1534_v50 = vsel %vm1532_vm11, %v2567_v62, 256.0 }
0x24f1   : > { %v1535_v51 = vmin.f32 %v1533_v49, %v1534_v50 }
0x24f3   : > { %1536 = vmin.xlane.f32.xlu1 %v1535_v51 }
0x2580   : > { %v1537_v53 = vpop.xlane.xlu1 %1536 }
0x2581   : > { %vm1538_vm12 = vcmp.eq.f32.partialorder %v2565_v61, %v1537_v53  ;;  %vm1539_vm13 = vcmp.eq.f32.partialorder %v2567_v62, %v1537_v53 }
0x2582   : > { %v1540_v55 = vsel %vm1538_vm12, -1.0, %v1526_v44  ;;  %v1541_v56 = vsel %vm1539_vm13, -1.0, %v1527_v45 }
0x2583   : > { %v1542_v59 = vmax.f32 %v1540_v55, %v1541_v56 }
0x2585   : > { %1543 = vmax.xlane.f32.xlu0 %v1542_v59 }
0x2612   : > { %v1544_v60 = vpop.xlane.xlu0 %1543 }
0x2613   : > { %vm1545_vm14 = vcmp.eq.f32.partialorder %v1540_v55, %v1544_v60  ;;  %vm1546_vm15 = vcmp.eq.f32.partialorder %v1541_v56, %v1544_v60 }
0x2614   : > { %v1547_v63 = vsel %vm1545_vm14, %v2565_v61, 256.0  ;;  %v1548_v3 = vsel %vm1546_vm15, %v2567_v62, 256.0 }
0x2615   : > { %v1549_v35 = vmin.f32 %v1547_v63, %v1548_v3 }
0x2617   : > { %1550 = vmin.xlane.f32.xlu1 %v1549_v35 }
0x26a4   : > { %v1551_v36 = vpop.xlane.xlu1 %1550 }
0x26a5   : > { %vm1552_vm0 = vcmp.eq.f32.partialorder %v2565_v61, %v1551_v36  ;;  %vm1553_vm1 = vcmp.eq.f32.partialorder %v2567_v62, %v1551_v36 }
0x26a6   : > { %v1554_v11 = vsel %vm1552_vm0, -1.0, %v1540_v55  ;;  %v1555_v12 = vsel %vm1553_vm1, -1.0, %v1541_v56 }
0x26a7   : > { %v1556_v13 = vmax.f32 %v1554_v11, %v1555_v12 }
0x26a9   : > { %1557 = vmax.xlane.f32.xlu0 %v1556_v13 }
0x2736   : > { %v1558_v19 = vpop.xlane.xlu0 %1557 }
0x2737   : > { %vm1559_vm2 = vcmp.eq.f32.partialorder %v1554_v11, %v1558_v19  ;;  %vm1560_vm3 = vcmp.eq.f32.partialorder %v1555_v12, %v1558_v19 }
0x2738   : > { %v1561_v15 = vsel %vm1559_vm2, %v2565_v61, 256.0  ;;  %v1562_v21 = vsel %vm1560_vm3, %v2567_v62, 256.0 }
0x2739   : > { %v1563_v23 = vmin.f32 %v1561_v15, %v1562_v21 }
0x273b   : > { %1564 = vmin.xlane.f32.xlu1 %v1563_v23 }
0x27c8   : > { %v1565_v22 = vpop.xlane.xlu1 %1564 }
0x27c9   : > { %vm1566_vm4 = vcmp.eq.f32.partialorder %v2565_v61, %v1565_v22  ;;  %vm1567_vm5 = vcmp.eq.f32.partialorder %v2567_v62, %v1565_v22 }
0x27ca   : > { %v1568_v25 = vsel %vm1566_vm4, -1.0, %v1554_v11  ;;  %v1569_v26 = vsel %vm1567_vm5, -1.0, %v1555_v12 }
0x27cb   : > { %v1570_v24 = vmax.f32 %v1568_v25, %v1569_v26 }
0x27cd   : > { %1571 = vmax.xlane.f32.xlu0 %v1570_v24 }
0x285a   : > { %v1572_v16 = vpop.xlane.xlu0 %1571 }
0x285b   : > { %vm1573_vm6 = vcmp.eq.f32.partialorder %v1568_v25, %v1572_v16  ;;  %vm1574_vm7 = vcmp.eq.f32.partialorder %v1569_v26, %v1572_v16 }
0x285c   : > { %v1575_v17 = vsel %vm1573_vm6, %v2565_v61, 256.0  ;;  %v1576_v27 = vsel %vm1574_vm7, %v2567_v62, 256.0 }
0x285d   : > { %v1577_v28 = vmin.f32 %v1575_v17, %v1576_v27  ;;  %v1677_v17 = vstv %s1850_s9 }
0x285f   : > { %1578 = vmin.xlane.f32.xlu1 %v1577_v28 }
0x28ec   : > { %v1579_v14 = vpop.xlane.xlu1 %1578 }
0x28ed   : > { %vm1580_vm8 = vcmp.eq.f32.partialorder %v2565_v61, %v1579_v14  ;;  %vm1581_vm9 = vcmp.eq.f32.partialorder %v2567_v62, %v1579_v14 }
0x28ee   : > { %v1582_v47 = vsel %vm1580_vm8, -1.0, %v1568_v25  ;;  %v1583_v10 = vsel %vm1581_vm9, -1.0, %v1569_v26  ;;  %v1674_v26 = vstv %s1673_s20 }
0x28ef   : > { %v1584_v20 = vmax.f32 %v1582_v47, %v1583_v10  ;;  %v1675_v24 = vmax.f32 %v1674_v26, %v2962_v38  ;;  %v1676_v16 = vmax.f32 %v1674_v26, %v2964_v40 }
0x28f1   : > { %1585 = vmax.xlane.f32.xlu0 %v1584_v20  ;;  %v1678_v27 = vmin.f32 %v1677_v17, %v1675_v24  ;;  %v1679_v28 = vmin.f32 %v1677_v17, %v1676_v16 }
0x297e   : > { %v1586_v29 = vpop.xlane.xlu0 %1585 }
0x297f   : > { %vm1587_vm10 = vcmp.eq.f32.partialorder %v1582_v47, %v1586_v29  ;;  %vm1588_vm11 = vcmp.eq.f32.partialorder %v1583_v10, %v1586_v29 }
0x2980   : > { %v1589_v52 = vsel %vm1587_vm10, %v2565_v61, 256.0  ;;  %v1590_v57 = vsel %vm1588_vm11, %v2567_v62, 256.0 }
0x2981   : > { %v1591_v58 = vmin.f32 %v1589_v52, %v1590_v57 }
0x2983   : > { %1592 = vmin.xlane.f32.xlu1 %v1591_v58 }
0x2a10   : > { %v1593_v0 = vpop.xlane.xlu1 %1592 }
0x2a11   : > { %vm1594_vm12 = vcmp.eq.f32.partialorder %v2565_v61, %v1593_v0  ;;  %vm1595_vm13 = vcmp.eq.f32.partialorder %v2567_v62, %v1593_v0 }
0x2a12   : > { %v1596_v54 = vsel %vm1594_vm12, -1.0, %v1582_v47  ;;  %v1597_v34 = vsel %vm1595_vm13, -1.0, %v1583_v10 }
0x2a13   : > { %v1598_v30 = vmax.f32 %v1596_v54, %v1597_v34 }
0x2a15   : > { %1599 = vmax.xlane.f32.xlu0 %v1598_v30 }
0x2aa2   : > { %v1600_v31 = vpop.xlane.xlu0 %1599 }
0x2aa3   : > { %vm1601_vm14 = vcmp.eq.f32.partialorder %v1596_v54, %v1600_v31  ;;  %vm1602_vm15 = vcmp.eq.f32.partialorder %v1597_v34, %v1600_v31 }
0x2aa4   : > { %v1603_v32 = vsel %vm1601_vm14, %v2565_v61, 256.0  ;;  %v1604_v33 = vsel %vm1602_vm15, %v2567_v62, 256.0 }
0x2aa5   : > { %v1605_v41 = vmin.f32 %v1603_v32, %v1604_v33 }
0x2aa7   : > { %1606 = vmin.xlane.f32.xlu1 %v1605_v41 }
0x2b34   : > { %v1607_v42 = vpop.xlane.xlu1 %1606 }
0x2b35   : > { %vm1608_vm0 = vcmp.eq.f32.partialorder %v2565_v61, %v1607_v42  ;;  %vm1609_vm1 = vcmp.eq.f32.partialorder %v2567_v62, %v1607_v42 }
0x2b36   : > { %v1610_v37 = vsel %vm1608_vm0, -1.0, %v1596_v54  ;;  %v1611_v39 = vsel %vm1609_vm1, -1.0, %v1597_v34 }
0x2b37   : > { %v1612_v18 = vmax.f32 %v1610_v37, %v1611_v39 }
0x2b39   : > { %1613 = vmax.xlane.f32.xlu0 %v1612_v18 }
0x2bc6   : > { %v1614_v1 = vpop.xlane.xlu0 %1613 }
0x2bc7   : > { %vm1615_vm2 = vcmp.eq.f32.partialorder %v1610_v37, %v1614_v1  ;;  %vm1616_vm3 = vcmp.eq.f32.partialorder %v1611_v39, %v1614_v1 }
0x2bc8   : > { %v1617_v5 = vsel %vm1615_vm2, %v2565_v61, 256.0  ;;  %v1618_v6 = vsel %vm1616_vm3, %v2567_v62, 256.0 }
0x2bc9   : > { %v1619_v7 = vmin.f32 %v1617_v5, %v1618_v6 }
0x2bcb   : > { %1620 = vmin.xlane.f32.xlu1 %v1619_v7 }
0x2c58   : > { %v1621_v8 = vpop.xlane.xlu1 %1620 }
0x2c59   : > { %vm1622_vm4 = vcmp.eq.f32.partialorder %v2565_v61, %v1621_v8  ;;  %vm1623_vm5 = vcmp.eq.f32.partialorder %v2567_v62, %v1621_v8 }
0x2c5a   : > { %v1624_v43 = vsel %vm1622_vm4, -1.0, %v1610_v37  ;;  %v1625_v9 = vsel %vm1623_vm5, -1.0, %v1611_v39 }
0x2c5b   : > { %v1626_v44 = vmax.f32 %v1624_v43, %v1625_v9 }
0x2c5d   : > { %1627 = vmax.xlane.f32.xlu0 %v1626_v44 }
0x2cea   : > { %v1628_v45 = vpop.xlane.xlu0 %1627 }
0x2ceb   : > { %vm1629_vm6 = vcmp.eq.f32.partialorder %v1624_v43, %v1628_v45  ;;  %vm1630_vm7 = vcmp.eq.f32.partialorder %v1625_v9, %v1628_v45 }
0x2cec   : > { %v1631_v46 = vsel %vm1629_vm6, %v2565_v61, 256.0  ;;  %v1632_v48 = vsel %vm1630_vm7, %v2567_v62, 256.0 }
0x2ced   : > { %v1633_v49 = vmin.f32 %v1631_v46, %v1632_v48 }
0x2cef   : > { %1634 = vmin.xlane.f32.xlu1 %v1633_v49 }
0x2d7c   : > { %v1635_v50 = vpop.xlane.xlu1 %1634 }
0x2d7d   : > { %vm1636_vm8 = vcmp.eq.f32.partialorder %v2565_v61, %v1635_v50  ;;  %vm1637_vm9 = vcmp.eq.f32.partialorder %v2567_v62, %v1635_v50 }
0x2d7e   : > { %v1638_v51 = vsel %vm1636_vm8, -1.0, %v1624_v43  ;;  %v1639_v53 = vsel %vm1637_vm9, -1.0, %v1625_v9 }
0x2d7f   : > { %v1640_v55 = vmax.f32 %v1638_v51, %v1639_v53 }
0x2d81   : > { %1641 = vmax.xlane.f32.xlu0 %v1640_v55 }
0x2e0e   : > { %v1642_v56 = vpop.xlane.xlu0 %1641 }
0x2e0f   : > { %vm1643_vm10 = vcmp.eq.f32.partialorder %v1638_v51, %v1642_v56  ;;  %vm1644_vm11 = vcmp.eq.f32.partialorder %v1639_v53, %v1642_v56 }
0x2e10   : > { %v1645_v59 = vsel %vm1643_vm10, %v2565_v61, 256.0  ;;  %v1646_v60 = vsel %vm1644_vm11, %v2567_v62, 256.0 }
0x2e11   : > { %v1647_v63 = vmin.f32 %v1645_v59, %v1646_v60 }
0x2e13   : > { %1648 = vmin.xlane.f32.xlu1 %v1647_v63 }
0x2ea0   : > { %v1649_v3 = vpop.xlane.xlu1 %1648 }
0x2ea1   : > { %vm1650_vm12 = vcmp.eq.f32.partialorder %v2565_v61, %v1649_v3  ;;  %vm1651_vm13 = vcmp.eq.f32.partialorder %v2567_v62, %v1649_v3 }
0x2ea2   : > { %v1652_v35 = vsel %vm1650_vm12, -1.0, %v1638_v51  ;;  %v1653_v36 = vsel %vm1651_vm13, -1.0, %v1639_v53 }
0x2ea3   : > { %v1654_v11 = vmax.f32 %v1652_v35, %v1653_v36 }
0x2ea5   : > { %1655 = vmax.xlane.f32.xlu0 %v1654_v11 }
0x2f32   : > { %v1656_v12 = vpop.xlane.xlu0 %1655 }
0x2f33   : > { %vm1657_vm14 = vcmp.eq.f32.partialorder %v1652_v35, %v1656_v12  ;;  %vm1658_vm15 = vcmp.eq.f32.partialorder %v1653_v36, %v1656_v12 }
0x2f34   : > { %v1659_v13 = vsel %vm1657_vm14, %v2565_v61, 256.0  ;;  %v1660_v19 = vsel %vm1658_vm15, %v2567_v62, 256.0 }
0x2f35   : > { %v1661_v15 = vmin.f32 %v1659_v13, %v1660_v19 }
0x2f37   : > { %1662 = vmin.xlane.f32.xlu1 %v1661_v15 }
0x2fc4   : > { %v1663_v21 = vpop.xlane.xlu1 %1662 }
0x2fc5   : > { %vm1664_vm0 = vcmp.eq.f32.partialorder %v2565_v61, %v1663_v21  ;;  %vm1665_vm1 = vcmp.eq.f32.partialorder %v2567_v62, %v1663_v21  ;;  %v1680_v61 = vsub.f32 %v2962_v38, %v1678_v27  ;;  %v1681_v62 = vsub.f32 %v2964_v40, %v1679_v28 }
0x2fc6   : > { %v1666_v23 = vsel %vm1664_vm0, -1.0, %v1652_v35  ;;  %v1667_v22 = vsel %vm1665_vm1, -1.0, %v1653_v36 }
0x2fc7   : > { %v1668_v25 = vmax.f32 %v1666_v23, %v1667_v22 }
0x2fc9   : > { %1669 = vmax.xlane.f32.xlu0 %v1668_v25 }
0x3056   : > { %v1670_v14 = vpop.xlane.xlu0 %1669 }
0x3057   : > { %vm1671_vm2 = vcmp.ge.f32.partialorder %v2967_v2, %v1670_v14  ;;  %vm1672_vm3 = vcmp.ge.f32.partialorder %v2970_v4, %v1670_v14 }
0x3058   : > { %v1682_v47 = vsel %vm1671_vm2, %v2962_v38, %v1680_v61  ;;  %v1683_v10 = vsel %vm1672_vm3, %v2964_v40, %v1681_v62 }
0x3059   : > { %1684 = vst [vmem:[%s2538_s23] sm:$0xff] %v1682_v47  ;;  %1685 = vst [vmem:[%s2538_s23 + $0x8] sm:$0xff] %v1683_v10 }
0x305a   : > { %2140 = shalt.err (!%p2137_p13)
}
0x305b   : > { %s2141_s11 = scalar_lea.hbm %s3033_s27, 256  ;;  %s2145_s8 = scalar_lea.hbm %s3085_s4, 512 }
0x305c   : > { %p2142_p4 = scmp.ne.s32.totalorder %s3033_s27, %s2141_s11  ;;  %p2146_p0 = scmp.lt.u32.totalorder %s3033_s27, %s3085_s4 }
0x305d   : > { %p2147_p3 = scmp.lt.u32.totalorder %s2145_s8, %s2141_s11  ;;  %p2149_p9 = scmp.lt.u32.totalorder %s2141_s11, %s3033_s27 }
0x305e   : > { %p2143_p2 = pnand %p2142_p4, %p2363_p7 }
0x305f   : > { %p2148_p5 = por %p2147_p3, %p2146_p0 }
0x3060   : > { %p2144_p11 = pneg %p2143_p2 }
0x3061   : > { %p2150_p12 = por %p2149_p9, %p2148_p5 }
0x3063   : > { %p2151_p10 = pnand %p2150_p12, %p2144_p11 }
0x3065   : > { %2154 = shalt.err (!%p2151_p10)
}
0x3066   : > { %1979 = dma.vmem_to_hbm [thread:$0]  (%p2363_p7), %s3035_s26, 256, %s3033_s27, %s1687_s19  }
0x3067 PF: > { %s1713_s9 = sand.u32 1, %s2201_s15   ;;  %p3106_p1 = scmp.ne.s32.totalorder %s3092_s22, 0 }
0x3068   : > { %p3107_p6 = scmp.ge.s32.totalorder %s2213_s18, 2  ;;  %s1714_s20 = scalar_lea.sflag [#allocation6], %s1713_s9 }
0x306a   : > { %p1993_p8 = pnand %p3107_p6, %p3106_p1 }
0x306c   : > { %2196 = dma.done.wait (!%p1993_p8), %s1714_s20, 256  }
0x306d   : > { %2198 = vsyncadd (!%p1993_p8), %s1714_s20, 4294967040  ;;  %p19_p13 = scmp.ge.s32.totalorder %s2353_s25, 4   ;;  %s3108_s15 = smov %s2205_s16 }
0x306e   : > { %s3109_s16 = smov %s2209_s17  ;;  %s3110_s17 = smov %s2369_s5 }
0x306f   : > { %s3111_s18 = smov %s2353_s25  ;;  %21 = sbr.rel (!%p19_p13) target bundleno = 7 (0x7), region = 142 }
0x3076   :  { %1719 = vsyncpa [#allocation5], 1 }
0x3077   :  { %1721 = vsyncpa [#allocation5 + $0x1], 1 }
0x3078   :  { %1722 = vsyncpa [#allocation9], 1 }
0x3079   :  { %1723 = vsyncpa [#allocation6], 1 }
0x307a   :  { %1725 = vsyncpa [#allocation6 + $0x1], 1 }
0x307b   :  { %1726 = vsyncpa [#allocation7], 1 }
0x307c   :  { %1728 = vsyncpa [#allocation7 + $0x1], 1 }
0x307d   :  { %1729 = vsyncmov [#allocation3] }
0x3080   :  { %s1730_s18 = vpop.sfrf %1729 }
0x3081   :  { %p1856_p7 = scmp.ne.s32.totalorder %s1730_s18, 0 }
0x3083   :  { %1734 = shalt.err (%p1856_p7)  }
0x3084   :  { %1736 = vsyncmov [#allocation3 + $0x1] }
0x3087   :  { %s1737_s22 = vpop.sfrf %1736 }
0x3088   :  { %p1857_p4 = scmp.ne.s32.totalorder %s1737_s22, 0 }
0x308a   :  { %1741 = shalt.err (%p1857_p4)  }

</bundles_post_ra>
